<compile_context>
chip_gen: v6e
topology: v6e:2x2x1
jax: 0.10.0
libtpu: 0.0.40
codegen_flags: <defaults>
</compile_context>

<pallas_src>
import jax
import jax.numpy as jnp
from jax import lax
from jax.experimental import pallas as pl
from jax.experimental.pallas import tpu as pltpu

LANE = 128
TILE_M_TARGET = 512        # ~85% of HBM roofline per measured tiling curve;
                           # per-tile VMEM (<2 MiB double-buffered) fits the
                           # 32 MiB scoped default on v7x as well.

VMEM_SPEC = pl.BlockSpec(memory_space=pltpu.MemorySpace.VMEM)


def _round_up(x, m):
    return (x + m - 1) // m * m


def _pick_tile_m(m, target=TILE_M_TARGET):
    t = min(m, target)
    while t > 1 and m % t:
        t //= 2
    return t


# ----------------------------- Pallas kernels ------------------------------ #

def _linear_kernel(x_ref, w_ref, b_ref, o_ref):
    # decoder_input: Linear(latent_dim -> hidden_dims[-1]); tiny, single block.
    o_ref[...] = (jnp.dot(x_ref[...], w_ref[...],
                          preferred_element_type=jnp.float32) + b_ref[...])


def _conv_stats_kernel(cols_ref, w_ref, b_ref, o_ref, stats_ref):
    # cols: [TM, 9*Cin] bf16, w: [9*Cin, Cp] bf16 -> one MXU matmul (K = 9*Cin).
    acc = jnp.dot(cols_ref[...], w_ref[...],
                  preferred_element_type=jnp.float32) + b_ref[...]
    o_ref[...] = acc
    # one-pass per-tile partial BatchNorm statistics (sum, sum of squares)
    s = jnp.sum(acc, axis=0, keepdims=True)
    ss = jnp.sum(acc * acc, axis=0, keepdims=True)
    stats_ref[...] = jnp.concatenate([s, ss], axis=0).reshape(1, 2, -1)


def _bn_lrelu_kernel(x_ref, scale_ref, shift_ref, o_ref):
    # fused BatchNorm affine (precomputed global scale/shift) + LeakyReLU(0.01)
    y = x_ref[...] * scale_ref[...] + shift_ref[...]
    o_ref[...] = jnp.where(y >= 0, y, 0.01 * y)


def _conv_tanh_kernel(cols_ref, w_ref, b_ref, o_ref):
    acc = jnp.dot(cols_ref[...], w_ref[...],
                  preferred_element_type=jnp.float32) + b_ref[...]
    o_ref[...] = jnp.tanh(acc)


# --------------------------- pallas_call wrappers --------------------------- #

def pallas_linear(x, w, b):
    out_shape = jax.ShapeDtypeStruct((x.shape[0], w.shape[1]), jnp.float32)
    return pl.pallas_call(_linear_kernel, out_shape=out_shape,
                          in_specs=[VMEM_SPEC] * 3,
                          out_specs=VMEM_SPEC)(x, w, b)


def pallas_conv_stats(cols, wpad, bpad, tile_m):
    m, k = cols.shape
    cp = wpad.shape[1]
    nt = m // tile_m
    grid_spec = pltpu.PrefetchScalarGridSpec(
        num_scalar_prefetch=0, grid=(nt,),
        in_specs=[pl.BlockSpec((tile_m, k), lambda i: (i, 0)),
                  pl.BlockSpec((k, cp), lambda i: (0, 0)),
                  pl.BlockSpec((1, cp), lambda i: (0, 0))],
        out_specs=[pl.BlockSpec((tile_m, cp), lambda i: (i, 0)),
                   pl.BlockSpec((1, 2, cp), lambda i: (i, 0, 0))])
    return pl.pallas_call(
        _conv_stats_kernel,
        out_shape=(jax.ShapeDtypeStruct((m, cp), jnp.float32),
                   jax.ShapeDtypeStruct((nt, 2, cp), jnp.float32)),
        grid_spec=grid_spec,
        compiler_params=pltpu.CompilerParams(
            dimension_semantics=("parallel",)),
    )(cols, wpad, bpad)


def pallas_bn_lrelu(x, scale, shift, tile_m):
    m, cp = x.shape
    nt = m // tile_m
    grid_spec = pltpu.PrefetchScalarGridSpec(
        num_scalar_prefetch=0, grid=(nt,),
        in_specs=[pl.BlockSpec((tile_m, cp), lambda i: (i, 0)),
                  pl.BlockSpec((1, cp), lambda i: (0, 0)),
                  pl.BlockSpec((1, cp), lambda i: (0, 0))],
        out_specs=pl.BlockSpec((tile_m, cp), lambda i: (i, 0)))
    return pl.pallas_call(
        _bn_lrelu_kernel,
        out_shape=jax.ShapeDtypeStruct((m, cp), jnp.float32),
        grid_spec=grid_spec,
        compiler_params=pltpu.CompilerParams(
            dimension_semantics=("parallel",)),
    )(x, scale, shift)


def pallas_conv_tanh(cols, wpad, bpad, tile_m):
    m, k = cols.shape
    cp = wpad.shape[1]
    nt = m // tile_m
    grid_spec = pltpu.PrefetchScalarGridSpec(
        num_scalar_prefetch=0, grid=(nt,),
        in_specs=[pl.BlockSpec((tile_m, k), lambda i: (i, 0)),
                  pl.BlockSpec((k, cp), lambda i: (0, 0)),
                  pl.BlockSpec((1, cp), lambda i: (0, 0))],
        out_specs=pl.BlockSpec((tile_m, cp), lambda i: (i, 0)))
    return pl.pallas_call(
        _conv_tanh_kernel,
        out_shape=jax.ShapeDtypeStruct((m, cp), jnp.float32),
        grid_spec=grid_spec,
        compiler_params=pltpu.CompilerParams(
            dimension_semantics=("parallel",)),
    )(cols, wpad, bpad)


# ------------------------------- JAX glue ----------------------------------- #

def _im2col_flat(xpad, ho, wo):
    """xpad: [N, Hp, Wp, C] -> [N*ho*wo, 9*C] (3x3 valid-conv patches, tap-major)."""
    n, _, _, c = xpad.shape
    taps = [xpad[:, kh:kh + ho, kw:kw + wo, :]
            for kh in range(3) for kw in range(3)]
    return jnp.concatenate(taps, axis=-1).reshape(n * ho * wo, 9 * c)


def convT_bn_lrelu(x_nhwc, w_t, b, gamma, beta):
    """ConvTranspose2d(k=3,s=2,p=1,op=1) + BatchNorm2d (train stats) + LeakyReLU."""
    n, h, w, cin = x_nhwc.shape
    cout = w_t.shape[1]                       # PyTorch layout [Cin, Cout, 3, 3]
    ho, wo = 2 * h, 2 * w
    m = n * ho * wo
    cp = _round_up(cout, LANE)                # lane-dense output stores
    tile_m = _pick_tile_m(m)

    # equivalent forward-conv weight: flip spatially, reorder to HWIO, flatten
    wconv = jnp.transpose(w_t[:, :, ::-1, ::-1], (2, 3, 0, 1)).reshape(9 * cin, cout)
    wpad = jnp.pad(wconv, ((0, 0), (0, cp - cout))).astype(jnp.bfloat16)
    bpad = jnp.pad(b, (0, cp - cout)).reshape(1, cp)

    # dilate-by-2 (interior zeros) + asymmetric pad (1 lo, 2 hi), compact im2col
    # TODO(synk): sub-pixel decomposition of the ConvTranspose (4 phase convs on
    # the un-dilated input) would avoid forming / multiplying the interior zeros.
    xpad = lax.pad(x_nhwc, jnp.float32(0.0),
                   ((0, 0, 0), (1, 2, 1), (1, 2, 1), (0, 0, 0)))
    cols = _im2col_flat(xpad, ho, wo).astype(jnp.bfloat16)

    conv, stats = pallas_conv_stats(cols, wpad, bpad, tile_m)

    # finalize global training-mode BatchNorm stats (biased variance) in one pass
    tot = jnp.sum(stats, axis=0)                      # [2, Cp]
    mean = tot[0] / m
    var = jnp.maximum(tot[1] / m - mean * mean, 0.0)
    gpad = jnp.pad(gamma, (0, cp - cout))
    betap = jnp.pad(beta, (0, cp - cout))
    scale_v = gpad * lax.rsqrt(var + 1e-5)
    shift_v = betap - mean * scale_v

    y = pallas_bn_lrelu(conv, scale_v.reshape(1, cp), shift_v.reshape(1, cp),
                        tile_m)
    return y[:, :cout].reshape(n, ho, wo, cout)


def conv_tanh(x_nhwc, w_c, b):
    """Conv2d(k=3, s=1, p=1) + Tanh."""
    n, h, w, cin = x_nhwc.shape
    cout = w_c.shape[0]                       # PyTorch layout [Cout, Cin, 3, 3]
    m = n * h * w
    cp = _round_up(cout, LANE)
    tile_m = _pick_tile_m(m)

    wconv = jnp.transpose(w_c, (2, 3, 1, 0)).reshape(9 * cin, cout)
    wpad = jnp.pad(wconv, ((0, 0), (0, cp - cout))).astype(jnp.bfloat16)
    bpad = jnp.pad(b, (0, cp - cout)).reshape(1, cp)

    xpad = lax.pad(x_nhwc, jnp.float32(0.0),
                   ((0, 0, 0), (1, 1, 0), (1, 1, 0), (0, 0, 0)))
    cols = _im2col_flat(xpad, h, w).astype(jnp.bfloat16)

    y = pallas_conv_tanh(cols, wpad, bpad, tile_m)
    return y[:, :cout].reshape(n, h, w, cout)


# ------------------------------ parameters ---------------------------------- #

def init_params(key, hidden_dims, latent_dim):
    hd = list(hidden_dims)[::-1]              # mirrors hidden_dims.reverse()
    keys = iter(jax.random.split(key, 64))
    p = {}
    # nn.Linear(latent_dim, hidden_dims[-1]); stored as [in, out] for matmul
    p['lin_w'] = jax.random.normal(next(keys), (latent_dim, hd[0]), jnp.float32) * 0.1
    p['lin_b'] = jax.random.normal(next(keys), (hd[0],), jnp.float32) * 0.05
    layers = []
    for i in range(len(hd) - 1):
        layers.append(dict(
            w=jax.random.normal(next(keys), (hd[i], hd[i + 1], 3, 3), jnp.float32) * 0.1,
            b=jax.random.normal(next(keys), (hd[i + 1],), jnp.float32) * 0.05,
            gamma=jnp.ones((hd[i + 1],), jnp.float32),
            beta=jnp.zeros((hd[i + 1],), jnp.float32)))
    p['decoder'] = layers
    p['final_ct'] = dict(
        w=jax.random.normal(next(keys), (hd[-1], hd[-1], 3, 3), jnp.float32) * 0.1,
        b=jax.random.normal(next(keys), (hd[-1],), jnp.float32) * 0.05,
        gamma=jnp.ones((hd[-1],), jnp.float32),
        beta=jnp.zeros((hd[-1],), jnp.float32))
    p['final_conv_w'] = jax.random.normal(next(keys), (3, hd[-1], 3, 3), jnp.float32) * 0.1
    p['final_conv_b'] = jax.random.normal(next(keys), (3,), jnp.float32) * 0.05
    return p


# -------------------------------- forward ----------------------------------- #

def decoder_forward(z, p):
    # x = self.decoder_input(z)
    h = pallas_linear(z, p['lin_w'], p['lin_b'].reshape(1, -1))      # [B, C0]
    b, c0 = h.shape
    # x = x.view(-1, C, 1, 1)  (NCHW)  ->  NHWC [B, 1, 1, C0]
    x = h.reshape(b, 1, 1, c0)
    # self.decoder: (ConvT + BN + LeakyReLU) blocks, each doubles H, W
    for lyr in p['decoder']:
        x = convT_bn_lrelu(x, lyr['w'], lyr['b'], lyr['gamma'], lyr['beta'])
    # self.final_layer: ConvT + BN + LeakyReLU + Conv2d(->3) + Tanh
    fc = p['final_ct']
    x = convT_bn_lrelu(x, fc['w'], fc['b'], fc['gamma'], fc['beta'])
    x = conv_tanh(x, p['final_conv_w'], p['final_conv_b'])
    # back to NCHW to match the PyTorch module output convention
    return jnp.transpose(x, (0, 3, 1, 2))


if __name__ == "__main__":
    hidden_dims = [8, 16, 32, 64]   # reversed internally -> [64, 32, 16, 8]
    latent_dim = 8
    batch = 2

    key = jax.random.PRNGKey(0)
    kp, kz = jax.random.split(key)
    params = init_params(kp, hidden_dims, latent_dim)
    z = jax.random.normal(kz, (batch, latent_dim), jnp.float32)

    out = jax.jit(decoder_forward)(z, params)
    out = jax.block_until_ready(out)

    expected_hw = 2 ** len(hidden_dims)   # 1x1 doubled once per ConvT = 16
    assert out.shape == (batch, 3, expected_hw, expected_hw), out.shape
    assert out.dtype == jnp.float32
    assert bool(jnp.all(jnp.isfinite(out)))
    assert bool(jnp.all(jnp.abs(out) <= 1.0))   # tanh output range
    print("KERNEL_OK")
</pallas_src>

<mosaic_0001>
module attributes {stable_mosaic.version = 11 : i64} {
  func.func @_linear_kernel(%arg0: memref<2x8xf32, #tpu.memory_space<vmem>>, %arg1: memref<8x64xf32, #tpu.memory_space<vmem>>, %arg2: memref<1x64xf32, #tpu.memory_space<vmem>>, %arg3: memref<2x64xf32, #tpu.memory_space<vmem>>) attributes {dimension_semantics = [], scalar_prefetch = 0 : i64, scratch_operands = 0 : i64, tpu.core_type = #tpu.core_type<tc>} {
    %c0 = arith.constant 0 : index
    %c0_0 = arith.constant 0 : index
    %0 = vector.load %arg0[%c0, %c0_0] : memref<2x8xf32, #tpu.memory_space<vmem>>, vector<2x8xf32>
    %c0_1 = arith.constant 0 : index
    %c0_2 = arith.constant 0 : index
    %1 = vector.load %arg1[%c0_1, %c0_2] : memref<8x64xf32, #tpu.memory_space<vmem>>, vector<8x64xf32>
    %cst = arith.constant dense<0.000000e+00> : vector<2x64xf32>
    %2 = tpu.matmul %0, %1, %cst {dimension_numbers = #tpu.dot_dimension_numbers<[1], [0], [0], [1], [0, 0, 1, 1], [], []>} : vector<2x8xf32>, vector<8x64xf32>, vector<2x64xf32> -> vector<2x64xf32>
    %c0_3 = arith.constant 0 : index
    %c0_4 = arith.constant 0 : index
    %3 = vector.load %arg2[%c0_3, %c0_4] : memref<1x64xf32, #tpu.memory_space<vmem>>, vector<1x64xf32>
    %4 = vector.broadcast %3 : vector<1x64xf32> to vector<2x64xf32>
    %5 = arith.addf %2, %4 : vector<2x64xf32>
    %c0_5 = arith.constant 0 : index
    %c0_6 = arith.constant 0 : index
    %6 = vector.load %arg3[%c0_5, %c0_6] : memref<2x64xf32, #tpu.memory_space<vmem>>, vector<2x64xf32>
    tpu.vector_store %arg3[%c0_5, %c0_6], %5 {strides = array<i32>} : memref<2x64xf32, #tpu.memory_space<vmem>>, vector<2x64xf32>,
    return
  }
}

module attributes {stable_mosaic.version = 11 : i64} {
  func.func @_conv_stats_kernel(%arg0: i32, %arg1: memref<8x576xbf16, #tpu.memory_space<vmem>>, %arg2: memref<576x128xbf16, #tpu.memory_space<vmem>>, %arg3: memref<1x128xf32, #tpu.memory_space<vmem>>, %arg4: memref<8x128xf32, #tpu.memory_space<vmem>>, %arg5: memref<1x2x128xf32, #tpu.memory_space<vmem>>) attributes {dimension_semantics = [#tpu.dimension_semantics<parallel>], iteration_bounds = array<i64: 1>, scalar_prefetch = 0 : i64, scratch_operands = 0 : i64, tpu.core_type = #tpu.core_type<tc>, window_params = [{transform_indices = @transform_0, window_bounds = array<i64: 8, 576>}, {pipeline_mode = #tpu.pipeline_mode<synchronous>, transform_indices = @transform_1, window_bounds = array<i64: 576, 128>}, {pipeline_mode = #tpu.pipeline_mode<synchronous>, transform_indices = @transform_2, window_bounds = array<i64: 1, 128>}, {transform_indices = @transform_3, window_bounds = array<i64: 8, 128>}, {transform_indices = @transform_4, window_bounds = array<i64: 1, 2, 128>}]} {
    %c0 = arith.constant 0 : index
    %c0_0 = arith.constant 0 : index
    %0 = vector.load %arg1[%c0, %c0_0] : memref<8x576xbf16, #tpu.memory_space<vmem>>, vector<8x576xbf16>
    %c0_1 = arith.constant 0 : index
    %c0_2 = arith.constant 0 : index
    %1 = vector.load %arg2[%c0_1, %c0_2] : memref<576x128xbf16, #tpu.memory_space<vmem>>, vector<576x128xbf16>
    %cst = arith.constant dense<0.000000e+00> : vector<8x128xf32>
    %2 = tpu.matmul %0, %1, %cst {dimension_numbers = #tpu.dot_dimension_numbers<[1], [0], [0], [1], [0, 0, 1, 1], [], []>} : vector<8x576xbf16>, vector<576x128xbf16>, vector<8x128xf32> -> vector<8x128xf32>
    %c0_3 = arith.constant 0 : index
    %c0_4 = arith.constant 0 : index
    %3 = vector.load %arg3[%c0_3, %c0_4] : memref<1x128xf32, #tpu.memory_space<vmem>>, vector<1x128xf32>
    %4 = vector.broadcast %3 : vector<1x128xf32> to vector<8x128xf32>
    %5 = arith.addf %2, %4 : vector<8x128xf32>
    %c0_5 = arith.constant 0 : index
    %c0_6 = arith.constant 0 : index
    %6 = vector.load %arg4[%c0_5, %c0_6] : memref<8x128xf32, #tpu.memory_space<vmem>>, vector<8x128xf32>
    tpu.vector_store %arg4[%c0_5, %c0_6], %5 {strides = array<i32>} : memref<8x128xf32, #tpu.memory_space<vmem>>, vector<8x128xf32>,
    %cst_7 = arith.constant dense<0.000000e+00> : vector<128xf32>
    %7 = vector.multi_reduction <add>, %5, %cst_7 [0] : vector<8x128xf32> to vector<128xf32>
    %8 = vector.shape_cast %7 : vector<128xf32> to vector<1x128xf32>
    %9 = arith.mulf %5, %5 : vector<8x128xf32>
    %cst_8 = arith.constant dense<0.000000e+00> : vector<128xf32>
    %10 = vector.multi_reduction <add>, %9, %cst_8 [0] : vector<8x128xf32> to vector<128xf32>
    %11 = vector.shape_cast %10 : vector<128xf32> to vector<1x128xf32>
    %12 = tpu.concatenate %8, %11 in 0 : vector<1x128xf32>, vector<1x128xf32> -> vector<2x128xf32>
    %13 = vector.shape_cast %12 : vector<2x128xf32> to vector<1x2x128xf32>
    %c0_9 = arith.constant 0 : index
    %c0_10 = arith.constant 0 : index
    %c0_11 = arith.constant 0 : index
    %14 = vector.load %arg5[%c0_9, %c0_10, %c0_11] : memref<1x2x128xf32, #tpu.memory_space<vmem>>, vector<1x2x128xf32>
    tpu.vector_store %arg5[%c0_9, %c0_10, %c0_11], %13 {strides = array<i32>} : memref<1x2x128xf32, #tpu.memory_space<vmem>>, vector<1x2x128xf32>,
    return
  }
  func.func @transform_0(%arg0: i32) -> (i32, i32) {
    %c0_i32 = arith.constant 0 : i32
    %c0_i32_0 = arith.constant 0 : i32
    return %arg0, %c0_i32 : i32, i32
  }
  func.func @transform_1(%arg0: i32) -> (i32, i32) {
    %c0_i32 = arith.constant 0 : i32
    %c0_i32_0 = arith.constant 0 : i32
    %c0_i32_1 = arith.constant 0 : i32
    return %c0_i32, %c0_i32_0 : i32, i32
  }
  func.func @transform_2(%arg0: i32) -> (i32, i32) {
    %c0_i32 = arith.constant 0 : i32
    %c0_i32_0 = arith.constant 0 : i32
    %c0_i32_1 = arith.constant 0 : i32
    return %c0_i32, %c0_i32_0 : i32, i32
  }
  func.func @transform_3(%arg0: i32) -> (i32, i32) {
    %c0_i32 = arith.constant 0 : i32
    %c0_i32_0 = arith.constant 0 : i32
    return %arg0, %c0_i32 : i32, i32
  }
  func.func @transform_4(%arg0: i32) -> (i32, i32, i32) {
    %c0_i32 = arith.constant 0 : i32
    %c0_i32_0 = arith.constant 0 : i32
    %c0_i32_1 = arith.constant 0 : i32
    return %arg0, %c0_i32, %c0_i32_0 : i32, i32, i32
  }
}

module attributes {stable_mosaic.version = 11 : i64} {
  func.func @_bn_lrelu_kernel(%arg0: i32, %arg1: memref<8x128xf32, #tpu.memory_space<vmem>>, %arg2: memref<1x128xf32, #tpu.memory_space<vmem>>, %arg3: memref<1x128xf32, #tpu.memory_space<vmem>>, %arg4: memref<8x128xf32, #tpu.memory_space<vmem>>) attributes {dimension_semantics = [#tpu.dimension_semantics<parallel>], iteration_bounds = array<i64: 1>, scalar_prefetch = 0 : i64, scratch_operands = 0 : i64, tpu.core_type = #tpu.core_type<tc>, window_params = [{transform_indices = @transform_0, window_bounds = array<i64: 8, 128>}, {pipeline_mode = #tpu.pipeline_mode<synchronous>, transform_indices = @transform_1, window_bounds = array<i64: 1, 128>}, {pipeline_mode = #tpu.pipeline_mode<synchronous>, transform_indices = @transform_2, window_bounds = array<i64: 1, 128>}, {transform_indices = @transform_3, window_bounds = array<i64: 8, 128>}]} {
    %c0 = arith.constant 0 : index
    %c0_0 = arith.constant 0 : index
    %0 = vector.load %arg1[%c0, %c0_0] : memref<8x128xf32, #tpu.memory_space<vmem>>, vector<8x128xf32>
    %c0_1 = arith.constant 0 : index
    %c0_2 = arith.constant 0 : index
    %1 = vector.load %arg2[%c0_1, %c0_2] : memref<1x128xf32, #tpu.memory_space<vmem>>, vector<1x128xf32>
    %2 = vector.broadcast %1 : vector<1x128xf32> to vector<8x128xf32>
    %3 = arith.mulf %0, %2 : vector<8x128xf32>
    %c0_3 = arith.constant 0 : index
    %c0_4 = arith.constant 0 : index
    %4 = vector.load %arg3[%c0_3, %c0_4] : memref<1x128xf32, #tpu.memory_space<vmem>>, vector<1x128xf32>
    %5 = vector.broadcast %4 : vector<1x128xf32> to vector<8x128xf32>
    %6 = arith.addf %3, %5 : vector<8x128xf32>
    %cst = arith.constant 0.000000e+00 : f32
    %7 = vector.broadcast %cst : f32 to vector<8x128xf32>
    %8 = arith.cmpf oge, %6, %7 : vector<8x128xf32>
    %cst_5 = arith.constant 0.00999999977 : f32
    %9 = vector.broadcast %cst_5 : f32 to vector<8x128xf32>
    %10 = arith.mulf %9, %6 : vector<8x128xf32>
    %11 = arith.select %8, %6, %10 : vector<8x128xi1>, vector<8x128xf32>
    %c0_6 = arith.constant 0 : index
    %c0_7 = arith.constant 0 : index
    %12 = vector.load %arg4[%c0_6, %c0_7] : memref<8x128xf32, #tpu.memory_space<vmem>>, vector<8x128xf32>
    tpu.vector_store %arg4[%c0_6, %c0_7], %11 {strides = array<i32>} : memref<8x128xf32, #tpu.memory_space<vmem>>, vector<8x128xf32>,
    return
  }
  func.func @transform_0(%arg0: i32) -> (i32, i32) {
    %c0_i32 = arith.constant 0 : i32
    %c0_i32_0 = arith.constant 0 : i32
    return %arg0, %c0_i32 : i32, i32
  }
  func.func @transform_1(%arg0: i32) -> (i32, i32) {
    %c0_i32 = arith.constant 0 : i32
    %c0_i32_0 = arith.constant 0 : i32
    %c0_i32_1 = arith.constant 0 : i32
    return %c0_i32, %c0_i32_0 : i32, i32
  }
  func.func @transform_2(%arg0: i32) -> (i32, i32) {
    %c0_i32 = arith.constant 0 : i32
    %c0_i32_0 = arith.constant 0 : i32
    %c0_i32_1 = arith.constant 0 : i32
    return %c0_i32, %c0_i32_0 : i32, i32
  }
  func.func @transform_3(%arg0: i32) -> (i32, i32) {
    %c0_i32 = arith.constant 0 : i32
    %c0_i32_0 = arith.constant 0 : i32
    return %arg0, %c0_i32 : i32, i32
  }
}

module attributes {stable_mosaic.version = 11 : i64} {
  func.func @_conv_stats_kernel(%arg0: i32, %arg1: memref<32x288xbf16, #tpu.memory_space<vmem>>, %arg2: memref<288x128xbf16, #tpu.memory_space<vmem>>, %arg3: memref<1x128xf32, #tpu.memory_space<vmem>>, %arg4: memref<32x128xf32, #tpu.memory_space<vmem>>, %arg5: memref<1x2x128xf32, #tpu.memory_space<vmem>>) attributes {dimension_semantics = [#tpu.dimension_semantics<parallel>], iteration_bounds = array<i64: 1>, scalar_prefetch = 0 : i64, scratch_operands = 0 : i64, tpu.core_type = #tpu.core_type<tc>, window_params = [{transform_indices = @transform_0, window_bounds = array<i64: 32, 288>}, {pipeline_mode = #tpu.pipeline_mode<synchronous>, transform_indices = @transform_1, window_bounds = array<i64: 288, 128>}, {pipeline_mode = #tpu.pipeline_mode<synchronous>, transform_indices = @transform_2, window_bounds = array<i64: 1, 128>}, {transform_indices = @transform_3, window_bounds = array<i64: 32, 128>}, {transform_indices = @transform_4, window_bounds = array<i64: 1, 2, 128>}]} {
    %c0 = arith.constant 0 : index
    %c0_0 = arith.constant 0 : index
    %0 = vector.load %arg1[%c0, %c0_0] : memref<32x288xbf16, #tpu.memory_space<vmem>>, vector<32x288xbf16>
    %c0_1 = arith.constant 0 : index
    %c0_2 = arith.constant 0 : index
    %1 = vector.load %arg2[%c0_1, %c0_2] : memref<288x128xbf16, #tpu.memory_space<vmem>>, vector<288x128xbf16>
    %cst = arith.constant dense<0.000000e+00> : vector<32x128xf32>
    %2 = tpu.matmul %0, %1, %cst {dimension_numbers = #tpu.dot_dimension_numbers<[1], [0], [0], [1], [0, 0, 1, 1], [], []>} : vector<32x288xbf16>, vector<288x128xbf16>, vector<32x128xf32> -> vector<32x128xf32>
    %c0_3 = arith.constant 0 : index
    %c0_4 = arith.constant 0 : index
    %3 = vector.load %arg3[%c0_3, %c0_4] : memref<1x128xf32, #tpu.memory_space<vmem>>, vector<1x128xf32>
    %4 = vector.broadcast %3 : vector<1x128xf32> to vector<32x128xf32>
    %5 = arith.addf %2, %4 : vector<32x128xf32>
    %c0_5 = arith.constant 0 : index
    %c0_6 = arith.constant 0 : index
    %6 = vector.load %arg4[%c0_5, %c0_6] : memref<32x128xf32, #tpu.memory_space<vmem>>, vector<32x128xf32>
    tpu.vector_store %arg4[%c0_5, %c0_6], %5 {strides = array<i32>} : memref<32x128xf32, #tpu.memory_space<vmem>>, vector<32x128xf32>,
    %cst_7 = arith.constant dense<0.000000e+00> : vector<128xf32>
    %7 = vector.multi_reduction <add>, %5, %cst_7 [0] : vector<32x128xf32> to vector<128xf32>
    %8 = vector.shape_cast %7 : vector<128xf32> to vector<1x128xf32>
    %9 = arith.mulf %5, %5 : vector<32x128xf32>
    %cst_8 = arith.constant dense<0.000000e+00> : vector<128xf32>
    %10 = vector.multi_reduction <add>, %9, %cst_8 [0] : vector<32x128xf32> to vector<128xf32>
    %11 = vector.shape_cast %10 : vector<128xf32> to vector<1x128xf32>
    %12 = tpu.concatenate %8, %11 in 0 : vector<1x128xf32>, vector<1x128xf32> -> vector<2x128xf32>
    %13 = vector.shape_cast %12 : vector<2x128xf32> to vector<1x2x128xf32>
    %c0_9 = arith.constant 0 : index
    %c0_10 = arith.constant 0 : index
    %c0_11 = arith.constant 0 : index
    %14 = vector.load %arg5[%c0_9, %c0_10, %c0_11] : memref<1x2x128xf32, #tpu.memory_space<vmem>>, vector<1x2x128xf32>
    tpu.vector_store %arg5[%c0_9, %c0_10, %c0_11], %13 {strides = array<i32>} : memref<1x2x128xf32, #tpu.memory_space<vmem>>, vector<1x2x128xf32>,
    return
  }
  func.func @transform_0(%arg0: i32) -> (i32, i32) {
    %c0_i32 = arith.constant 0 : i32
    %c0_i32_0 = arith.constant 0 : i32
    return %arg0, %c0_i32 : i32, i32
  }
  func.func @transform_1(%arg0: i32) -> (i32, i32) {
    %c0_i32 = arith.constant 0 : i32
    %c0_i32_0 = arith.constant 0 : i32
    %c0_i32_1 = arith.constant 0 : i32
    return %c0_i32, %c0_i32_0 : i32, i32
  }
  func.func @transform_2(%arg0: i32) -> (i32, i32) {
    %c0_i32 = arith.constant 0 : i32
    %c0_i32_0 = arith.constant 0 : i32
    %c0_i32_1 = arith.constant 0 : i32
    return %c0_i32, %c0_i32_0 : i32, i32
  }
  func.func @transform_3(%arg0: i32) -> (i32, i32) {
    %c0_i32 = arith.constant 0 : i32
    %c0_i32_0 = arith.constant 0 : i32
    return %arg0, %c0_i32 : i32, i32
  }
  func.func @transform_4(%arg0: i32) -> (i32, i32, i32) {
    %c0_i32 = arith.constant 0 : i32
    %c0_i32_0 = arith.constant 0 : i32
    %c0_i32_1 = arith.constant 0 : i32
    return %arg0, %c0_i32, %c0_i32_0 : i32, i32, i32
  }
}

module attributes {stable_mosaic.version = 11 : i64} {
  func.func @_bn_lrelu_kernel(%arg0: i32, %arg1: memref<32x128xf32, #tpu.memory_space<vmem>>, %arg2: memref<1x128xf32, #tpu.memory_space<vmem>>, %arg3: memref<1x128xf32, #tpu.memory_space<vmem>>, %arg4: memref<32x128xf32, #tpu.memory_space<vmem>>) attributes {dimension_semantics = [#tpu.dimension_semantics<parallel>], iteration_bounds = array<i64: 1>, scalar_prefetch = 0 : i64, scratch_operands = 0 : i64, tpu.core_type = #tpu.core_type<tc>, window_params = [{transform_indices = @transform_0, window_bounds = array<i64: 32, 128>}, {pipeline_mode = #tpu.pipeline_mode<synchronous>, transform_indices = @transform_1, window_bounds = array<i64: 1, 128>}, {pipeline_mode = #tpu.pipeline_mode<synchronous>, transform_indices = @transform_2, window_bounds = array<i64: 1, 128>}, {transform_indices = @transform_3, window_bounds = array<i64: 32, 128>}]} {
    %c0 = arith.constant 0 : index
    %c0_0 = arith.constant 0 : index
    %0 = vector.load %arg1[%c0, %c0_0] : memref<32x128xf32, #tpu.memory_space<vmem>>, vector<32x128xf32>
    %c0_1 = arith.constant 0 : index
    %c0_2 = arith.constant 0 : index
    %1 = vector.load %arg2[%c0_1, %c0_2] : memref<1x128xf32, #tpu.memory_space<vmem>>, vector<1x128xf32>
    %2 = vector.broadcast %1 : vector<1x128xf32> to vector<32x128xf32>
    %3 = arith.mulf %0, %2 : vector<32x128xf32>
    %c0_3 = arith.constant 0 : index
    %c0_4 = arith.constant 0 : index
    %4 = vector.load %arg3[%c0_3, %c0_4] : memref<1x128xf32, #tpu.memory_space<vmem>>, vector<1x128xf32>
    %5 = vector.broadcast %4 : vector<1x128xf32> to vector<32x128xf32>
    %6 = arith.addf %3, %5 : vector<32x128xf32>
    %cst = arith.constant 0.000000e+00 : f32
    %7 = vector.broadcast %cst : f32 to vector<32x128xf32>
    %8 = arith.cmpf oge, %6, %7 : vector<32x128xf32>
    %cst_5 = arith.constant 0.00999999977 : f32
    %9 = vector.broadcast %cst_5 : f32 to vector<32x128xf32>
    %10 = arith.mulf %9, %6 : vector<32x128xf32>
    %11 = arith.select %8, %6, %10 : vector<32x128xi1>, vector<32x128xf32>
    %c0_6 = arith.constant 0 : index
    %c0_7 = arith.constant 0 : index
    %12 = vector.load %arg4[%c0_6, %c0_7] : memref<32x128xf32, #tpu.memory_space<vmem>>, vector<32x128xf32>
    tpu.vector_store %arg4[%c0_6, %c0_7], %11 {strides = array<i32>} : memref<32x128xf32, #tpu.memory_space<vmem>>, vector<32x128xf32>,
    return
  }
  func.func @transform_0(%arg0: i32) -> (i32, i32) {
    %c0_i32 = arith.constant 0 : i32
    %c0_i32_0 = arith.constant 0 : i32
    return %arg0, %c0_i32 : i32, i32
  }
  func.func @transform_1(%arg0: i32) -> (i32, i32) {
    %c0_i32 = arith.constant 0 : i32
    %c0_i32_0 = arith.constant 0 : i32
    %c0_i32_1 = arith.constant 0 : i32
    return %c0_i32, %c0_i32_0 : i32, i32
  }
  func.func @transform_2(%arg0: i32) -> (i32, i32) {
    %c0_i32 = arith.constant 0 : i32
    %c0_i32_0 = arith.constant 0 : i32
    %c0_i32_1 = arith.constant 0 : i32
    return %c0_i32, %c0_i32_0 : i32, i32
  }
  func.func @transform_3(%arg0: i32) -> (i32, i32) {
    %c0_i32 = arith.constant 0 : i32
    %c0_i32_0 = arith.constant 0 : i32
    return %arg0, %c0_i32 : i32, i32
  }
}

module attributes {stable_mosaic.version = 11 : i64} {
  func.func @_bn_lrelu_kernel(%arg0: i32, %arg1: memref<128x128xf32, #tpu.memory_space<vmem>>, %arg2: memref<1x128xf32, #tpu.memory_space<vmem>>, %arg3: memref<1x128xf32, #tpu.memory_space<vmem>>, %arg4: memref<128x128xf32, #tpu.memory_space<vmem>>) attributes {dimension_semantics = [#tpu.dimension_semantics<parallel>], iteration_bounds = array<i64: 1>, scalar_prefetch = 0 : i64, scratch_operands = 0 : i64, tpu.core_type = #tpu.core_type<tc>, window_params = [{transform_indices = @transform_0, window_bounds = array<i64: 128, 128>}, {pipeline_mode = #tpu.pipeline_mode<synchronous>, transform_indices = @transform_1, window_bounds = array<i64: 1, 128>}, {pipeline_mode = #tpu.pipeline_mode<synchronous>, transform_indices = @transform_2, window_bounds = array<i64: 1, 128>}, {transform_indices = @transform_3, window_bounds = array<i64: 128, 128>}]} {
    %c0 = arith.constant 0 : index
    %c0_0 = arith.constant 0 : index
    %0 = vector.load %arg1[%c0, %c0_0] : memref<128x128xf32, #tpu.memory_space<vmem>>, vector<128x128xf32>
    %c0_1 = arith.constant 0 : index
    %c0_2 = arith.constant 0 : index
    %1 = vector.load %arg2[%c0_1, %c0_2] : memref<1x128xf32, #tpu.memory_space<vmem>>, vector<1x128xf32>
    %2 = vector.broadcast %1 : vector<1x128xf32> to vector<128x128xf32>
    %3 = arith.mulf %0, %2 : vector<128x128xf32>
    %c0_3 = arith.constant 0 : index
    %c0_4 = arith.constant 0 : index
    %4 = vector.load %arg3[%c0_3, %c0_4] : memref<1x128xf32, #tpu.memory_space<vmem>>, vector<1x128xf32>
    %5 = vector.broadcast %4 : vector<1x128xf32> to vector<128x128xf32>
    %6 = arith.addf %3, %5 : vector<128x128xf32>
    %cst = arith.constant 0.000000e+00 : f32
    %7 = vector.broadcast %cst : f32 to vector<128x128xf32>
    %8 = arith.cmpf oge, %6, %7 : vector<128x128xf32>
    %cst_5 = arith.constant 0.00999999977 : f32
    %9 = vector.broadcast %cst_5 : f32 to vector<128x128xf32>
    %10 = arith.mulf %9, %6 : vector<128x128xf32>
    %11 = arith.select %8, %6, %10 : vector<128x128xi1>, vector<128x128xf32>
    %c0_6 = arith.constant 0 : index
    %c0_7 = arith.constant 0 : index
    %12 = vector.load %arg4[%c0_6, %c0_7] : memref<128x128xf32, #tpu.memory_space<vmem>>, vector<128x128xf32>
    tpu.vector_store %arg4[%c0_6, %c0_7], %11 {strides = array<i32>} : memref<128x128xf32, #tpu.memory_space<vmem>>, vector<128x128xf32>,
    return
  }
  func.func @transform_0(%arg0: i32) -> (i32, i32) {
    %c0_i32 = arith.constant 0 : i32
    %c0_i32_0 = arith.constant 0 : i32
    return %arg0, %c0_i32 : i32, i32
  }
  func.func @transform_1(%arg0: i32) -> (i32, i32) {
    %c0_i32 = arith.constant 0 : i32
    %c0_i32_0 = arith.constant 0 : i32
    %c0_i32_1 = arith.constant 0 : i32
    return %c0_i32, %c0_i32_0 : i32, i32
  }
  func.func @transform_2(%arg0: i32) -> (i32, i32) {
    %c0_i32 = arith.constant 0 : i32
    %c0_i32_0 = arith.constant 0 : i32
    %c0_i32_1 = arith.constant 0 : i32
    return %c0_i32, %c0_i32_0 : i32, i32
  }
  func.func @transform_3(%arg0: i32) -> (i32, i32) {
    %c0_i32 = arith.constant 0 : i32
    %c0_i32_0 = arith.constant 0 : i32
    return %arg0, %c0_i32 : i32, i32
  }
}

module attributes {stable_mosaic.version = 11 : i64} {
  func.func @_conv_stats_kernel(%arg0: i32, %arg1: memref<128x144xbf16, #tpu.memory_space<vmem>>, %arg2: memref<144x128xbf16, #tpu.memory_space<vmem>>, %arg3: memref<1x128xf32, #tpu.memory_space<vmem>>, %arg4: memref<128x128xf32, #tpu.memory_space<vmem>>, %arg5: memref<1x2x128xf32, #tpu.memory_space<vmem>>) attributes {dimension_semantics = [#tpu.dimension_semantics<parallel>], iteration_bounds = array<i64: 1>, scalar_prefetch = 0 : i64, scratch_operands = 0 : i64, tpu.core_type = #tpu.core_type<tc>, window_params = [{transform_indices = @transform_0, window_bounds = array<i64: 128, 144>}, {pipeline_mode = #tpu.pipeline_mode<synchronous>, transform_indices = @transform_1, window_bounds = array<i64: 144, 128>}, {pipeline_mode = #tpu.pipeline_mode<synchronous>, transform_indices = @transform_2, window_bounds = array<i64: 1, 128>}, {transform_indices = @transform_3, window_bounds = array<i64: 128, 128>}, {transform_indices = @transform_4, window_bounds = array<i64: 1, 2, 128>}]} {
    %c0 = arith.constant 0 : index
    %c0_0 = arith.constant 0 : index
    %0 = vector.load %arg1[%c0, %c0_0] : memref<128x144xbf16, #tpu.memory_space<vmem>>, vector<128x144xbf16>
    %c0_1 = arith.constant 0 : index
    %c0_2 = arith.constant 0 : index
    %1 = vector.load %arg2[%c0_1, %c0_2] : memref<144x128xbf16, #tpu.memory_space<vmem>>, vector<144x128xbf16>
    %cst = arith.constant dense<0.000000e+00> : vector<128x128xf32>
    %2 = tpu.matmul %0, %1, %cst {dimension_numbers = #tpu.dot_dimension_numbers<[1], [0], [0], [1], [0, 0, 1, 1], [], []>} : vector<128x144xbf16>, vector<144x128xbf16>, vector<128x128xf32> -> vector<128x128xf32>
    %c0_3 = arith.constant 0 : index
    %c0_4 = arith.constant 0 : index
    %3 = vector.load %arg3[%c0_3, %c0_4] : memref<1x128xf32, #tpu.memory_space<vmem>>, vector<1x128xf32>
    %4 = vector.broadcast %3 : vector<1x128xf32> to vector<128x128xf32>
    %5 = arith.addf %2, %4 : vector<128x128xf32>
    %c0_5 = arith.constant 0 : index
    %c0_6 = arith.constant 0 : index
    %6 = vector.load %arg4[%c0_5, %c0_6] : memref<128x128xf32, #tpu.memory_space<vmem>>, vector<128x128xf32>
    tpu.vector_store %arg4[%c0_5, %c0_6], %5 {strides = array<i32>} : memref<128x128xf32, #tpu.memory_space<vmem>>, vector<128x128xf32>,
    %cst_7 = arith.constant dense<0.000000e+00> : vector<128xf32>
    %7 = vector.multi_reduction <add>, %5, %cst_7 [0] : vector<128x128xf32> to vector<128xf32>
    %8 = vector.shape_cast %7 : vector<128xf32> to vector<1x128xf32>
    %9 = arith.mulf %5, %5 : vector<128x128xf32>
    %cst_8 = arith.constant dense<0.000000e+00> : vector<128xf32>
    %10 = vector.multi_reduction <add>, %9, %cst_8 [0] : vector<128x128xf32> to vector<128xf32>
    %11 = vector.shape_cast %10 : vector<128xf32> to vector<1x128xf32>
    %12 = tpu.concatenate %8, %11 in 0 : vector<1x128xf32>, vector<1x128xf32> -> vector<2x128xf32>
    %13 = vector.shape_cast %12 : vector<2x128xf32> to vector<1x2x128xf32>
    %c0_9 = arith.constant 0 : index
    %c0_10 = arith.constant 0 : index
    %c0_11 = arith.constant 0 : index
    %14 = vector.load %arg5[%c0_9, %c0_10, %c0_11] : memref<1x2x128xf32, #tpu.memory_space<vmem>>, vector<1x2x128xf32>
    tpu.vector_store %arg5[%c0_9, %c0_10, %c0_11], %13 {strides = array<i32>} : memref<1x2x128xf32, #tpu.memory_space<vmem>>, vector<1x2x128xf32>,
    return
  }
  func.func @transform_0(%arg0: i32) -> (i32, i32) {
    %c0_i32 = arith.constant 0 : i32
    %c0_i32_0 = arith.constant 0 : i32
    return %arg0, %c0_i32 : i32, i32
  }
  func.func @transform_1(%arg0: i32) -> (i32, i32) {
    %c0_i32 = arith.constant 0 : i32
    %c0_i32_0 = arith.constant 0 : i32
    %c0_i32_1 = arith.constant 0 : i32
    return %c0_i32, %c0_i32_0 : i32, i32
  }
  func.func @transform_2(%arg0: i32) -> (i32, i32) {
    %c0_i32 = arith.constant 0 : i32
    %c0_i32_0 = arith.constant 0 : i32
    %c0_i32_1 = arith.constant 0 : i32
    return %c0_i32, %c0_i32_0 : i32, i32
  }
  func.func @transform_3(%arg0: i32) -> (i32, i32) {
    %c0_i32 = arith.constant 0 : i32
    %c0_i32_0 = arith.constant 0 : i32
    return %arg0, %c0_i32 : i32, i32
  }
  func.func @transform_4(%arg0: i32) -> (i32, i32, i32) {
    %c0_i32 = arith.constant 0 : i32
    %c0_i32_0 = arith.constant 0 : i32
    %c0_i32_1 = arith.constant 0 : i32
    return %arg0, %c0_i32, %c0_i32_0 : i32, i32, i32
  }
}

module attributes {stable_mosaic.version = 11 : i64} {
  func.func @_conv_stats_kernel(%arg0: i32, %arg1: memref<512x72xbf16, #tpu.memory_space<vmem>>, %arg2: memref<72x128xbf16, #tpu.memory_space<vmem>>, %arg3: memref<1x128xf32, #tpu.memory_space<vmem>>, %arg4: memref<512x128xf32, #tpu.memory_space<vmem>>, %arg5: memref<1x2x128xf32, #tpu.memory_space<vmem>>) attributes {dimension_semantics = [#tpu.dimension_semantics<parallel>], iteration_bounds = array<i64: 1>, scalar_prefetch = 0 : i64, scratch_operands = 0 : i64, tpu.core_type = #tpu.core_type<tc>, window_params = [{transform_indices = @transform_0, window_bounds = array<i64: 512, 72>}, {pipeline_mode = #tpu.pipeline_mode<synchronous>, transform_indices = @transform_1, window_bounds = array<i64: 72, 128>}, {pipeline_mode = #tpu.pipeline_mode<synchronous>, transform_indices = @transform_2, window_bounds = array<i64: 1, 128>}, {transform_indices = @transform_3, window_bounds = array<i64: 512, 128>}, {transform_indices = @transform_4, window_bounds = array<i64: 1, 2, 128>}]} {
    %c0 = arith.constant 0 : index
    %c0_0 = arith.constant 0 : index
    %0 = vector.load %arg1[%c0, %c0_0] : memref<512x72xbf16, #tpu.memory_space<vmem>>, vector<512x72xbf16>
    %c0_1 = arith.constant 0 : index
    %c0_2 = arith.constant 0 : index
    %1 = vector.load %arg2[%c0_1, %c0_2] : memref<72x128xbf16, #tpu.memory_space<vmem>>, vector<72x128xbf16>
    %cst = arith.constant dense<0.000000e+00> : vector<512x128xf32>
    %2 = tpu.matmul %0, %1, %cst {dimension_numbers = #tpu.dot_dimension_numbers<[1], [0], [0], [1], [0, 0, 1, 1], [], []>} : vector<512x72xbf16>, vector<72x128xbf16>, vector<512x128xf32> -> vector<512x128xf32>
    %c0_3 = arith.constant 0 : index
    %c0_4 = arith.constant 0 : index
    %3 = vector.load %arg3[%c0_3, %c0_4] : memref<1x128xf32, #tpu.memory_space<vmem>>, vector<1x128xf32>
    %4 = vector.broadcast %3 : vector<1x128xf32> to vector<512x128xf32>
    %5 = arith.addf %2, %4 : vector<512x128xf32>
    %c0_5 = arith.constant 0 : index
    %c0_6 = arith.constant 0 : index
    %6 = vector.load %arg4[%c0_5, %c0_6] : memref<512x128xf32, #tpu.memory_space<vmem>>, vector<512x128xf32>
    tpu.vector_store %arg4[%c0_5, %c0_6], %5 {strides = array<i32>} : memref<512x128xf32, #tpu.memory_space<vmem>>, vector<512x128xf32>,
    %cst_7 = arith.constant dense<0.000000e+00> : vector<128xf32>
    %7 = vector.multi_reduction <add>, %5, %cst_7 [0] : vector<512x128xf32> to vector<128xf32>
    %8 = vector.shape_cast %7 : vector<128xf32> to vector<1x128xf32>
    %9 = arith.mulf %5, %5 : vector<512x128xf32>
    %cst_8 = arith.constant dense<0.000000e+00> : vector<128xf32>
    %10 = vector.multi_reduction <add>, %9, %cst_8 [0] : vector<512x128xf32> to vector<128xf32>
    %11 = vector.shape_cast %10 : vector<128xf32> to vector<1x128xf32>
    %12 = tpu.concatenate %8, %11 in 0 : vector<1x128xf32>, vector<1x128xf32> -> vector<2x128xf32>
    %13 = vector.shape_cast %12 : vector<2x128xf32> to vector<1x2x128xf32>
    %c0_9 = arith.constant 0 : index
    %c0_10 = arith.constant 0 : index
    %c0_11 = arith.constant 0 : index
    %14 = vector.load %arg5[%c0_9, %c0_10, %c0_11] : memref<1x2x128xf32, #tpu.memory_space<vmem>>, vector<1x2x128xf32>
    tpu.vector_store %arg5[%c0_9, %c0_10, %c0_11], %13 {strides = array<i32>} : memref<1x2x128xf32, #tpu.memory_space<vmem>>, vector<1x2x128xf32>,
    return
  }
  func.func @transform_0(%arg0: i32) -> (i32, i32) {
    %c0_i32 = arith.constant 0 : i32
    %c0_i32_0 = arith.constant 0 : i32
    return %arg0, %c0_i32 : i32, i32
  }
  func.func @transform_1(%arg0: i32) -> (i32, i32) {
    %c0_i32 = arith.constant 0 : i32
    %c0_i32_0 = arith.constant 0 : i32
    %c0_i32_1 = arith.constant 0 : i32
    return %c0_i32, %c0_i32_0 : i32, i32
  }
  func.func @transform_2(%arg0: i32) -> (i32, i32) {
    %c0_i32 = arith.constant 0 : i32
    %c0_i32_0 = arith.constant 0 : i32
    %c0_i32_1 = arith.constant 0 : i32
    return %c0_i32, %c0_i32_0 : i32, i32
  }
  func.func @transform_3(%arg0: i32) -> (i32, i32) {
    %c0_i32 = arith.constant 0 : i32
    %c0_i32_0 = arith.constant 0 : i32
    return %arg0, %c0_i32 : i32, i32
  }
  func.func @transform_4(%arg0: i32) -> (i32, i32, i32) {
    %c0_i32 = arith.constant 0 : i32
    %c0_i32_0 = arith.constant 0 : i32
    %c0_i32_1 = arith.constant 0 : i32
    return %arg0, %c0_i32, %c0_i32_0 : i32, i32, i32
  }
}

module attributes {stable_mosaic.version = 11 : i64} {
  func.func @_bn_lrelu_kernel(%arg0: i32, %arg1: memref<512x128xf32, #tpu.memory_space<vmem>>, %arg2: memref<1x128xf32, #tpu.memory_space<vmem>>, %arg3: memref<1x128xf32, #tpu.memory_space<vmem>>, %arg4: memref<512x128xf32, #tpu.memory_space<vmem>>) attributes {dimension_semantics = [#tpu.dimension_semantics<parallel>], iteration_bounds = array<i64: 1>, scalar_prefetch = 0 : i64, scratch_operands = 0 : i64, tpu.core_type = #tpu.core_type<tc>, window_params = [{transform_indices = @transform_0, window_bounds = array<i64: 512, 128>}, {pipeline_mode = #tpu.pipeline_mode<synchronous>, transform_indices = @transform_1, window_bounds = array<i64: 1, 128>}, {pipeline_mode = #tpu.pipeline_mode<synchronous>, transform_indices = @transform_2, window_bounds = array<i64: 1, 128>}, {transform_indices = @transform_3, window_bounds = array<i64: 512, 128>}]} {
    %c0 = arith.constant 0 : index
    %c0_0 = arith.constant 0 : index
    %0 = vector.load %arg1[%c0, %c0_0] : memref<512x128xf32, #tpu.memory_space<vmem>>, vector<512x128xf32>
    %c0_1 = arith.constant 0 : index
    %c0_2 = arith.constant 0 : index
    %1 = vector.load %arg2[%c0_1, %c0_2] : memref<1x128xf32, #tpu.memory_space<vmem>>, vector<1x128xf32>
    %2 = vector.broadcast %1 : vector<1x128xf32> to vector<512x128xf32>
    %3 = arith.mulf %0, %2 : vector<512x128xf32>
    %c0_3 = arith.constant 0 : index
    %c0_4 = arith.constant 0 : index
    %4 = vector.load %arg3[%c0_3, %c0_4] : memref<1x128xf32, #tpu.memory_space<vmem>>, vector<1x128xf32>
    %5 = vector.broadcast %4 : vector<1x128xf32> to vector<512x128xf32>
    %6 = arith.addf %3, %5 : vector<512x128xf32>
    %cst = arith.constant 0.000000e+00 : f32
    %7 = vector.broadcast %cst : f32 to vector<512x128xf32>
    %8 = arith.cmpf oge, %6, %7 : vector<512x128xf32>
    %cst_5 = arith.constant 0.00999999977 : f32
    %9 = vector.broadcast %cst_5 : f32 to vector<512x128xf32>
    %10 = arith.mulf %9, %6 : vector<512x128xf32>
    %11 = arith.select %8, %6, %10 : vector<512x128xi1>, vector<512x128xf32>
    %c0_6 = arith.constant 0 : index
    %c0_7 = arith.constant 0 : index
    %12 = vector.load %arg4[%c0_6, %c0_7] : memref<512x128xf32, #tpu.memory_space<vmem>>, vector<512x128xf32>
    tpu.vector_store %arg4[%c0_6, %c0_7], %11 {strides = array<i32>} : memref<512x128xf32, #tpu.memory_space<vmem>>, vector<512x128xf32>,
    return
  }
  func.func @transform_0(%arg0: i32) -> (i32, i32) {
    %c0_i32 = arith.constant 0 : i32
    %c0_i32_0 = arith.constant 0 : i32
    return %arg0, %c0_i32 : i32, i32
  }
  func.func @transform_1(%arg0: i32) -> (i32, i32) {
    %c0_i32 = arith.constant 0 : i32
    %c0_i32_0 = arith.constant 0 : i32
    %c0_i32_1 = arith.constant 0 : i32
    return %c0_i32, %c0_i32_0 : i32, i32
  }
  func.func @transform_2(%arg0: i32) -> (i32, i32) {
    %c0_i32 = arith.constant 0 : i32
    %c0_i32_0 = arith.constant 0 : i32
    %c0_i32_1 = arith.constant 0 : i32
    return %c0_i32, %c0_i32_0 : i32, i32
  }
  func.func @transform_3(%arg0: i32) -> (i32, i32) {
    %c0_i32 = arith.constant 0 : i32
    %c0_i32_0 = arith.constant 0 : i32
    return %arg0, %c0_i32 : i32, i32
  }
}

module attributes {stable_mosaic.version = 11 : i64} {
  func.func @_conv_tanh_kernel(%arg0: i32, %arg1: memref<512x72xbf16, #tpu.memory_space<vmem>>, %arg2: memref<72x128xbf16, #tpu.memory_space<vmem>>, %arg3: memref<1x128xf32, #tpu.memory_space<vmem>>, %arg4: memref<512x128xf32, #tpu.memory_space<vmem>>) attributes {dimension_semantics = [#tpu.dimension_semantics<parallel>], iteration_bounds = array<i64: 1>, scalar_prefetch = 0 : i64, scratch_operands = 0 : i64, tpu.core_type = #tpu.core_type<tc>, window_params = [{transform_indices = @transform_0, window_bounds = array<i64: 512, 72>}, {pipeline_mode = #tpu.pipeline_mode<synchronous>, transform_indices = @transform_1, window_bounds = array<i64: 72, 128>}, {pipeline_mode = #tpu.pipeline_mode<synchronous>, transform_indices = @transform_2, window_bounds = array<i64: 1, 128>}, {transform_indices = @transform_3, window_bounds = array<i64: 512, 128>}]} {
    %c0 = arith.constant 0 : index
    %c0_0 = arith.constant 0 : index
    %0 = vector.load %arg1[%c0, %c0_0] : memref<512x72xbf16, #tpu.memory_space<vmem>>, vector<512x72xbf16>
    %c0_1 = arith.constant 0 : index
    %c0_2 = arith.constant 0 : index
    %1 = vector.load %arg2[%c0_1, %c0_2] : memref<72x128xbf16, #tpu.memory_space<vmem>>, vector<72x128xbf16>
    %cst = arith.constant dense<0.000000e+00> : vector<512x128xf32>
    %2 = tpu.matmul %0, %1, %cst {dimension_numbers = #tpu.dot_dimension_numbers<[1], [0], [0], [1], [0, 0, 1, 1], [], []>} : vector<512x72xbf16>, vector<72x128xbf16>, vector<512x128xf32> -> vector<512x128xf32>
    %c0_3 = arith.constant 0 : index
    %c0_4 = arith.constant 0 : index
    %3 = vector.load %arg3[%c0_3, %c0_4] : memref<1x128xf32, #tpu.memory_space<vmem>>, vector<1x128xf32>
    %4 = vector.broadcast %3 : vector<1x128xf32> to vector<512x128xf32>
    %5 = arith.addf %2, %4 : vector<512x128xf32>
    %6 = math.tanh %5 : vector<512x128xf32>
    %c0_5 = arith.constant 0 : index
    %c0_6 = arith.constant 0 : index
    %7 = vector.load %arg4[%c0_5, %c0_6] : memref<512x128xf32, #tpu.memory_space<vmem>>, vector<512x128xf32>
    tpu.vector_store %arg4[%c0_5, %c0_6], %6 {strides = array<i32>} : memref<512x128xf32, #tpu.memory_space<vmem>>, vector<512x128xf32>,
    return
  }
  func.func @transform_0(%arg0: i32) -> (i32, i32) {
    %c0_i32 = arith.constant 0 : i32
    %c0_i32_0 = arith.constant 0 : i32
    return %arg0, %c0_i32 : i32, i32
  }
  func.func @transform_1(%arg0: i32) -> (i32, i32) {
    %c0_i32 = arith.constant 0 : i32
    %c0_i32_0 = arith.constant 0 : i32
    %c0_i32_1 = arith.constant 0 : i32
    return %c0_i32, %c0_i32_0 : i32, i32
  }
  func.func @transform_2(%arg0: i32) -> (i32, i32) {
    %c0_i32 = arith.constant 0 : i32
    %c0_i32_0 = arith.constant 0 : i32
    %c0_i32_1 = arith.constant 0 : i32
    return %c0_i32, %c0_i32_0 : i32, i32
  }
  func.func @transform_3(%arg0: i32) -> (i32, i32) {
    %c0_i32 = arith.constant 0 : i32
    %c0_i32_0 = arith.constant 0 : i32
    return %arg0, %c0_i32 : i32, i32
  }
}

</mosaic_0001>

<bundles_post_ra>
// kernel: decoder_forward.10
= control target key start
LH: loop header
LB: loop body
LE: loop exit
PB: predicated region body
PF: predicated region fallthrough
CT: control target
= control target key end

     0   :  { %vm23_vm0 = vcmask 64512   ;;  %v114_v0 = vmov 0.0   ;;  %vm115_vm1 = vmmov 0   ;;  %vm97_vm2 = vcmask 517120   ;;  %s148_s1 = inlined_call_operand.vmem [shape: f32[8,64], index: 1, kind: input, shape index: {}]   ;;  %s149_s0 = inlined_call_operand.vmem [shape: f32[2,8], index: 0, kind: input, shape index: {}]   ;;  %s150_s2 = inlined_call_operand.vmem [shape: f32[1,64], index: 2, kind: input, shape index: {}]   ;;  %s151_s3 = inlined_call_operand.vmem [shape: f32[2,64], index: 3, kind: output, shape index: {}]  }
   0x1   :  { %107 = vmatprep.subr.mxu0 %v114_v0  ;;  %v15_v1 = vld [vmem:[%s148_s1] sm:$0xff]  ;;  %109 = vmatprep.mubr.msk.f32.mxu0 %vm115_vm1, %v114_v0 }
   0x2   :  { %v14_v2 = vld [vmem:[%s149_s0] sm:$0x3]  ;;  %108 = vmatpush3.msra.mxu0 %v15_v1 }
   0x3   :  { %110 = vmatmul.mubr.msk.f32.vlgmr.msra.gmra.mxu0 %vm23_vm0, %v14_v2  ;;  %v103_v3 = vld [vmem:[%s150_s2] ss:$0 sm:$0xff] }
  0xc3   :  { %v93_v4 = vpop.f32.mrf.mxu0 }
  0xc4   :  { %v94_v5 = vadd.f32 %v103_v3, %v93_v4 }
  0xc5   :  { %v111_v6 = vpop.f32.mrf.mxu0 }
  0xc6   :  { %98 = vst.msk [vmem:[%s151_s3] sm:$0x3] %vm97_vm2, %v94_v5 }

// kernel: decoder_forward.12
= control target key start
LH: loop header
LB: loop body
LE: loop exit
PB: predicated region body
PF: predicated region fallthrough
CT: control target
= control target key end

     0   :  { %s73_s0 = inlined_call_operand.vmem [shape: f32[8,128], index: 0, kind: input, shape index: {}]   ;;  %s74_s1 = inlined_call_operand.vmem [shape: f32[1,128], index: 1, kind: input, shape index: {}]   ;;  %s75_s2 = inlined_call_operand.vmem [shape: f32[1,128], index: 2, kind: input, shape index: {}]   ;;  %s76_s3 = inlined_call_operand.vmem [shape: f32[8,128], index: 3, kind: output, shape index: {}]  }
   0x1   :  { %v14_v0 = vld [vmem:[%s73_s0] sm:$0xff] }
   0x2   :  { %v39_v1 = vld [vmem:[%s74_s1] ss:$0 sm:$0xff] }
   0x3   :  { %v40_v2 = vld [vmem:[%s75_s2] ss:$0 sm:$0xff]  ;;  %v22_v3 = vmul.f32 %v39_v1, %v14_v0 }
   0x5   :  { %v30_v4 = vadd.f32 %v40_v2, %v22_v3 }
   0x7   :  { %vm31_vm0 = vcmp.ge.f32.partialorder %v30_v4, 0.0  ;;  %v32_v5 = vmul.f32 0.01, %v30_v4 }
   0x9   :  { %v33_v6 = vsel %vm31_vm0, %v30_v4, %v32_v5 }
   0xa   :  { %34 = vst [vmem:[%s76_s3] sm:$0xff] %v33_v6 }

// kernel: decoder_forward.11
= control target key start
LH: loop header
LB: loop body
LE: loop exit
PB: predicated region body
PF: predicated region fallthrough
CT: control target
= control target key end

     0   :  { %v628_v35 = vmov 0.0   ;;  %vm629_vm0 = vmmov 0   ;;  %vm332_vm1 = vcmask 523264   ;;  %vm470_vm2 = vcmask 1040384   ;;  %s781_s1 = inlined_call_operand.vmem [shape: bf16[576,128], index: 1, kind: input, shape index: {}]   ;;  %s782_s0 = inlined_call_operand.vmem [shape: bf16[8,576], index: 0, kind: input, shape index: {}]   ;;  %s783_s2 = inlined_call_operand.vmem [shape: f32[1,128], index: 2, kind: input, shape index: {}]   ;;  %s784_s3 = inlined_call_operand.vmem [shape: f32[8,128], index: 3, kind: output, shape index: {0}]   ;;  %s785_s4 = inlined_call_operand.vmem [shape: f32[1,2,128], index: 4, kind: output, shape index: {1}]  }
   0x1   :  { %v587_v0 = vld [vmem:[%s781_s1 + $0x78] sm:$0xff]   ;;  %v591_v4 = vld [vmem:[%s781_s1 + $0x70] sm:$0xff]   ;;  %v595_v8 = vld [vmem:[%s781_s1 + $0x68] sm:$0xff]  }
   0x2   :  { %v588_v1 = vld [vmem:[%s781_s1 + $0x38] sm:$0xff]   ;;  %524 = vmatprep.subr.bf16.mxu0 %v587_v0  ;;  %v592_v5 = vld [vmem:[%s781_s1 + $0x30] sm:$0xff]   ;;  %v596_v9 = vld [vmem:[%s781_s1 + $0x28] sm:$0xff]  }
   0x3   :  { %v589_v2 = vld [vmem:[%s781_s1 + $0xf8] sm:$0xff]   ;;  %525 = vmatpush3.bf16.msra.mxu0 %v588_v1  ;;  %v593_v6 = vld [vmem:[%s781_s1 + $0xf0] sm:$0xff]   ;;  %v597_v10 = vld [vmem:[%s781_s1 + $0xe8] sm:$0xff]  }
   0x4   :  { %v590_v3 = vld [vmem:[%s781_s1 + $0xb8] sm:$0xff]   ;;  %546 = vmatprep.subr.bf16.mxu1 %v589_v2  ;;  %526 = vmatprep.subr.bf16.mxu0 %v591_v4  ;;  %v594_v7 = vld [vmem:[%s781_s1 + $0xb0] sm:$0xff]   ;;  %v598_v11 = vld [vmem:[%s781_s1 + $0xa8] sm:$0xff]  }
   0x5   :  { %547 = vmatpush3.bf16.msra.mxu1 %v590_v3  ;;  %v599_v12 = vld [vmem:[%s781_s1 + $0x60] sm:$0xff]   ;;  %v603_v16 = vld [vmem:[%s781_s1 + $0x58] sm:$0xff]   ;;  %v607_v20 = vld [vmem:[%s781_s1 + $0x50] sm:$0xff]  }
   0x6   :  { %548 = vmatprep.subr.bf16.mxu1 %v593_v6  ;;  %v600_v13 = vld [vmem:[%s781_s1 + $0x20] sm:$0xff]   ;;  %v604_v17 = vld [vmem:[%s781_s1 + $0x18] sm:$0xff]   ;;  %v608_v21 = vld [vmem:[%s781_s1 + $0x10] sm:$0xff]  }
   0x7   :  { %527 = vmatpush3.bf16.msra.mxu0 %v592_v5  ;;  %v601_v14 = vld [vmem:[%s781_s1 + $0xe0] sm:$0xff]   ;;  %v605_v18 = vld [vmem:[%s781_s1 + $0xd8] sm:$0xff]   ;;  %v609_v22 = vld [vmem:[%s781_s1 + $0xd0] sm:$0xff]  }
   0x8   :  { %528 = vmatprep.subr.bf16.mxu0 %v595_v8  ;;  %v602_v15 = vld [vmem:[%s781_s1 + $0xa0] sm:$0xff]   ;;  %v606_v19 = vld [vmem:[%s781_s1 + $0x98] sm:$0xff]   ;;  %v610_v23 = vld [vmem:[%s781_s1 + $0x90] sm:$0xff]  }
   0x9   :  { %549 = vmatpush3.bf16.msra.mxu1 %v594_v7  ;;  %v611_v24 = vld [vmem:[%s781_s1 + $0x48] sm:$0xff]   ;;  %v615_v28 = vld [vmem:[%s781_s1 + $0x40] sm:$0xff]   ;;  %v624_v39 = vld [vmem:[%s781_s1 + $0x118] sm:$0xff]  }
   0xa   :  { %550 = vmatprep.subr.bf16.mxu1 %v597_v10  ;;  %v612_v25 = vld [vmem:[%s781_s1 + $0x8] sm:$0xff]   ;;  %v616_v29 = vld [vmem:[%s781_s1] sm:$0xff]   ;;  %v625_v40 = vld [vmem:[%s781_s1 + $0x110] sm:$0xff]  }
   0xb   :  { %529 = vmatpush3.bf16.msra.mxu0 %v596_v9  ;;  %v613_v26 = vld [vmem:[%s781_s1 + $0xc8] sm:$0xff]   ;;  %v617_v30 = vld [vmem:[%s781_s1 + $0xc0] sm:$0xff]   ;;  %v620_v43 = vld [vmem:[%s782_s0 + $0x10] ss:$0 sps:$4 sm:$0xff]  }
   0xc   :  { %530 = vmatprep.subr.bf16.mxu0 %v599_v12  ;;  %v614_v27 = vld [vmem:[%s781_s1 + $0x88] sm:$0xff]   ;;  %v17_v31 = vld [vmem:[%s782_s0] sm:$0xff] }
   0xd   :  { %551 = vmatpush3.bf16.msra.mxu1 %v598_v11  ;;  %v482_v32 = vcombine.low %v17_v31, %v17_v31  ;;  %v483_v33 = vcombine.high %v17_v31, %v17_v31  ;;  %v621_v34 = vld [vmem:[%s781_s1 + $0x80] sm:$0xff]   ;;  %v18_v36 = vld [vmem:[%s782_s0 + $0x8] sm:$0xff] }
   0xe   :  { %552 = vmatprep.subr.bf16.mxu1 %v601_v14  ;;  %v484_v37 = vcombine.low %v18_v36, %v18_v36  ;;  %v485_v38 = vcombine.high %v18_v36, %v18_v36  ;;  %v626_v41 = vld [vmem:[%s781_s1 + $0x108] sm:$0xff]   ;;  %v627_v42 = vld [vmem:[%s781_s1 + $0x100] sm:$0xff]  }
   0xf   :  { %531 = vmatpush3.bf16.msra.mxu0 %v600_v13  ;;  %368 = vmatprep.mubr.bf16.mxu0 %v483_v33  ;;  %v481_v52 = vld [vmem:[%s783_s2] ss:$0 sm:$0xff] }
  0x10   :  { %532 = vmatprep.subr.bf16.mxu0 %v603_v16  ;;  %408 = vmatprep.mubr.bf16.mxu1 %v485_v38 }
  0x11   :  { %553 = vmatpush3.bf16.msra.mxu1 %v602_v15 }
  0x12   :  { %554 = vmatprep.subr.bf16.mxu1 %v605_v18 }
  0x13   :  { %533 = vmatpush3.bf16.msra.mxu0 %v604_v17 }
  0x14   :  { %534 = vmatprep.subr.bf16.mxu0 %v607_v20 }
  0x15   :  { %555 = vmatpush3.bf16.msra.mxu1 %v606_v19 }
  0x16   :  { %556 = vmatprep.subr.bf16.mxu1 %v609_v22 }
  0x17   :  { %535 = vmatpush3.bf16.msra.mxu0 %v608_v21 }
  0x18   :  { %536 = vmatprep.subr.bf16.mxu0 %v611_v24 }
  0x19   :  { %557 = vmatpush3.bf16.msra.mxu1 %v610_v23 }
  0x1a   :  { %558 = vmatprep.subr.bf16.mxu1 %v613_v26 }
  0x1b   :  { %537 = vmatpush3.bf16.msra.mxu0 %v612_v25 }
  0x1c   :  { %538 = vmatprep.subr.bf16.mxu0 %v615_v28 }
  0x1d   :  { %559 = vmatpush3.bf16.msra.mxu1 %v614_v27 }
  0x1e   :  { %560 = vmatprep.subr.bf16.mxu1 %v617_v30 }
  0x1f   :  { %539 = vmatpush3.bf16.msra.mxu0 %v616_v29 }
  0x20   :  { %573 = vmatprep.subr.bf16.mxu0 %v628_v35 }
  0x21   :  { %561 = vmatpush3.bf16.msra.mxu1 %v621_v34 }
  0x22   :  { %369 = vmatmul.mubr.bf16.vlgmr.msra.gmra.mxu0 %v482_v32 }
  0x23   :  { %574 = vmatpush3.bf16.msra.mxu0 %v624_v39  ;;  %581 = vmatprep.mubr.msk.bf16.mxu0 %vm629_vm0, %v628_v35 }
  0x24   :  { %409 = vmatmul.mubr.bf16.vlgmr.msra.gmra.mxu1 %v484_v37  ;;  %575 = vmatprep.subr.bf16.mxu0 %v628_v35 }
  0x27   :  { %576 = vmatpush3.bf16.msra.mxu0 %v625_v40 }
  0x28   :  { %577 = vmatprep.subr.bf16.mxu0 %v628_v35 }
  0x2b   :  { %578 = vmatpush3.bf16.msra.mxu0 %v626_v41 }
  0x2c   :  { %579 = vmatprep.subr.bf16.mxu0 %v628_v35 }
  0x2f   :  { %580 = vmatpush3.bf16.msra.mxu0 %v627_v42 }
  0x32   :  { %582 = vmatmul.mubr.msk.bf16.vlgmr.msra.gmra.mxu0 %vm332_vm1, %v620_v43 }
  0xe2   :  { %v540_v44 = vpop.f32.mrf.mxu0 }
  0xe4   :  { %v541_v45 = vpop.f32.mrf.mxu0  ;;  %v562_v46 = vpop.f32.mrf.mxu1 }
  0xe5   :  { %v542_v51 = vadd.f32 %v541_v45, %v540_v44 }
  0xe6   :  { %v543_v47 = vpop.f32.mrf.mxu0  ;;  %v563_v48 = vpop.f32.mrf.mxu1 }
  0xe7   :  { %v371_v54 = vadd.f32 %v542_v51, %v481_v52  ;;  %v564_v55 = vadd.f32 %v563_v48, %v562_v46 }
  0xe8   :  { %v544_v49 = vpop.f32.mrf.mxu0  ;;  %v565_v50 = vpop.f32.mrf.mxu1 }
  0xe9   :  { %v411_v56 = vadd.f32 %v564_v55, %v371_v54 }
  0xea   :  { %v566_v53 = vpop.f32.mrf.mxu1 }
  0xf2   :  { %v450_v57 = vpop.f32.mrf.mxu0 }
  0xf3   :  { %v451_v58 = vadd.f32 %v450_v57, %v411_v56 }
  0xf4   :  { %v583_v59 = vpop.f32.mrf.mxu0 }
  0xf5   :  { %456 = vst [vmem:[%s784_s3] sm:$0xff] %v451_v58  ;;  %v457_v60 = vrot.slane %v451_v58, 4  ;;  %v463_v61 = vmul.f32 %v451_v58, %v451_v58 }
  0xf6   :  { %v453_v62 = vpop.f32.mrf.mxu0 }
  0xf7   :  { %v458_v63 = vadd.f32 %v457_v60, %v451_v58  ;;  %v464_v0 = vrot.slane %v463_v61, 4 }
  0xf8   :  { %v584_v1 = vpop.f32.mrf.mxu0 }
  0xf9   :  { %v459_v2 = vrot.slane %v458_v63, 2  ;;  %v465_v3 = vadd.f32 %v464_v0, %v463_v61 }
  0xfb   :  { %v460_v4 = vadd.f32 %v459_v2, %v458_v63  ;;  %v466_v5 = vrot.slane %v465_v3, 2 }
  0xfd   :  { %v461_v6 = vrot.slane %v460_v4, 1  ;;  %v467_v7 = vadd.f32 %v466_v5, %v465_v3 }
  0xff   :  { %v468_v8 = vrot.slane %v467_v7, 1  ;;  %v462_v9 = vadd.f32 %v461_v6, %v460_v4 }
 0x101   :  { %v469_v10 = vadd.f32 %v468_v8, %v467_v7 }
 0x103   :  { %v471_v11 = vsel %vm470_vm2, %v462_v9, %v469_v10 }
 0x104   :  { %472 = vst [vmem:[%s785_s4] sm:$0x3] %v471_v11 }

// kernel: decoder_forward.14
= control target key start
LH: loop header
LB: loop body
LE: loop exit
PB: predicated region body
PF: predicated region fallthrough
CT: control target
= control target key end

     0   :  { %s112_s0 = inlined_call_operand.vmem [shape: f32[32,128], index: 0, kind: input, shape index: {}]   ;;  %s113_s1 = inlined_call_operand.vmem [shape: f32[1,128], index: 1, kind: input, shape index: {}]   ;;  %s114_s2 = inlined_call_operand.vmem [shape: f32[1,128], index: 2, kind: input, shape index: {}]   ;;  %s115_s3 = inlined_call_operand.vmem [shape: f32[32,128], index: 3, kind: output, shape index: {}]  }
   0x1   :  { %v14_v0 = vld [vmem:[%s112_s0] sm:$0xff]  ;;  %v15_v4 = vld [vmem:[%s112_s0 + $0x8] sm:$0xff]  ;;  %v16_v5 = vld [vmem:[%s112_s0 + $0x10] sm:$0xff] }
   0x2   :  { %v60_v1 = vld [vmem:[%s113_s1] ss:$0 sm:$0xff]  ;;  %v17_v6 = vld [vmem:[%s112_s0 + $0x18] sm:$0xff] }
   0x3   :  { %v61_v2 = vld [vmem:[%s114_s2] ss:$0 sm:$0xff]  ;;  %v25_v3 = vmul.f32 %v60_v1, %v14_v0  ;;  %v26_v7 = vmul.f32 %v60_v1, %v15_v4  ;;  %v27_v8 = vmul.f32 %v60_v1, %v16_v5  ;;  %v28_v9 = vmul.f32 %v60_v1, %v17_v6 }
   0x5   :  { %v36_v10 = vadd.f32 %v61_v2, %v25_v3  ;;  %v37_v11 = vadd.f32 %v61_v2, %v26_v7  ;;  %v38_v12 = vadd.f32 %v61_v2, %v27_v8  ;;  %v39_v13 = vadd.f32 %v61_v2, %v28_v9 }
   0x7   :  { %vm40_vm0 = vcmp.ge.f32.partialorder %v36_v10, 0.0  ;;  %v44_v14 = vmul.f32 0.01, %v36_v10  ;;  %vm41_vm1 = vcmp.ge.f32.partialorder %v37_v11, 0.0  ;;  %v45_v15 = vmul.f32 0.01, %v37_v11 }
   0x8   :  { %vm42_vm2 = vcmp.ge.f32.partialorder %v38_v12, 0.0  ;;  %v46_v16 = vmul.f32 0.01, %v38_v12  ;;  %vm43_vm3 = vcmp.ge.f32.partialorder %v39_v13, 0.0  ;;  %v47_v18 = vmul.f32 0.01, %v39_v13 }
   0x9   :  { %v48_v17 = vsel %vm40_vm0, %v36_v10, %v44_v14  ;;  %v49_v19 = vsel %vm41_vm1, %v37_v11, %v45_v15 }
   0xa   :  { %52 = vst [vmem:[%s115_s3] sm:$0xff] %v48_v17  ;;  %v50_v20 = vsel %vm42_vm2, %v38_v12, %v46_v16  ;;  %53 = vst [vmem:[%s115_s3 + $0x8] sm:$0xff] %v49_v19  ;;  %v51_v21 = vsel %vm43_vm3, %v39_v13, %v47_v18 }
   0xb   :  { %54 = vst [vmem:[%s115_s3 + $0x10] sm:$0xff] %v50_v20  ;;  %55 = vst [vmem:[%s115_s3 + $0x18] sm:$0xff] %v51_v21 }

// kernel: decoder_forward.13
= control target key start
LH: loop header
LB: loop body
LE: loop exit
PB: predicated region body
PF: predicated region fallthrough
CT: control target
= control target key end

     0   :  { %vm206_vm0 = vcmask 261120   ;;  %vm337_vm1 = vcmask 1040384   ;;  %s556_s1 = inlined_call_operand.vmem [shape: bf16[288,128], index: 1, kind: input, shape index: {}]   ;;  %s557_s0 = inlined_call_operand.vmem [shape: bf16[32,288], index: 0, kind: input, shape index: {}]   ;;  %s558_s2 = inlined_call_operand.vmem [shape: f32[1,128], index: 2, kind: input, shape index: {}]   ;;  %s559_s3 = inlined_call_operand.vmem [shape: f32[32,128], index: 3, kind: output, shape index: {0}]   ;;  %s560_s4 = inlined_call_operand.vmem [shape: f32[1,2,128], index: 4, kind: output, shape index: {1}]  }
   0x1   :  { %v415_v0 = vld [vmem:[%s556_s1 + $0x78] sm:$0xff]   ;;  %v417_v2 = vld [vmem:[%s556_s1 + $0x70] sm:$0xff]   ;;  %v419_v4 = vld [vmem:[%s556_s1 + $0x68] sm:$0xff]  }
   0x2   :  { %v416_v1 = vld [vmem:[%s556_s1 + $0x38] sm:$0xff]   ;;  %375 = vmatprep.subr.bf16.mxu0 %v415_v0  ;;  %v418_v3 = vld [vmem:[%s556_s1 + $0x30] sm:$0xff]   ;;  %v420_v5 = vld [vmem:[%s556_s1 + $0x28] sm:$0xff]  }
   0x3   :  { %376 = vmatpush3.bf16.msra.mxu0 %v416_v1  ;;  %v421_v6 = vld [vmem:[%s556_s1 + $0x60] sm:$0xff]   ;;  %v423_v8 = vld [vmem:[%s556_s1 + $0x58] sm:$0xff]   ;;  %v429_v9 = vld [vmem:[%s556_s1 + $0x88] sm:$0xff]  }
   0x4   :  { %377 = vmatprep.subr.bf16.mxu0 %v417_v2  ;;  %v422_v7 = vld [vmem:[%s556_s1 + $0x20] sm:$0xff]   ;;  %v424_v10 = vld [vmem:[%s556_s1 + $0x18] sm:$0xff]   ;;  %v425_v11 = vld [vmem:[%s556_s1 + $0x50] sm:$0xff]   ;;  %407 = vmatprep.subr.bf16.mxu1 %v429_v9 }
   0x5   :  { %v426_v12 = vld [vmem:[%s556_s1 + $0x10] sm:$0xff]   ;;  %408 = vmatpush3.bf16.msra.mxu1 %v429_v9  ;;  %v432_v13 = vld [vmem:[%s556_s1 + $0x80] sm:$0xff]   ;;  %v427_v14 = vld [vmem:[%s556_s1 + $0x48] sm:$0xff]  }
   0x6   :  { %409 = vmatprep.subr.bf16.mxu1 %v432_v13  ;;  %v435_v15 = vld [vmem:[%s557_s0 + $0x4] ss:$12 sps:$4 sm:$0xff]   ;;  %v436_v16 = vld [vmem:[%s557_s0 + $0x8] ss:$12 sps:$4 sm:$0xff]   ;;  %v437_v17 = vld [vmem:[%s557_s0 + $0x20] ss:$12 sps:$4 sm:$0xff]  }
   0x7   :  { %378 = vmatpush3.bf16.msra.mxu0 %v418_v3  ;;  %245 = vmatprep.mubr.bf16.mxu0 %v435_v15  ;;  %v428_v18 = vld [vmem:[%s556_s1 + $0x8] sm:$0xff]   ;;  %v430_v19 = vld [vmem:[%s556_s1 + $0x40] sm:$0xff]  }
   0x8   :  { %379 = vmatprep.subr.bf16.mxu0 %v419_v4  ;;  %411 = vmatprep.mubr.msk.bf16.mxu1 %vm206_vm0, %v436_v16  ;;  %v431_v20 = vld [vmem:[%s556_s1] sm:$0xff]   ;;  %v438_v22 = vld [vmem:[%s557_s0 + $0x1c] ss:$12 sps:$4 sm:$0xff]  }
   0x9   :  { %410 = vmatpush3.bf16.msra.mxu1 %v432_v13  ;;  %v433_v21 = vld [vmem:[%s557_s0] ss:$12 sps:$4 sm:$0xff]   ;;  %v440_v23 = vld [vmem:[%s557_s0 + $0x18] ss:$12 sps:$4 sm:$0xff]  }
   0xa   :  { %v348_v27 = vld [vmem:[%s558_s2] ss:$0 sm:$0xff] }
   0xb   :  { %380 = vmatpush3.bf16.msra.mxu0 %v420_v5 }
   0xc   :  { %381 = vmatprep.subr.bf16.mxu0 %v421_v6  ;;  %412 = vmatmul.mubr.msk.bf16.vlgmr.msra.gmra.mxu1 %vm206_vm0, %v437_v17 }
   0xf   :  { %382 = vmatpush3.bf16.msra.mxu0 %v422_v7 }
  0x10   :  { %383 = vmatprep.subr.bf16.mxu0 %v423_v8 }
  0x13   :  { %384 = vmatpush3.bf16.msra.mxu0 %v424_v10 }
  0x14   :  { %385 = vmatprep.subr.bf16.mxu0 %v425_v11 }
  0x17   :  { %386 = vmatpush3.bf16.msra.mxu0 %v426_v12 }
  0x18   :  { %387 = vmatprep.subr.bf16.mxu0 %v427_v14 }
  0x1b   :  { %388 = vmatpush3.bf16.msra.mxu0 %v428_v18 }
  0x1c   :  { %389 = vmatprep.subr.bf16.mxu0 %v430_v19 }
  0x1f   :  { %390 = vmatpush3.bf16.msra.mxu0 %v431_v20 }
  0x22   :  { %246 = vmatmul.mubr.bf16.vlgmr.msra.gmra.mxu0 %v433_v21 }
  0x23   :  { %253 = vmatprep.mubr.bf16.mxu0 %v438_v22 }
  0x2a   :  { %254 = vmatmul.mubr.bf16.gmra.mxu0 %v440_v23 }
  0xcc   :  { %v413_v24 = vpop.f32.mrf.mxu1 }
  0xce   :  { %v296_v28 = vpop.f32.mrf.mxu1 }
  0xd0   :  { %v414_v33 = vpop.f32.mrf.mxu1 }
  0xd2   :  { %v299_v38 = vpop.f32.mrf.mxu1 }
  0xe2   :  { %v391_v25 = vpop.f32.mrf.mxu0 }
  0xe4   :  { %v392_v26 = vpop.f32.mrf.mxu0 }
  0xe5   :  { %v393_v29 = vadd.f32 %v392_v26, %v391_v25 }
  0xe6   :  { %v394_v30 = vpop.f32.mrf.mxu0 }
  0xe7   :  { %v248_v31 = vadd.f32 %v393_v29, %v348_v27 }
  0xe8   :  { %v395_v32 = vpop.f32.mrf.mxu0 }
  0xe9   :  { %v297_v34 = vadd.f32 %v296_v28, %v248_v31  ;;  %v396_v35 = vadd.f32 %v395_v32, %v394_v30 }
  0xea   :  { %v397_v36 = vpop.f32.mrf.mxu0 }
  0xeb   :  { %311 = vst [vmem:[%s559_s3] sm:$0xff] %v297_v34  ;;  %v251_v37 = vadd.f32 %v396_v35, %v348_v27  ;;  %v324_v48 = vmul.f32 %v297_v34, %v297_v34 }
  0xec   :  { %v398_v39 = vpop.f32.mrf.mxu0 }
  0xed   :  { %v300_v40 = vadd.f32 %v299_v38, %v251_v37  ;;  %v399_v41 = vadd.f32 %v398_v39, %v397_v36 }
  0xee   :  { %v400_v42 = vpop.f32.mrf.mxu0 }
  0xef   :  { %312 = vst [vmem:[%s559_s3 + $0x8] sm:$0xff] %v300_v40  ;;  %v256_v43 = vadd.f32 %v399_v41, %v348_v27  ;;  %v325_v45 = vmul.f32 %v300_v40, %v300_v40  ;;  %v315_v49 = vadd.f32 %v300_v40, %v297_v34 }
  0xf0   :  { %v401_v44 = vpop.f32.mrf.mxu0 }
  0xf1   :  { %v305_v46 = vadd.f32 %v413_v24, %v256_v43  ;;  %v402_v47 = vadd.f32 %v401_v44, %v400_v42  ;;  %v328_v52 = vadd.f32 %v325_v45, %v324_v48 }
  0xf3   :  { %313 = vst [vmem:[%s559_s3 + $0x10] sm:$0xff] %v305_v46  ;;  %v326_v50 = vmul.f32 %v305_v46, %v305_v46  ;;  %v259_v51 = vadd.f32 %v402_v47, %v348_v27  ;;  %v316_v53 = vadd.f32 %v315_v49, %v305_v46 }
  0xf5   :  { %v308_v54 = vadd.f32 %v414_v33, %v259_v51  ;;  %v329_v55 = vadd.f32 %v328_v52, %v326_v50 }
  0xf7   :  { %314 = vst [vmem:[%s559_s3 + $0x18] sm:$0xff] %v308_v54  ;;  %v317_v56 = vadd.f32 %v316_v53, %v308_v54  ;;  %v327_v57 = vmul.f32 %v308_v54, %v308_v54 }
  0xf9   :  { %v318_v58 = vrot.slane %v317_v56, 4  ;;  %v330_v59 = vadd.f32 %v329_v55, %v327_v57 }
  0xfb   :  { %v319_v60 = vadd.f32 %v318_v58, %v317_v56  ;;  %v331_v61 = vrot.slane %v330_v59, 4 }
  0xfd   :  { %v320_v62 = vrot.slane %v319_v60, 2  ;;  %v332_v63 = vadd.f32 %v331_v61, %v330_v59 }
  0xff   :  { %v321_v0 = vadd.f32 %v320_v62, %v319_v60  ;;  %v333_v1 = vrot.slane %v332_v63, 2 }
 0x101   :  { %v322_v2 = vrot.slane %v321_v0, 1  ;;  %v334_v3 = vadd.f32 %v333_v1, %v332_v63 }
 0x103   :  { %v335_v4 = vrot.slane %v334_v3, 1  ;;  %v323_v5 = vadd.f32 %v322_v2, %v321_v0 }
 0x105   :  { %v336_v6 = vadd.f32 %v335_v4, %v334_v3 }
 0x107   :  { %v338_v7 = vsel %vm337_vm1, %v323_v5, %v336_v6 }
 0x108   :  { %339 = vst [vmem:[%s560_s4] sm:$0x3] %v338_v7 }

// kernel: decoder_forward.16
= control target key start
LH: loop header
LB: loop body
LE: loop exit
PB: predicated region body
PF: predicated region fallthrough
CT: control target
= control target key end

     0   :  { %s305_s0 = inlined_call_operand.vmem [shape: f32[128,128], index: 0, kind: input, shape index: {}]   ;;  %s306_s1 = inlined_call_operand.vmem [shape: f32[1,128], index: 1, kind: input, shape index: {}]   ;;  %s307_s2 = inlined_call_operand.vmem [shape: f32[1,128], index: 2, kind: input, shape index: {}]   ;;  %s308_s3 = inlined_call_operand.vmem [shape: f32[128,128], index: 3, kind: output, shape index: {}]  }
   0x1   :  { %v14_v0 = vld [vmem:[%s305_s0] sm:$0xff]  ;;  %v15_v4 = vld [vmem:[%s305_s0 + $0x8] sm:$0xff]  ;;  %v16_v5 = vld [vmem:[%s305_s0 + $0x10] sm:$0xff] }
   0x2   :  { %v172_v1 = vld [vmem:[%s306_s1] ss:$0 sm:$0xff]  ;;  %v17_v6 = vld [vmem:[%s305_s0 + $0x18] sm:$0xff]  ;;  %v19_v11 = vld [vmem:[%s305_s0 + $0x28] sm:$0xff] }
   0x3   :  { %v177_v2 = vld [vmem:[%s307_s2] ss:$0 sm:$0xff]  ;;  %v37_v3 = vmul.f32 %v172_v1, %v14_v0  ;;  %v38_v7 = vmul.f32 %v172_v1, %v15_v4  ;;  %v39_v8 = vmul.f32 %v172_v1, %v16_v5  ;;  %v40_v9 = vmul.f32 %v172_v1, %v17_v6  ;;  %v20_v12 = vld [vmem:[%s305_s0 + $0x30] sm:$0xff]  ;;  %v21_v17 = vld [vmem:[%s305_s0 + $0x38] sm:$0xff] }
   0x4   :  { %v18_v10 = vld [vmem:[%s305_s0 + $0x20] sm:$0xff]  ;;  %v42_v15 = vmul.f32 %v172_v1, %v19_v11  ;;  %v43_v16 = vmul.f32 %v172_v1, %v20_v12  ;;  %v44_v21 = vmul.f32 %v172_v1, %v21_v17  ;;  %v23_v30 = vld [vmem:[%s305_s0 + $0x48] sm:$0xff]  ;;  %v24_v31 = vld [vmem:[%s305_s0 + $0x50] sm:$0xff] }
   0x5   :  { %v60_v13 = vadd.f32 %v177_v2, %v37_v3  ;;  %v41_v14 = vmul.f32 %v172_v1, %v18_v10  ;;  %v61_v18 = vadd.f32 %v177_v2, %v38_v7  ;;  %v62_v19 = vadd.f32 %v177_v2, %v39_v8  ;;  %v22_v25 = vld [vmem:[%s305_s0 + $0x40] sm:$0xff]  ;;  %v25_v43 = vld [vmem:[%s305_s0 + $0x58] sm:$0xff]  ;;  %v27_v45 = vld [vmem:[%s305_s0 + $0x68] sm:$0xff] }
   0x6   :  { %v63_v20 = vadd.f32 %v177_v2, %v40_v9  ;;  %v65_v24 = vadd.f32 %v177_v2, %v42_v15  ;;  %v66_v37 = vadd.f32 %v177_v2, %v43_v16  ;;  %v67_v38 = vadd.f32 %v177_v2, %v44_v21  ;;  %v26_v44 = vld [vmem:[%s305_s0 + $0x60] sm:$0xff]  ;;  %v28_v56 = vld [vmem:[%s305_s0 + $0x70] sm:$0xff]  ;;  %v29_v4 = vld [vmem:[%s305_s0 + $0x78] sm:$0xff] }
   0x7   :  { %vm76_vm0 = vcmp.ge.f32.partialorder %v60_v13, 0.0  ;;  %v92_v22 = vmul.f32 0.01, %v60_v13  ;;  %v64_v23 = vadd.f32 %v177_v2, %v41_v14  ;;  %vm77_vm1 = vcmp.ge.f32.partialorder %v61_v18, 0.0 }
   0x8   :  { %v93_v26 = vmul.f32 0.01, %v61_v18  ;;  %vm78_vm2 = vcmp.ge.f32.partialorder %v62_v19, 0.0  ;;  %v94_v27 = vmul.f32 0.01, %v62_v19  ;;  %vm79_vm3 = vcmp.ge.f32.partialorder %v63_v20, 0.0 }
   0x9   :  { %v108_v28 = vsel %vm76_vm0, %v60_v13, %v92_v22  ;;  %v95_v29 = vmul.f32 0.01, %v63_v20  ;;  %vm80_vm4 = vcmp.ge.f32.partialorder %v64_v23, 0.0  ;;  %v96_v34 = vmul.f32 0.01, %v64_v23 }
   0xa   :  { %124 = vst [vmem:[%s308_s3] sm:$0xff] %v108_v28  ;;  %v109_v32 = vsel %vm77_vm1, %v61_v18, %v93_v26  ;;  %v110_v33 = vsel %vm78_vm2, %v62_v19, %v94_v27  ;;  %vm81_vm5 = vcmp.ge.f32.partialorder %v65_v24, 0.0  ;;  %v97_v36 = vmul.f32 0.01, %v65_v24 }
   0xb   :  { %125 = vst [vmem:[%s308_s3 + $0x8] sm:$0xff] %v109_v32  ;;  %126 = vst [vmem:[%s308_s3 + $0x10] sm:$0xff] %v110_v33  ;;  %v111_v35 = vsel %vm79_vm3, %v63_v20, %v95_v29  ;;  %v112_v39 = vsel %vm80_vm4, %v64_v23, %v96_v34  ;;  %v45_v40 = vmul.f32 %v172_v1, %v22_v25  ;;  %vm82_vm6 = vcmp.ge.f32.partialorder %v66_v37, 0.0 }
   0xc   :  { %127 = vst [vmem:[%s308_s3 + $0x18] sm:$0xff] %v111_v35  ;;  %v46_v41 = vmul.f32 %v172_v1, %v23_v30  ;;  %v47_v42 = vmul.f32 %v172_v1, %v24_v31  ;;  %128 = vst [vmem:[%s308_s3 + $0x20] sm:$0xff] %v112_v39  ;;  %v113_v46 = vsel %vm81_vm5, %v65_v24, %v97_v36  ;;  %v98_v47 = vmul.f32 0.01, %v66_v37 }
   0xd   :  { %vm83_vm7 = vcmp.ge.f32.partialorder %v67_v38, 0.0  ;;  %129 = vst [vmem:[%s308_s3 + $0x28] sm:$0xff] %v113_v46  ;;  %v99_v48 = vmul.f32 0.01, %v67_v38  ;;  %v68_v49 = vadd.f32 %v177_v2, %v45_v40  ;;  %v48_v53 = vmul.f32 %v172_v1, %v25_v43 }
   0xe   :  { %v69_v50 = vadd.f32 %v177_v2, %v46_v41  ;;  %v70_v51 = vadd.f32 %v177_v2, %v47_v42  ;;  %v114_v52 = vsel %vm82_vm6, %v66_v37, %v98_v47  ;;  %v49_v54 = vmul.f32 %v172_v1, %v26_v44 }
   0xf   :  { %v50_v55 = vmul.f32 %v172_v1, %v27_v45  ;;  %130 = vst [vmem:[%s308_s3 + $0x30] sm:$0xff] %v114_v52  ;;  %v115_v57 = vsel %vm83_vm7, %v67_v38, %v99_v48  ;;  %vm84_vm8 = vcmp.ge.f32.partialorder %v68_v49, 0.0  ;;  %v100_v58 = vmul.f32 0.01, %v68_v49 }
  0x10   :  { %vm85_vm9 = vcmp.ge.f32.partialorder %v69_v50, 0.0  ;;  %131 = vst [vmem:[%s308_s3 + $0x38] sm:$0xff] %v115_v57  ;;  %v101_v59 = vmul.f32 0.01, %v69_v50  ;;  %vm86_vm10 = vcmp.ge.f32.partialorder %v70_v51, 0.0  ;;  %v71_v61 = vadd.f32 %v177_v2, %v48_v53 }
  0x11   :  { %v102_v60 = vmul.f32 0.01, %v70_v51  ;;  %v116_v62 = vsel %vm84_vm8, %v68_v49, %v100_v58  ;;  %v72_v63 = vadd.f32 %v177_v2, %v49_v54  ;;  %v73_v0 = vadd.f32 %v177_v2, %v50_v55 }
  0x12   :  { %v51_v3 = vmul.f32 %v172_v1, %v28_v56  ;;  %132 = vst [vmem:[%s308_s3 + $0x40] sm:$0xff] %v116_v62  ;;  %v117_v5 = vsel %vm85_vm9, %v69_v50, %v101_v59  ;;  %vm87_vm11 = vcmp.ge.f32.partialorder %v71_v61, 0.0  ;;  %v103_v7 = vmul.f32 0.01, %v71_v61 }
  0x13   :  { %v118_v6 = vsel %vm86_vm10, %v70_v51, %v102_v60  ;;  %133 = vst [vmem:[%s308_s3 + $0x48] sm:$0xff] %v117_v5  ;;  %vm88_vm12 = vcmp.ge.f32.partialorder %v72_v63, 0.0  ;;  %v104_v8 = vmul.f32 0.01, %v72_v63  ;;  %vm89_vm13 = vcmp.ge.f32.partialorder %v73_v0, 0.0 }
  0x14   :  { %134 = vst [vmem:[%s308_s3 + $0x50] sm:$0xff] %v118_v6  ;;  %v105_v9 = vmul.f32 0.01, %v73_v0  ;;  %v119_v10 = vsel %vm87_vm11, %v71_v61, %v103_v7  ;;  %v74_v11 = vadd.f32 %v177_v2, %v51_v3  ;;  %v52_v12 = vmul.f32 %v172_v1, %v29_v4 }
  0x15   :  { %135 = vst [vmem:[%s308_s3 + $0x58] sm:$0xff] %v119_v10  ;;  %v120_v13 = vsel %vm88_vm12, %v72_v63, %v104_v8 }
  0x16   :  { %v121_v14 = vsel %vm89_vm13, %v73_v0, %v105_v9  ;;  %136 = vst [vmem:[%s308_s3 + $0x60] sm:$0xff] %v120_v13  ;;  %vm90_vm14 = vcmp.ge.f32.partialorder %v74_v11, 0.0  ;;  %v106_v15 = vmul.f32 0.01, %v74_v11  ;;  %v75_v16 = vadd.f32 %v177_v2, %v52_v12 }
  0x17   :  { %137 = vst [vmem:[%s308_s3 + $0x68] sm:$0xff] %v121_v14 }
  0x18   :  { %v122_v17 = vsel %vm90_vm14, %v74_v11, %v106_v15  ;;  %vm91_vm15 = vcmp.ge.f32.partialorder %v75_v16, 0.0  ;;  %v107_v1 = vmul.f32 0.01, %v75_v16 }
  0x19   :  { %138 = vst [vmem:[%s308_s3 + $0x70] sm:$0xff] %v122_v17 }
  0x1a   :  { %v123_v18 = vsel %vm91_vm15, %v75_v16, %v107_v1 }
  0x1b   :  { %139 = vst [vmem:[%s308_s3 + $0x78] sm:$0xff] %v123_v18 }

// kernel: decoder_forward.15
= control target key start
LH: loop header
LB: loop body
LE: loop exit
PB: predicated region body
PF: predicated region fallthrough
CT: control target
= control target key end

     0   :  { %v477_v0 = vmov 0   ;;  %vm184_vm0 = vcmask 130048   ;;  %vm380_vm1 = vcmask 1040384   ;;  %s682_s1 = inlined_call_operand.vmem [shape: bf16[144,128], index: 1, kind: input, shape index: {}]   ;;  %s683_s0 = inlined_call_operand.vmem [shape: bf16[128,144], index: 0, kind: input, shape index: {}]   ;;  %s684_s2 = inlined_call_operand.vmem [shape: f32[1,128], index: 2, kind: input, shape index: {}]   ;;  %s685_s3 = inlined_call_operand.vmem [shape: f32[128,128], index: 3, kind: output, shape index: {0}]   ;;  %s686_s4 = inlined_call_operand.vmem [shape: f32[1,2,128], index: 4, kind: output, shape index: {1}]  }
   0x1   :  { %209 = vmatprep.subr.bf16.mxu0 %v477_v0  ;;  %v444_v1 = vld [vmem:[%s682_s1 + $0x38] sm:$0xff]   ;;  %425 = vmatprep.subr.bf16.mxu1 %v477_v0  ;;  %v445_v2 = vld [vmem:[%s682_s1 + $0x30] sm:$0xff]   ;;  %v446_v3 = vld [vmem:[%s682_s1 + $0x28] sm:$0xff]  }
   0x2   :  { %210 = vmatpush1.bf16.msra.mxu0 %v444_v1  ;;  %434 = vmatpush1.bf16.msra.mxu1 %v444_v1  ;;  %v447_v4 = vld [vmem:[%s682_s1 + $0x20] sm:$0xff]   ;;  %v448_v7 = vld [vmem:[%s682_s1 + $0x18] sm:$0xff]   ;;  %v449_v8 = vld [vmem:[%s682_s1 + $0x10] sm:$0xff]  }
   0x3   :  { %211 = vmatprep.subr.bf16.mxu0 %v477_v0  ;;  %426 = vmatprep.subr.bf16.mxu1 %v477_v0  ;;  %v455_v5 = vld [vmem:[%s683_s0 + $0x4] ss:$8 sps:$4 sm:$0xff]   ;;  %v453_v12 = vld [vmem:[%s683_s0] ss:$8 sps:$4 sm:$0xff]   ;;  %v456_v14 = vld [vmem:[%s683_s0 + $0x14] ss:$8 sps:$4 sm:$0xff]  }
   0x4   :  { %417 = vmatprep.mubr.msk.bf16.mxu0 %vm184_vm0, %v455_v5  ;;  %v461_v6 = vld [vmem:[%s683_s0 + $0x44] ss:$8 sps:$4 sm:$0xff]   ;;  %v459_v13 = vld [vmem:[%s683_s0 + $0x40] ss:$8 sps:$4 sm:$0xff]   ;;  %v465_v15 = vld [vmem:[%s683_s0 + $0x54] ss:$8 sps:$4 sm:$0xff]  }
   0x5   :  { %421 = vmatprep.mubr.msk.bf16.mxu1 %vm184_vm0, %v461_v6  ;;  %v450_v9 = vld [vmem:[%s682_s1 + $0x8] sm:$0xff]   ;;  %v451_v10 = vld [vmem:[%s682_s1] sm:$0xff]   ;;  %v458_v16 = vld [vmem:[%s683_s0 + $0x10] ss:$8 sps:$4 sm:$0xff]  }
   0x6   :  { %212 = vmatpush1.bf16.msra.mxu0 %v445_v2  ;;  %435 = vmatpush1.bf16.msra.mxu1 %v445_v2  ;;  %v452_v11 = vld [vmem:[%s682_s1 + $0x40] sm:$0xff]   ;;  %v467_v17 = vld [vmem:[%s683_s0 + $0x50] ss:$8 sps:$4 sm:$0xff]   ;;  %v468_v22 = vld [vmem:[%s683_s0 + $0x34] ss:$8 sps:$4 sm:$0xff]  }
   0x7   :  { %213 = vmatprep.subr.bf16.mxu0 %v477_v0  ;;  %427 = vmatprep.subr.bf16.mxu1 %v477_v0  ;;  %v462_v18 = vld [vmem:[%s683_s0 + $0x24] ss:$8 sps:$4 sm:$0xff]   ;;  %v464_v20 = vld [vmem:[%s683_s0 + $0x20] ss:$8 sps:$4 sm:$0xff]   ;;  %v474_v23 = vld [vmem:[%s683_s0 + $0x74] ss:$8 sps:$4 sm:$0xff]  }
   0x8   :  { %v471_v19 = vld [vmem:[%s683_s0 + $0x64] ss:$8 sps:$4 sm:$0xff]   ;;  %v473_v21 = vld [vmem:[%s683_s0 + $0x60] ss:$8 sps:$4 sm:$0xff]   ;;  %v470_v24 = vld [vmem:[%s683_s0 + $0x30] ss:$8 sps:$4 sm:$0xff]  }
   0x9   :  { %v476_v25 = vld [vmem:[%s683_s0 + $0x70] ss:$8 sps:$4 sm:$0xff]   ;;  %v589_v26 = vld [vmem:[%s684_s2] ss:$0 sm:$0xff] }
   0xa   :  { %214 = vmatpush1.bf16.msra.mxu0 %v446_v3  ;;  %436 = vmatpush1.bf16.msra.mxu1 %v446_v3 }
   0xb   :  { %215 = vmatprep.subr.bf16.mxu0 %v477_v0  ;;  %428 = vmatprep.subr.bf16.mxu1 %v477_v0 }
   0xe   :  { %216 = vmatpush1.bf16.msra.mxu0 %v447_v4  ;;  %437 = vmatpush1.bf16.msra.mxu1 %v447_v4 }
   0xf   :  { %217 = vmatprep.subr.bf16.mxu0 %v477_v0  ;;  %429 = vmatprep.subr.bf16.mxu1 %v477_v0 }
  0x12   :  { %218 = vmatpush1.bf16.msra.mxu0 %v448_v7  ;;  %438 = vmatpush1.bf16.msra.mxu1 %v448_v7 }
  0x13   :  { %219 = vmatprep.subr.bf16.mxu0 %v477_v0  ;;  %430 = vmatprep.subr.bf16.mxu1 %v477_v0 }
  0x16   :  { %220 = vmatpush1.bf16.msra.mxu0 %v449_v8  ;;  %439 = vmatpush1.bf16.msra.mxu1 %v449_v8 }
  0x17   :  { %221 = vmatprep.subr.bf16.mxu0 %v477_v0  ;;  %431 = vmatprep.subr.bf16.mxu1 %v477_v0 }
  0x1a   :  { %222 = vmatpush1.bf16.msra.mxu0 %v450_v9  ;;  %440 = vmatpush1.bf16.msra.mxu1 %v450_v9 }
  0x1b   :  { %223 = vmatprep.subr.bf16.mxu0 %v477_v0  ;;  %432 = vmatprep.subr.bf16.mxu1 %v477_v0 }
  0x1e   :  { %224 = vmatpush1.bf16.msra.mxu0 %v451_v10  ;;  %441 = vmatpush1.bf16.msra.mxu1 %v451_v10 }
  0x1f   :  { %239 = vmatprep.subr.bf16.mxu0 %v477_v0  ;;  %433 = vmatprep.subr.bf16.mxu1 %v477_v0 }
  0x22   :  { %240 = vmatpush2.bf16.msra.mxu0 %v452_v11  ;;  %442 = vmatpush2.bf16.msra.mxu1 %v452_v11 }
  0x25   :  { %242 = vmatmul.mubr.bf16.vlgmr.msra.gmra.mxu0 %v453_v12  ;;  %274 = vmatmul.mubr.bf16.vlgmr.msra.gmra.mxu1 %v459_v13 }
  0x26   :  { %418 = vmatprep.mubr.msk.bf16.mxu0 %vm184_vm0, %v456_v14  ;;  %422 = vmatprep.mubr.msk.bf16.mxu1 %vm184_vm0, %v465_v15 }
  0x2d   :  { %250 = vmatmul.mubr.bf16.gmra.mxu0 %v458_v16  ;;  %282 = vmatmul.mubr.bf16.gmra.mxu1 %v467_v17 }
  0x2e   :  { %419 = vmatprep.mubr.msk.bf16.mxu0 %vm184_vm0, %v462_v18  ;;  %423 = vmatprep.mubr.msk.bf16.mxu1 %vm184_vm0, %v471_v19 }
  0x35   :  { %258 = vmatmul.mubr.bf16.gmra.mxu0 %v464_v20  ;;  %290 = vmatmul.mubr.bf16.gmra.mxu1 %v473_v21 }
  0x36   :  { %420 = vmatprep.mubr.msk.bf16.mxu0 %vm184_vm0, %v468_v22  ;;  %424 = vmatprep.mubr.msk.bf16.mxu1 %vm184_vm0, %v474_v23 }
  0x3d   :  { %266 = vmatmul.mubr.bf16.gmra.mxu0 %v470_v24  ;;  %298 = vmatmul.mubr.bf16.gmra.mxu1 %v476_v25 }
  0xe5   :  { %v243_v27 = vpop.f32.mrf.mxu0  ;;  %v275_v28 = vpop.f32.mrf.mxu1 }
  0xe6   :  { %v244_v29 = vadd.f32 %v589_v26, %v243_v27  ;;  %v593_v30 = vadd.f32 %v589_v26, %v275_v28 }
  0xe7   :  { %v245_v31 = vpop.f32.mrf.mxu0  ;;  %v277_v32 = vpop.f32.mrf.mxu1 }
  0xe8   :  { %306 = vst [vmem:[%s685_s3] sm:$0xff] %v244_v29  ;;  %314 = vst [vmem:[%s685_s3 + $0x40] sm:$0xff] %v593_v30  ;;  %v343_v56 = vmul.f32 %v244_v29, %v244_v29 }
  0xe9   :  { %v246_v33 = vpop.f32.mrf.mxu0  ;;  %v278_v34 = vpop.f32.mrf.mxu1 }
  0xea   :  { %v247_v35 = vadd.f32 %v589_v26, %v246_v33  ;;  %v604_v36 = vadd.f32 %v589_v26, %v278_v34  ;;  %v351_v34 = vmul.f32 %v593_v30, %v593_v30 }
  0xeb   :  { %v248_v37 = vpop.f32.mrf.mxu0  ;;  %v280_v38 = vpop.f32.mrf.mxu1 }
  0xec   :  { %307 = vst [vmem:[%s685_s3 + $0x8] sm:$0xff] %v247_v35  ;;  %315 = vst [vmem:[%s685_s3 + $0x48] sm:$0xff] %v604_v36  ;;  %v344_v51 = vmul.f32 %v247_v35, %v247_v35  ;;  %v322_v60 = vadd.f32 %v247_v35, %v244_v29 }
  0xed   :  { %v251_v39 = vpop.f32.mrf.mxu0  ;;  %v283_v40 = vpop.f32.mrf.mxu1 }
  0xee   :  { %v252_v41 = vadd.f32 %v589_v26, %v251_v39  ;;  %v615_v42 = vadd.f32 %v589_v26, %v283_v40  ;;  %v359_v61 = vadd.f32 %v344_v51, %v343_v56 }
  0xef   :  { %v253_v43 = vpop.f32.mrf.mxu0  ;;  %v285_v44 = vpop.f32.mrf.mxu1 }
  0xf0   :  { %308 = vst [vmem:[%s685_s3 + $0x10] sm:$0xff] %v252_v41  ;;  %316 = vst [vmem:[%s685_s3 + $0x50] sm:$0xff] %v615_v42  ;;  %v345_v57 = vmul.f32 %v252_v41, %v252_v41  ;;  %v323_v1 = vadd.f32 %v322_v60, %v252_v41  ;;  %v353_v40 = vmul.f32 %v615_v42, %v615_v42 }
  0xf1   :  { %v254_v45 = vpop.f32.mrf.mxu0  ;;  %v286_v46 = vpop.f32.mrf.mxu1 }
  0xf2   :  { %v255_v47 = vadd.f32 %v589_v26, %v254_v45  ;;  %v626_v48 = vadd.f32 %v589_v26, %v286_v46  ;;  %v360_v4 = vadd.f32 %v359_v61, %v345_v57 }
  0xf3   :  { %v256_v49 = vpop.f32.mrf.mxu0  ;;  %v288_v50 = vpop.f32.mrf.mxu1 }
  0xf4   :  { %309 = vst [vmem:[%s685_s3 + $0x18] sm:$0xff] %v255_v47  ;;  %317 = vst [vmem:[%s685_s3 + $0x58] sm:$0xff] %v626_v48  ;;  %v346_v62 = vmul.f32 %v255_v47, %v255_v47  ;;  %v324_v7 = vadd.f32 %v323_v1, %v255_v47  ;;  %v354_v44 = vmul.f32 %v626_v48, %v626_v48 }
  0xf5   :  { %v259_v52 = vpop.f32.mrf.mxu0  ;;  %v291_v53 = vpop.f32.mrf.mxu1 }
  0xf6   :  { %v260_v54 = vadd.f32 %v589_v26, %v259_v52  ;;  %v292_v55 = vadd.f32 %v589_v26, %v291_v53  ;;  %v361_v9 = vadd.f32 %v360_v4, %v346_v62 }
  0xf7   :  { %v261_v58 = vpop.f32.mrf.mxu0  ;;  %v293_v59 = vpop.f32.mrf.mxu1 }
  0xf8   :  { %310 = vst [vmem:[%s685_s3 + $0x20] sm:$0xff] %v260_v54  ;;  %318 = vst [vmem:[%s685_s3 + $0x60] sm:$0xff] %v292_v55  ;;  %v347_v8 = vmul.f32 %v260_v54, %v260_v54  ;;  %v325_v12 = vadd.f32 %v324_v7, %v260_v54 }
  0xf9   :  { %v262_v63 = vpop.f32.mrf.mxu0  ;;  %v294_v0 = vpop.f32.mrf.mxu1 }
  0xfa   :  { %v263_v2 = vadd.f32 %v589_v26, %v262_v63  ;;  %v295_v3 = vadd.f32 %v589_v26, %v294_v0  ;;  %v362_v18 = vadd.f32 %v361_v9, %v347_v8 }
  0xfb   :  { %v264_v5 = vpop.f32.mrf.mxu0  ;;  %v296_v6 = vpop.f32.mrf.mxu1 }
  0xfc   :  { %311 = vst [vmem:[%s685_s3 + $0x28] sm:$0xff] %v263_v2  ;;  %319 = vst [vmem:[%s685_s3 + $0x68] sm:$0xff] %v295_v3  ;;  %v348_v13 = vmul.f32 %v263_v2, %v263_v2  ;;  %v326_v19 = vadd.f32 %v325_v12, %v263_v2  ;;  %v356_v51 = vmul.f32 %v295_v3, %v295_v3 }
  0xfd   :  { %v267_v10 = vpop.f32.mrf.mxu0  ;;  %v299_v11 = vpop.f32.mrf.mxu1 }
  0xfe   :  { %v268_v14 = vadd.f32 %v589_v26, %v267_v10  ;;  %v300_v15 = vadd.f32 %v589_v26, %v299_v11  ;;  %v363_v23 = vadd.f32 %v362_v18, %v348_v13 }
  0xff   :  { %v269_v16 = vpop.f32.mrf.mxu0  ;;  %v301_v17 = vpop.f32.mrf.mxu1 }
 0x100   :  { %312 = vst [vmem:[%s685_s3 + $0x30] sm:$0xff] %v268_v14  ;;  %v349_v20 = vmul.f32 %v268_v14, %v268_v14  ;;  %320 = vst [vmem:[%s685_s3 + $0x70] sm:$0xff] %v300_v15  ;;  %v327_v24 = vadd.f32 %v326_v19, %v268_v14  ;;  %v357_v54 = vmul.f32 %v300_v15, %v300_v15 }
 0x101   :  { %v270_v21 = vpop.f32.mrf.mxu0  ;;  %v302_v22 = vpop.f32.mrf.mxu1 }
 0x102   :  { %v271_v25 = vadd.f32 %v589_v26, %v270_v21  ;;  %v303_v27 = vadd.f32 %v589_v26, %v302_v22  ;;  %v364_v31 = vadd.f32 %v363_v23, %v349_v20  ;;  %v352_v26 = vmul.f32 %v604_v36, %v604_v36 }
 0x103   :  { %v272_v28 = vpop.f32.mrf.mxu0  ;;  %v304_v29 = vpop.f32.mrf.mxu1 }
 0x104   :  { %313 = vst [vmem:[%s685_s3 + $0x38] sm:$0xff] %v271_v25  ;;  %v328_v32 = vadd.f32 %v327_v24, %v271_v25  ;;  %v350_v33 = vmul.f32 %v271_v25, %v271_v25  ;;  %321 = vst [vmem:[%s685_s3 + $0x78] sm:$0xff] %v303_v27  ;;  %v358_v58 = vmul.f32 %v303_v27, %v303_v27 }
 0x106   :  { %v329_v35 = vadd.f32 %v328_v32, %v593_v30  ;;  %v365_v37 = vadd.f32 %v364_v31, %v350_v33  ;;  %v355_v30 = vmul.f32 %v292_v55, %v292_v55 }
 0x108   :  { %v330_v38 = vadd.f32 %v329_v35, %v604_v36  ;;  %v366_v39 = vadd.f32 %v365_v37, %v351_v34 }
 0x10a   :  { %v367_v41 = vadd.f32 %v366_v39, %v352_v26  ;;  %v331_v43 = vadd.f32 %v330_v38, %v615_v42 }
 0x10c   :  { %v332_v45 = vadd.f32 %v331_v43, %v626_v48  ;;  %v368_v46 = vadd.f32 %v367_v41, %v353_v40 }
 0x10e   :  { %v333_v47 = vadd.f32 %v332_v45, %v292_v55  ;;  %v369_v49 = vadd.f32 %v368_v46, %v354_v44 }
 0x110   :  { %v334_v50 = vadd.f32 %v333_v47, %v295_v3  ;;  %v370_v52 = vadd.f32 %v369_v49, %v355_v30 }
 0x112   :  { %v371_v36 = vadd.f32 %v370_v52, %v356_v51  ;;  %v335_v53 = vadd.f32 %v334_v50, %v300_v15 }
 0x114   :  { %v372_v56 = vadd.f32 %v371_v36, %v357_v54  ;;  %v336_v57 = vadd.f32 %v335_v53, %v303_v27 }
 0x116   :  { %v337_v59 = vrot.slane %v336_v57, 4  ;;  %v373_v42 = vadd.f32 %v372_v56, %v358_v58 }
 0x118   :  { %v338_v60 = vadd.f32 %v337_v59, %v336_v57  ;;  %v374_v61 = vrot.slane %v373_v42, 4 }
 0x11a   :  { %v339_v62 = vrot.slane %v338_v60, 2  ;;  %v375_v63 = vadd.f32 %v374_v61, %v373_v42 }
 0x11c   :  { %v340_v48 = vadd.f32 %v339_v62, %v338_v60  ;;  %v376_v0 = vrot.slane %v375_v63, 2 }
 0x11e   :  { %v341_v1 = vrot.slane %v340_v48, 1  ;;  %v377_v55 = vadd.f32 %v376_v0, %v375_v63 }
 0x120   :  { %v378_v2 = vrot.slane %v377_v55, 1  ;;  %v342_v3 = vadd.f32 %v341_v1, %v340_v48 }
 0x122   :  { %v379_v4 = vadd.f32 %v378_v2, %v377_v55 }
 0x124   :  { %v381_v5 = vsel %vm380_vm1, %v342_v3, %v379_v4 }
 0x125   :  { %382 = vst [vmem:[%s686_s4] sm:$0x3] %v381_v5 }

// kernel: decoder_forward.17
= control target key start
LH: loop header
LB: loop body
LE: loop exit
PB: predicated region body
PF: predicated region fallthrough
CT: control target
= control target key end

     0   :  { %vm381_vm0 = vcmask 1043456   ;;  %vm284_vm1 = vcmask 588800   ;;  %vm940_vm2 = vcmask 1040384   ;;  %s1805_s1 = inlined_call_operand.vmem [shape: bf16[72,128], index: 1, kind: input, shape index: {}]   ;;  %s1806_s0 = inlined_call_operand.vmem [shape: bf16[512,72], index: 0, kind: input, shape index: {}]   ;;  %s1807_s2 = inlined_call_operand.vmem [shape: f32[1,128], index: 2, kind: input, shape index: {}]   ;;  %s1808_s3 = inlined_call_operand.vmem [shape: f32[512,128], index: 3, kind: output, shape index: {0}]   ;;  %s1809_s4 = inlined_call_operand.vmem [shape: f32[1,2,128], index: 4, kind: output, shape index: {1}]  }
   0x1   :  { %v1144_v0 = vld [vmem:[%s1805_s1 + $0x20] ss:$0 sps:$4 sm:$0xff]   ;;  %v1145_v1 = vld [vmem:[%s1805_s1 + $0x18] sm:$0xff]   ;;  %v1146_v3 = vld [vmem:[%s1805_s1 + $0x10] sm:$0xff]  }
   0x2   :  { %1142 = vmatprep.subr.msk.bf16.mxu0 %vm381_vm0, %v1144_v0  ;;  %v383_v2 = vsel %vm381_vm0, %v1144_v0, 0  ;;  %1143 = vmatprep.subr.msk.bf16.mxu1 %vm381_vm0, %v1144_v0  ;;  %v1149_v4 = vld [vmem:[%s1806_s0] sm:$0xff]   ;;  %v1147_v5 = vld [vmem:[%s1805_s1 + $0x8] sm:$0xff]   ;;  %v1151_v8 = vld [vmem:[%s1806_s0 + $0x10] sm:$0xff]  }
   0x3   :  { %1059 = vmatpush3.bf16.msra.mxu0 %v383_v2  ;;  %1137 = vmatpush3.bf16.msra.mxu1 %v383_v2  ;;  %v1148_v6 = vld [vmem:[%s1805_s1] sm:$0xff]   ;;  %v1150_v7 = vld [vmem:[%s1806_s0 + $0x8] sm:$0xff]   ;;  %v1167_v11 = vld [vmem:[%s1806_s0 + $0x90] sm:$0xff]  }
   0x4   :  { %1060 = vmatprep.subr.bf16.mxu0 %v1145_v1  ;;  %1133 = vmatprep.subr.bf16.mxu1 %v1145_v1  ;;  %v1165_v9 = vld [vmem:[%s1806_s0 + $0x80] sm:$0xff]   ;;  %v1166_v10 = vld [vmem:[%s1806_s0 + $0x88] sm:$0xff]   ;;  %v1152_v12 = vld [vmem:[%s1806_s0 + $0x18] sm:$0xff]  }
   0x5   :  { %1068 = vmatprep.mubr.msk.bf16.mxu0 %vm284_vm1, %v1149_v4  ;;  %1100 = vmatprep.mubr.msk.bf16.mxu1 %vm284_vm1, %v1165_v9  ;;  %v1153_v13 = vld [vmem:[%s1806_s0 + $0x20] sm:$0xff]   ;;  %v1168_v14 = vld [vmem:[%s1806_s0 + $0x98] sm:$0xff]   ;;  %v1154_v16 = vld [vmem:[%s1806_s0 + $0x28] sm:$0xff]  }
   0x6   :  { %v1169_v15 = vld [vmem:[%s1806_s0 + $0xa0] sm:$0xff]   ;;  %v1155_v17 = vld [vmem:[%s1806_s0 + $0x30] sm:$0xff]   ;;  %v1170_v18 = vld [vmem:[%s1806_s0 + $0xa8] sm:$0xff]  }
   0x7   :  { %1061 = vmatpush3.bf16.msra.mxu0 %v1145_v1  ;;  %1138 = vmatpush3.bf16.msra.mxu1 %v1145_v1  ;;  %v1171_v19 = vld [vmem:[%s1806_s0 + $0xb0] sm:$0xff]   ;;  %v1156_v20 = vld [vmem:[%s1806_s0 + $0x38] sm:$0xff]   ;;  %v1157_v21 = vld [vmem:[%s1806_s0 + $0x40] sm:$0xff]  }
   0x8   :  { %1062 = vmatprep.subr.bf16.mxu0 %v1146_v3  ;;  %1134 = vmatprep.subr.bf16.mxu1 %v1146_v3  ;;  %v1172_v22 = vld [vmem:[%s1806_s0 + $0xb8] sm:$0xff]   ;;  %v1173_v23 = vld [vmem:[%s1806_s0 + $0xc0] sm:$0xff]   ;;  %v1158_v24 = vld [vmem:[%s1806_s0 + $0x48] sm:$0xff]  }
   0x9   :  { %v1159_v25 = vld [vmem:[%s1806_s0 + $0x50] sm:$0xff]   ;;  %v1174_v26 = vld [vmem:[%s1806_s0 + $0xc8] sm:$0xff]   ;;  %v1160_v28 = vld [vmem:[%s1806_s0 + $0x58] sm:$0xff]  }
   0xa   :  { %v1175_v27 = vld [vmem:[%s1806_s0 + $0xd0] sm:$0xff]   ;;  %v1161_v29 = vld [vmem:[%s1806_s0 + $0x60] sm:$0xff]   ;;  %v1176_v30 = vld [vmem:[%s1806_s0 + $0xd8] sm:$0xff]  }
   0xb   :  { %1063 = vmatpush3.bf16.msra.mxu0 %v1146_v3  ;;  %1139 = vmatpush3.bf16.msra.mxu1 %v1146_v3  ;;  %v1177_v31 = vld [vmem:[%s1806_s0 + $0xe0] sm:$0xff]   ;;  %v1162_v32 = vld [vmem:[%s1806_s0 + $0x68] sm:$0xff]   ;;  %v1163_v33 = vld [vmem:[%s1806_s0 + $0x70] sm:$0xff]  }
   0xc   :  { %1064 = vmatprep.subr.bf16.mxu0 %v1147_v5  ;;  %1135 = vmatprep.subr.bf16.mxu1 %v1147_v5  ;;  %v1178_v34 = vld [vmem:[%s1806_s0 + $0xe8] sm:$0xff]   ;;  %v1179_v35 = vld [vmem:[%s1806_s0 + $0xf0] sm:$0xff]   ;;  %v1164_v36 = vld [vmem:[%s1806_s0 + $0x78] sm:$0xff]  }
   0xd   :  { %v1180_v37 = vld [vmem:[%s1806_s0 + $0xf8] sm:$0xff]   ;;  %v1352_v38 = vld [vmem:[%s1807_s2] ss:$0 sm:$0xff] }
   0xf   :  { %1065 = vmatpush3.bf16.msra.mxu0 %v1147_v5  ;;  %1140 = vmatpush3.bf16.msra.mxu1 %v1147_v5 }
  0x10   :  { %1066 = vmatprep.subr.bf16.mxu0 %v1148_v6  ;;  %1136 = vmatprep.subr.bf16.mxu1 %v1148_v6 }
  0x13   :  { %1067 = vmatpush3.bf16.msra.mxu0 %v1148_v6  ;;  %1141 = vmatpush3.bf16.msra.mxu1 %v1148_v6 }
  0x16   :  { %1069 = vmatmul.mubr.msk.bf16.vlgmr.msra.gmra.mxu0 %vm284_vm1, %v1150_v7  ;;  %1101 = vmatmul.mubr.msk.bf16.vlgmr.msra.gmra.mxu1 %vm284_vm1, %v1166_v10 }
  0x17   :  { %1072 = vmatprep.mubr.msk.bf16.mxu0 %vm284_vm1, %v1151_v8  ;;  %1104 = vmatprep.mubr.msk.bf16.mxu1 %vm284_vm1, %v1167_v11 }
  0x1e   :  { %1073 = vmatmul.mubr.msk.bf16.gmra.mxu0 %vm284_vm1, %v1152_v12  ;;  %1105 = vmatmul.mubr.msk.bf16.gmra.mxu1 %vm284_vm1, %v1168_v14 }
  0x1f   :  { %1076 = vmatprep.mubr.msk.bf16.mxu0 %vm284_vm1, %v1153_v13  ;;  %1108 = vmatprep.mubr.msk.bf16.mxu1 %vm284_vm1, %v1169_v15 }
  0x26   :  { %1077 = vmatmul.mubr.msk.bf16.gmra.mxu0 %vm284_vm1, %v1154_v16  ;;  %1109 = vmatmul.mubr.msk.bf16.gmra.mxu1 %vm284_vm1, %v1170_v18 }
  0x27   :  { %1080 = vmatprep.mubr.msk.bf16.mxu0 %vm284_vm1, %v1155_v17  ;;  %1112 = vmatprep.mubr.msk.bf16.mxu1 %vm284_vm1, %v1171_v19 }
  0x2e   :  { %1081 = vmatmul.mubr.msk.bf16.gmra.mxu0 %vm284_vm1, %v1156_v20  ;;  %1113 = vmatmul.mubr.msk.bf16.gmra.mxu1 %vm284_vm1, %v1172_v22 }
  0x2f   :  { %1084 = vmatprep.mubr.msk.bf16.mxu0 %vm284_vm1, %v1157_v21  ;;  %1116 = vmatprep.mubr.msk.bf16.mxu1 %vm284_vm1, %v1173_v23 }
  0x36   :  { %1085 = vmatmul.mubr.msk.bf16.gmra.mxu0 %vm284_vm1, %v1158_v24  ;;  %1117 = vmatmul.mubr.msk.bf16.gmra.mxu1 %vm284_vm1, %v1174_v26 }
  0x37   :  { %1088 = vmatprep.mubr.msk.bf16.mxu0 %vm284_vm1, %v1159_v25  ;;  %1120 = vmatprep.mubr.msk.bf16.mxu1 %vm284_vm1, %v1175_v27 }
  0x3e   :  { %1089 = vmatmul.mubr.msk.bf16.gmra.mxu0 %vm284_vm1, %v1160_v28  ;;  %1121 = vmatmul.mubr.msk.bf16.gmra.mxu1 %vm284_vm1, %v1176_v30 }
  0x3f   :  { %1092 = vmatprep.mubr.msk.bf16.mxu0 %vm284_vm1, %v1161_v29  ;;  %1124 = vmatprep.mubr.msk.bf16.mxu1 %vm284_vm1, %v1177_v31 }
  0x46   :  { %1093 = vmatmul.mubr.msk.bf16.gmra.mxu0 %vm284_vm1, %v1162_v32  ;;  %1125 = vmatmul.mubr.msk.bf16.gmra.mxu1 %vm284_vm1, %v1178_v34 }
  0x47   :  { %1096 = vmatprep.mubr.msk.bf16.mxu0 %vm284_vm1, %v1163_v33  ;;  %1128 = vmatprep.mubr.msk.bf16.mxu1 %vm284_vm1, %v1179_v35 }
  0x4e   :  { %1097 = vmatmul.mubr.msk.bf16.gmra.mxu0 %vm284_vm1, %v1164_v36  ;;  %1129 = vmatmul.mubr.msk.bf16.gmra.mxu1 %vm284_vm1, %v1180_v37 }
  0xd6   :  { %v1070_v39 = vpop.f32.mrf.mxu0  ;;  %v1102_v42 = vpop.f32.mrf.mxu1 }
  0xd7   :  { %v428_v40 = vadd.f32 %v1070_v39, %v1352_v38  ;;  %v1360_v44 = vadd.f32 %v1102_v42, %v1352_v38 }
  0xd8   :  { %v419_v41 = vpop.f32.mrf.mxu0  ;;  %v547_v46 = vpop.f32.mrf.mxu1 }
  0xd9   :  { %676 = vst [vmem:[%s1808_s3 + $0x10] sm:$0xff] %v428_v40  ;;  %v420_v43 = vadd.f32 %v1352_v38, %v419_v41  ;;  %708 = vst [vmem:[%s1808_s3 + $0x110] sm:$0xff] %v1360_v44  ;;  %v1371_v48 = vadd.f32 %v1352_v38, %v547_v46  ;;  %v809_v62 = vmul.f32 %v428_v40, %v428_v40 }
  0xda   :  { %v1071_v45 = vpop.f32.mrf.mxu0  ;;  %v1103_v50 = vpop.f32.mrf.mxu1 }
  0xdb   :  { %674 = vst [vmem:[%s1808_s3] sm:$0xff] %v420_v43  ;;  %v431_v47 = vadd.f32 %v1071_v45, %v1352_v38  ;;  %706 = vst [vmem:[%s1808_s3 + $0x100] sm:$0xff] %v1371_v48  ;;  %v1382_v52 = vadd.f32 %v1103_v50, %v1352_v38  ;;  %v807_v55 = vmul.f32 %v420_v43, %v420_v43 }
  0xdc   :  { %v422_v49 = vpop.f32.mrf.mxu0  ;;  %v550_v54 = vpop.f32.mrf.mxu1 }
  0xdd   :  { %677 = vst [vmem:[%s1808_s3 + $0x18] sm:$0xff] %v431_v47  ;;  %v423_v51 = vadd.f32 %v1352_v38, %v422_v49  ;;  %709 = vst [vmem:[%s1808_s3 + $0x118] sm:$0xff] %v1382_v52  ;;  %v1393_v60 = vadd.f32 %v1352_v38, %v550_v54  ;;  %v810_v5 = vmul.f32 %v431_v47, %v431_v47 }
  0xde   :  { %v1074_v53 = vpop.f32.mrf.mxu0  ;;  %v1106_v61 = vpop.f32.mrf.mxu1 }
  0xdf   :  { %675 = vst [vmem:[%s1808_s3 + $0x8] sm:$0xff] %v423_v51  ;;  %v738_v56 = vadd.f32 %v423_v51, %v420_v43  ;;  %v808_v57 = vmul.f32 %v423_v51, %v423_v51  ;;  %v444_v58 = vadd.f32 %v1074_v53, %v1352_v38  ;;  %707 = vst [vmem:[%s1808_s3 + $0x108] sm:$0xff] %v1393_v60 }
  0xe0   :  { %v435_v59 = vpop.f32.mrf.mxu0  ;;  %v1404_v3 = vadd.f32 %v1106_v61, %v1352_v38  ;;  %v563_v4 = vpop.f32.mrf.mxu1 }
  0xe1   :  { %v739_v63 = vadd.f32 %v738_v56, %v428_v40  ;;  %v871_v0 = vadd.f32 %v808_v57, %v807_v55  ;;  %680 = vst [vmem:[%s1808_s3 + $0x30] sm:$0xff] %v444_v58  ;;  %v436_v1 = vadd.f32 %v1352_v38, %v435_v59  ;;  %v1415_v10 = vadd.f32 %v1352_v38, %v563_v4 }
  0xe2   :  { %v1075_v2 = vpop.f32.mrf.mxu0  ;;  %712 = vst [vmem:[%s1808_s3 + $0x130] sm:$0xff] %v1404_v3  ;;  %v1107_v11 = vpop.f32.mrf.mxu1  ;;  %v813_v26 = vmul.f32 %v444_v58, %v444_v58 }
  0xe3   :  { %v872_v6 = vadd.f32 %v871_v0, %v809_v62  ;;  %678 = vst [vmem:[%s1808_s3 + $0x20] sm:$0xff] %v436_v1  ;;  %v740_v7 = vadd.f32 %v739_v63, %v431_v47  ;;  %v447_v8 = vadd.f32 %v1075_v2, %v1352_v38  ;;  %v811_v13 = vmul.f32 %v436_v1, %v436_v1 }
  0xe4   :  { %v438_v9 = vpop.f32.mrf.mxu0  ;;  %710 = vst [vmem:[%s1808_s3 + $0x120] sm:$0xff] %v1415_v10  ;;  %v1426_v17 = vadd.f32 %v1107_v11, %v1352_v38  ;;  %v566_v18 = vpop.f32.mrf.mxu1 }
  0xe5   :  { %v741_v12 = vadd.f32 %v740_v7, %v436_v1  ;;  %v873_v14 = vadd.f32 %v872_v6, %v810_v5  ;;  %681 = vst [vmem:[%s1808_s3 + $0x38] sm:$0xff] %v447_v8  ;;  %v439_v15 = vadd.f32 %v1352_v38, %v438_v9  ;;  %v1437_v24 = vadd.f32 %v1352_v38, %v566_v18 }
  0xe6   :  { %v1078_v16 = vpop.f32.mrf.mxu0  ;;  %713 = vst [vmem:[%s1808_s3 + $0x138] sm:$0xff] %v1426_v17  ;;  %v1110_v25 = vpop.f32.mrf.mxu1  ;;  %v814_v33 = vmul.f32 %v447_v8, %v447_v8 }
  0xe7   :  { %v874_v19 = vadd.f32 %v873_v14, %v811_v13  ;;  %679 = vst [vmem:[%s1808_s3 + $0x28] sm:$0xff] %v439_v15  ;;  %v742_v20 = vadd.f32 %v741_v12, %v439_v15  ;;  %v812_v21 = vmul.f32 %v439_v15, %v439_v15  ;;  %v460_v22 = vadd.f32 %v1078_v16, %v1352_v38 }
  0xe8   :  { %v451_v23 = vpop.f32.mrf.mxu0  ;;  %711 = vst [vmem:[%s1808_s3 + $0x128] sm:$0xff] %v1437_v24  ;;  %v1448_v31 = vadd.f32 %v1110_v25, %v1352_v38  ;;  %v579_v32 = vpop.f32.mrf.mxu1 }
  0xe9   :  { %v743_v27 = vadd.f32 %v742_v20, %v444_v58  ;;  %v875_v28 = vadd.f32 %v874_v19, %v812_v21  ;;  %684 = vst [vmem:[%s1808_s3 + $0x50] sm:$0xff] %v460_v22  ;;  %v452_v29 = vadd.f32 %v1352_v38, %v451_v23  ;;  %v1459_v39 = vadd.f32 %v1352_v38, %v579_v32 }
  0xea   :  { %v1079_v30 = vpop.f32.mrf.mxu0  ;;  %716 = vst [vmem:[%s1808_s3 + $0x150] sm:$0xff] %v1448_v31  ;;  %v1111_v40 = vpop.f32.mrf.mxu1  ;;  %v817_v58 = vmul.f32 %v460_v22, %v460_v22 }
  0xeb   :  { %v876_v34 = vadd.f32 %v875_v28, %v813_v26  ;;  %682 = vst [vmem:[%s1808_s3 + $0x40] sm:$0xff] %v452_v29  ;;  %v744_v35 = vadd.f32 %v743_v27, %v447_v8  ;;  %v463_v36 = vadd.f32 %v1079_v30, %v1352_v38  ;;  %v815_v42 = vmul.f32 %v452_v29, %v452_v29 }
  0xec   :  { %v454_v37 = vpop.f32.mrf.mxu0  ;;  %714 = vst [vmem:[%s1808_s3 + $0x140] sm:$0xff] %v1459_v39  ;;  %v1470_v47 = vadd.f32 %v1111_v40, %v1352_v38  ;;  %v582_v49 = vpop.f32.mrf.mxu1 }
  0xed   :  { %v745_v41 = vadd.f32 %v744_v35, %v452_v29  ;;  %v877_v43 = vadd.f32 %v876_v34, %v814_v33  ;;  %685 = vst [vmem:[%s1808_s3 + $0x58] sm:$0xff] %v463_v36  ;;  %v455_v45 = vadd.f32 %v1352_v38, %v454_v37  ;;  %v1481_v56 = vadd.f32 %v1352_v38, %v582_v49 }
  0xee   :  { %v1082_v46 = vpop.f32.mrf.mxu0  ;;  %717 = vst [vmem:[%s1808_s3 + $0x158] sm:$0xff] %v1470_v47  ;;  %v1114_v57 = vpop.f32.mrf.mxu1  ;;  %v818_v2 = vmul.f32 %v463_v36, %v463_v36 }
  0xef   :  { %v878_v50 = vadd.f32 %v877_v43, %v815_v42  ;;  %683 = vst [vmem:[%s1808_s3 + $0x48] sm:$0xff] %v455_v45  ;;  %v746_v51 = vadd.f32 %v745_v41, %v455_v45  ;;  %v816_v53 = vmul.f32 %v455_v45, %v455_v45  ;;  %v476_v54 = vadd.f32 %v1082_v46, %v1352_v38 }
  0xf0   :  { %v467_v55 = vpop.f32.mrf.mxu0  ;;  %715 = vst [vmem:[%s1808_s3 + $0x148] sm:$0xff] %v1481_v56  ;;  %v1492_v0 = vadd.f32 %v1114_v57, %v1352_v38  ;;  %v595_v1 = vpop.f32.mrf.mxu1 }
  0xf1   :  { %v747_v59 = vadd.f32 %v746_v51, %v460_v22  ;;  %v879_v61 = vadd.f32 %v878_v50, %v816_v53  ;;  %688 = vst [vmem:[%s1808_s3 + $0x70] sm:$0xff] %v476_v54  ;;  %v468_v62 = vadd.f32 %v1352_v38, %v467_v55  ;;  %v1503_v8 = vadd.f32 %v1352_v38, %v595_v1 }
  0xf2   :  { %v1083_v63 = vpop.f32.mrf.mxu0  ;;  %720 = vst [vmem:[%s1808_s3 + $0x170] sm:$0xff] %v1492_v0  ;;  %v1115_v9 = vpop.f32.mrf.mxu1  ;;  %v821_v27 = vmul.f32 %v476_v54, %v476_v54 }
  0xf3   :  { %v880_v4 = vadd.f32 %v879_v61, %v817_v58  ;;  %686 = vst [vmem:[%s1808_s3 + $0x60] sm:$0xff] %v468_v62  ;;  %v748_v5 = vadd.f32 %v747_v59, %v463_v36  ;;  %v479_v6 = vadd.f32 %v1083_v63, %v1352_v38  ;;  %v819_v12 = vmul.f32 %v468_v62, %v468_v62 }
  0xf4   :  { %v470_v7 = vpop.f32.mrf.mxu0  ;;  %718 = vst [vmem:[%s1808_s3 + $0x160] sm:$0xff] %v1503_v8  ;;  %v1514_v16 = vadd.f32 %v1115_v9, %v1352_v38  ;;  %v598_v18 = vpop.f32.mrf.mxu1 }
  0xf5   :  { %v749_v11 = vadd.f32 %v748_v5, %v468_v62  ;;  %v881_v13 = vadd.f32 %v880_v4, %v818_v2  ;;  %689 = vst [vmem:[%s1808_s3 + $0x78] sm:$0xff] %v479_v6  ;;  %v471_v14 = vadd.f32 %v1352_v38, %v470_v7  ;;  %v1525_v25 = vadd.f32 %v1352_v38, %v598_v18 }
  0xf6   :  { %v1086_v15 = vpop.f32.mrf.mxu0  ;;  %721 = vst [vmem:[%s1808_s3 + $0x178] sm:$0xff] %v1514_v16  ;;  %v1118_v26 = vpop.f32.mrf.mxu1  ;;  %v822_v35 = vmul.f32 %v479_v6, %v479_v6 }
  0xf7   :  { %v882_v19 = vadd.f32 %v881_v13, %v819_v12  ;;  %687 = vst [vmem:[%s1808_s3 + $0x68] sm:$0xff] %v471_v14  ;;  %v750_v20 = vadd.f32 %v749_v11, %v471_v14  ;;  %v820_v21 = vmul.f32 %v471_v14, %v471_v14  ;;  %v492_v22 = vadd.f32 %v1086_v15, %v1352_v38 }
  0xf8   :  { %v483_v23 = vpop.f32.mrf.mxu0  ;;  %719 = vst [vmem:[%s1808_s3 + $0x168] sm:$0xff] %v1525_v25  ;;  %v1536_v33 = vadd.f32 %v1118_v26, %v1352_v38  ;;  %v611_v34 = vpop.f32.mrf.mxu1 }
  0xf9   :  { %v751_v28 = vadd.f32 %v750_v20, %v476_v54  ;;  %v883_v29 = vadd.f32 %v882_v19, %v820_v21  ;;  %692 = vst [vmem:[%s1808_s3 + $0x90] sm:$0xff] %v492_v22  ;;  %v484_v30 = vadd.f32 %v1352_v38, %v483_v23  ;;  %v1547_v42 = vadd.f32 %v1352_v38, %v611_v34 }
  0xfa   :  { %v1087_v32 = vpop.f32.mrf.mxu0  ;;  %724 = vst [vmem:[%s1808_s3 + $0x190] sm:$0xff] %v1536_v33  ;;  %v1119_v43 = vpop.f32.mrf.mxu1  ;;  %v825_v1 = vmul.f32 %v492_v22, %v492_v22 }
  0xfb   :  { %v884_v36 = vadd.f32 %v883_v29, %v821_v27  ;;  %690 = vst [vmem:[%s1808_s3 + $0x80] sm:$0xff] %v484_v30  ;;  %v752_v37 = vadd.f32 %v751_v28, %v479_v6  ;;  %v495_v40 = vadd.f32 %v1087_v32, %v1352_v38  ;;  %v823_v46 = vmul.f32 %v484_v30, %v484_v30 }
  0xfc   :  { %v486_v41 = vpop.f32.mrf.mxu0  ;;  %722 = vst [vmem:[%s1808_s3 + $0x180] sm:$0xff] %v1547_v42  ;;  %v1558_v53 = vadd.f32 %v1119_v43, %v1352_v38  ;;  %v614_v54 = vpop.f32.mrf.mxu1 }
  0xfd   :  { %v753_v45 = vadd.f32 %v752_v37, %v484_v30  ;;  %v885_v49 = vadd.f32 %v884_v36, %v822_v35  ;;  %693 = vst [vmem:[%s1808_s3 + $0x98] sm:$0xff] %v495_v40  ;;  %v487_v50 = vadd.f32 %v1352_v38, %v486_v41  ;;  %v1569_v62 = vadd.f32 %v1352_v38, %v614_v54 }
  0xfe   :  { %v1090_v51 = vpop.f32.mrf.mxu0  ;;  %725 = vst [vmem:[%s1808_s3 + $0x198] sm:$0xff] %v1558_v53  ;;  %v1122_v63 = vpop.f32.mrf.mxu1  ;;  %v826_v11 = vmul.f32 %v495_v40, %v495_v40 }
  0xff   :  { %v886_v55 = vadd.f32 %v885_v49, %v823_v46  ;;  %691 = vst [vmem:[%s1808_s3 + $0x88] sm:$0xff] %v487_v50  ;;  %v754_v57 = vadd.f32 %v753_v45, %v487_v50  ;;  %v824_v58 = vmul.f32 %v487_v50, %v487_v50  ;;  %v508_v59 = vadd.f32 %v1090_v51, %v1352_v38 }
 0x100   :  { %v499_v61 = vpop.f32.mrf.mxu0  ;;  %723 = vst [vmem:[%s1808_s3 + $0x188] sm:$0xff] %v1569_v62  ;;  %v1580_v7 = vadd.f32 %v1122_v63, %v1352_v38  ;;  %v627_v9 = vpop.f32.mrf.mxu1 }
 0x101   :  { %v755_v2 = vadd.f32 %v754_v57, %v492_v22  ;;  %v887_v4 = vadd.f32 %v886_v55, %v824_v58  ;;  %696 = vst [vmem:[%s1808_s3 + $0xb0] sm:$0xff] %v508_v59  ;;  %v500_v5 = vadd.f32 %v1352_v38, %v499_v61  ;;  %v1591_v18 = vadd.f32 %v1352_v38, %v627_v9 }
 0x102   :  { %v1091_v6 = vpop.f32.mrf.mxu0  ;;  %728 = vst [vmem:[%s1808_s3 + $0x1b0] sm:$0xff] %v1580_v7  ;;  %v1123_v19 = vpop.f32.mrf.mxu1 }
 0x103   :  { %v888_v12 = vadd.f32 %v887_v4, %v825_v1  ;;  %694 = vst [vmem:[%s1808_s3 + $0xa0] sm:$0xff] %v500_v5  ;;  %v756_v13 = vadd.f32 %v755_v2, %v495_v40  ;;  %v511_v14 = vadd.f32 %v1091_v6, %v1352_v38  ;;  %v827_v21 = vmul.f32 %v500_v5, %v500_v5 }
 0x104   :  { %v502_v15 = vpop.f32.mrf.mxu0  ;;  %726 = vst [vmem:[%s1808_s3 + $0x1a0] sm:$0xff] %v1591_v18  ;;  %v1602_v27 = vadd.f32 %v1123_v19, %v1352_v38  ;;  %v630_v28 = vpop.f32.mrf.mxu1  ;;  %v829_v40 = vmul.f32 %v508_v59, %v508_v59 }
 0x105   :  { %v757_v20 = vadd.f32 %v756_v13, %v500_v5  ;;  %v889_v22 = vadd.f32 %v888_v12, %v826_v11  ;;  %697 = vst [vmem:[%s1808_s3 + $0xb8] sm:$0xff] %v511_v14  ;;  %v503_v23 = vadd.f32 %v1352_v38, %v502_v15  ;;  %v1613_v36 = vadd.f32 %v1352_v38, %v630_v28 }
 0x106   :  { %v1094_v26 = vpop.f32.mrf.mxu0  ;;  %729 = vst [vmem:[%s1808_s3 + $0x1b8] sm:$0xff] %v1602_v27  ;;  %v1126_v37 = vpop.f32.mrf.mxu1  ;;  %v830_v51 = vmul.f32 %v511_v14, %v511_v14 }
 0x107   :  { %v890_v29 = vadd.f32 %v889_v22, %v827_v21  ;;  %695 = vst [vmem:[%s1808_s3 + $0xa8] sm:$0xff] %v503_v23  ;;  %v758_v30 = vadd.f32 %v757_v20, %v503_v23  ;;  %v828_v32 = vmul.f32 %v503_v23, %v503_v23  ;;  %v524_v34 = vadd.f32 %v1094_v26, %v1352_v38 }
 0x108   :  { %v515_v35 = vpop.f32.mrf.mxu0  ;;  %727 = vst [vmem:[%s1808_s3 + $0x1a8] sm:$0xff] %v1613_v36  ;;  %v1624_v49 = vadd.f32 %v1126_v37, %v1352_v38  ;;  %v643_v50 = vpop.f32.mrf.mxu1 }
 0x109   :  { %v759_v41 = vadd.f32 %v758_v30, %v508_v59  ;;  %v891_v43 = vadd.f32 %v890_v29, %v828_v32  ;;  %700 = vst [vmem:[%s1808_s3 + $0xd0] sm:$0xff] %v524_v34  ;;  %v516_v45 = vadd.f32 %v1352_v38, %v515_v35  ;;  %v1635_v59 = vadd.f32 %v1352_v38, %v643_v50 }
 0x10a   :  { %v1095_v46 = vpop.f32.mrf.mxu0  ;;  %732 = vst [vmem:[%s1808_s3 + $0x1d0] sm:$0xff] %v1624_v49  ;;  %v1127_v61 = vpop.f32.mrf.mxu1  ;;  %v833_v21 = vmul.f32 %v524_v34, %v524_v34 }
 0x10b   :  { %v892_v54 = vadd.f32 %v891_v43, %v829_v40  ;;  %698 = vst [vmem:[%s1808_s3 + $0xc0] sm:$0xff] %v516_v45  ;;  %v760_v55 = vadd.f32 %v759_v41, %v511_v14  ;;  %v527_v57 = vadd.f32 %v1095_v46, %v1352_v38  ;;  %v831_v1 = vmul.f32 %v516_v45, %v516_v45 }
 0x10c   :  { %v518_v58 = vpop.f32.mrf.mxu0  ;;  %730 = vst [vmem:[%s1808_s3 + $0x1c0] sm:$0xff] %v1635_v59  ;;  %v1646_v6 = vadd.f32 %v1127_v61, %v1352_v38  ;;  %v646_v9 = vpop.f32.mrf.mxu1 }
 0x10d   :  { %v761_v63 = vadd.f32 %v760_v55, %v516_v45  ;;  %v893_v2 = vadd.f32 %v892_v54, %v830_v51  ;;  %701 = vst [vmem:[%s1808_s3 + $0xd8] sm:$0xff] %v527_v57  ;;  %v519_v4 = vadd.f32 %v1352_v38, %v518_v58  ;;  %v1657_v19 = vadd.f32 %v1352_v38, %v646_v9 }
 0x10e   :  { %v1098_v5 = vpop.f32.mrf.mxu0  ;;  %733 = vst [vmem:[%s1808_s3 + $0x1d8] sm:$0xff] %v1646_v6  ;;  %v1130_v20 = vpop.f32.mrf.mxu1  ;;  %v834_v32 = vmul.f32 %v527_v57, %v527_v57 }
 0x10f   :  { %v894_v11 = vadd.f32 %v893_v2, %v831_v1  ;;  %699 = vst [vmem:[%s1808_s3 + $0xc8] sm:$0xff] %v519_v4  ;;  %v762_v12 = vadd.f32 %v761_v63, %v519_v4  ;;  %v832_v13 = vmul.f32 %v519_v4, %v519_v4  ;;  %v540_v14 = vadd.f32 %v1098_v5, %v1352_v38 }
 0x110   :  { %v531_v15 = vpop.f32.mrf.mxu0  ;;  %731 = vst [vmem:[%s1808_s3 + $0x1c8] sm:$0xff] %v1657_v19  ;;  %v1668_v29 = vadd.f32 %v1130_v20, %v1352_v38  ;;  %v659_v30 = vpop.f32.mrf.mxu1 }
 0x111   :  { %v763_v22 = vadd.f32 %v762_v12, %v524_v34  ;;  %v895_v23 = vadd.f32 %v894_v11, %v832_v13  ;;  %704 = vst [vmem:[%s1808_s3 + $0xf0] sm:$0xff] %v540_v14  ;;  %v532_v26 = vadd.f32 %v1352_v38, %v531_v15  ;;  %v1679_v41 = vadd.f32 %v1352_v38, %v659_v30 }
 0x112   :  { %v1099_v28 = vpop.f32.mrf.mxu0  ;;  %736 = vst [vmem:[%s1808_s3 + $0x1f0] sm:$0xff] %v1668_v29  ;;  %v1131_v43 = vpop.f32.mrf.mxu1  ;;  %v837_v1 = vmul.f32 %v540_v14, %v540_v14 }
 0x113   :  { %v896_v35 = vadd.f32 %v895_v23, %v833_v21  ;;  %702 = vst [vmem:[%s1808_s3 + $0xe0] sm:$0xff] %v532_v26  ;;  %v764_v34 = vadd.f32 %v763_v22, %v527_v57  ;;  %v543_v37 = vadd.f32 %v1099_v28, %v1352_v38  ;;  %v835_v46 = vmul.f32 %v532_v26, %v532_v26 }
 0x114   :  { %v534_v40 = vpop.f32.mrf.mxu0  ;;  %734 = vst [vmem:[%s1808_s3 + $0x1e0] sm:$0xff] %v1679_v41  ;;  %v1690_v54 = vadd.f32 %v1131_v43, %v1352_v38  ;;  %v662_v55 = vpop.f32.mrf.mxu1  ;;  %v841_v21 = vmul.f32 %v1360_v44, %v1360_v44 }
 0x115   :  { %v765_v45 = vadd.f32 %v764_v34, %v532_v26  ;;  %v897_v50 = vadd.f32 %v896_v35, %v834_v32  ;;  %705 = vst [vmem:[%s1808_s3 + $0xf8] sm:$0xff] %v543_v37  ;;  %v535_v51 = vadd.f32 %v1352_v38, %v534_v40  ;;  %v1696_v63 = vadd.f32 %v1352_v38, %v662_v55 }
 0x116   :  { %737 = vst [vmem:[%s1808_s3 + $0x1f8] sm:$0xff] %v1690_v54  ;;  %v838_v5 = vmul.f32 %v543_v37, %v543_v37  ;;  %v839_v38 = vmul.f32 %v1371_v48, %v1371_v48  ;;  %v842_v26 = vmul.f32 %v1382_v52, %v1382_v52  ;;  %v843_v32 = vmul.f32 %v1415_v10, %v1415_v10 }
 0x117   :  { %v898_v57 = vadd.f32 %v897_v50, %v835_v46  ;;  %703 = vst [vmem:[%s1808_s3 + $0xe8] sm:$0xff] %v535_v51  ;;  %v766_v58 = vadd.f32 %v765_v45, %v535_v51  ;;  %v836_v61 = vmul.f32 %v535_v51, %v535_v51  ;;  %735 = vst [vmem:[%s1808_s3 + $0x1e8] sm:$0xff] %v1696_v63 }
 0x118   :  { %v847_v50 = vmul.f32 %v1459_v39, %v1459_v39 }
 0x119   :  { %v767_v2 = vadd.f32 %v766_v58, %v540_v14  ;;  %v899_v4 = vadd.f32 %v898_v57, %v836_v61  ;;  %v840_v14 = vmul.f32 %v1393_v60, %v1393_v60  ;;  %v848_v57 = vmul.f32 %v1481_v56, %v1481_v56 }
 0x11b   :  { %v900_v9 = vadd.f32 %v899_v4, %v837_v1  ;;  %v768_v11 = vadd.f32 %v767_v2, %v543_v37  ;;  %v844_v37 = vmul.f32 %v1437_v24, %v1437_v24  ;;  %v851_v4 = vmul.f32 %v1503_v8, %v1503_v8 }
 0x11d   :  { %v769_v12 = vadd.f32 %v768_v11, %v1371_v48  ;;  %v901_v13 = vadd.f32 %v900_v9, %v838_v5  ;;  %v852_v11 = vmul.f32 %v1525_v25, %v1525_v25 }
 0x11f   :  { %v770_v15 = vadd.f32 %v769_v12, %v1393_v60  ;;  %v902_v20 = vadd.f32 %v901_v13, %v839_v38 }
 0x121   :  { %v771_v22 = vadd.f32 %v770_v15, %v1360_v44  ;;  %v903_v23 = vadd.f32 %v902_v20, %v840_v14  ;;  %v845_v44 = vmul.f32 %v1404_v3, %v1404_v3  ;;  %v855_v14 = vmul.f32 %v1547_v42, %v1547_v42 }
 0x123   :  { %v904_v28 = vadd.f32 %v903_v23, %v841_v21  ;;  %v772_v30 = vadd.f32 %v771_v22, %v1382_v52  ;;  %v846_v52 = vmul.f32 %v1426_v17, %v1426_v17  ;;  %v856_v22 = vmul.f32 %v1569_v62, %v1569_v62 }
 0x125   :  { %v773_v48 = vadd.f32 %v772_v30, %v1415_v10  ;;  %v905_v35 = vadd.f32 %v904_v28, %v842_v26 }
 0x127   :  { %v906_v60 = vadd.f32 %v905_v35, %v843_v32  ;;  %v774_v34 = vadd.f32 %v773_v48, %v1437_v24  ;;  %v859_v48 = vmul.f32 %v1591_v18, %v1591_v18 }
 0x129   :  { %v775_v40 = vadd.f32 %v774_v34, %v1404_v3  ;;  %v907_v43 = vadd.f32 %v906_v60, %v844_v37  ;;  %v849_v3 = vmul.f32 %v1448_v31, %v1448_v31  ;;  %v860_v60 = vmul.f32 %v1613_v36, %v1613_v36 }
 0x12b   :  { %v908_v45 = vadd.f32 %v907_v43, %v845_v44  ;;  %v776_v46 = vadd.f32 %v775_v40, %v1426_v17  ;;  %v850_v17 = vmul.f32 %v1470_v47, %v1470_v47  ;;  %v863_v43 = vmul.f32 %v1635_v59, %v1635_v59 }
 0x12d   :  { %v777_v10 = vadd.f32 %v776_v46, %v1459_v39  ;;  %v909_v51 = vadd.f32 %v908_v45, %v846_v52  ;;  %v864_v46 = vmul.f32 %v1657_v19, %v1657_v19 }
 0x12f   :  { %v910_v55 = vadd.f32 %v909_v51, %v847_v50  ;;  %v778_v24 = vadd.f32 %v777_v10, %v1481_v56 }
 0x131   :  { %v779_v58 = vadd.f32 %v778_v24, %v1448_v31  ;;  %v911_v61 = vadd.f32 %v910_v55, %v848_v57  ;;  %v853_v31 = vmul.f32 %v1492_v0, %v1492_v0  ;;  %v867_v24 = vmul.f32 %v1679_v41, %v1679_v41 }
 0x133   :  { %v912_v1 = vadd.f32 %v911_v61, %v849_v3  ;;  %v780_v2 = vadd.f32 %v779_v58, %v1470_v47  ;;  %v854_v47 = vmul.f32 %v1514_v16, %v1514_v16  ;;  %v868_v58 = vmul.f32 %v1696_v63, %v1696_v63 }
 0x135   :  { %v781_v39 = vadd.f32 %v780_v2, %v1503_v8  ;;  %v913_v5 = vadd.f32 %v912_v1, %v850_v17 }
 0x137   :  { %v914_v9 = vadd.f32 %v913_v5, %v851_v4  ;;  %v782_v56 = vadd.f32 %v781_v39, %v1525_v25 }
 0x139   :  { %v783_v38 = vadd.f32 %v782_v56, %v1492_v0  ;;  %v915_v12 = vadd.f32 %v914_v9, %v852_v11  ;;  %v857_v0 = vmul.f32 %v1536_v33, %v1536_v33 }
 0x13b   :  { %v916_v13 = vadd.f32 %v915_v12, %v853_v31  ;;  %v784_v15 = vadd.f32 %v783_v38, %v1514_v16  ;;  %v858_v16 = vmul.f32 %v1558_v53, %v1558_v53 }
 0x13d   :  { %v785_v8 = vadd.f32 %v784_v15, %v1547_v42  ;;  %v917_v20 = vadd.f32 %v916_v13, %v854_v47 }
 0x13f   :  { %v918_v21 = vadd.f32 %v917_v20, %v855_v14  ;;  %v786_v25 = vadd.f32 %v785_v8, %v1569_v62 }
 0x141   :  { %v787_v23 = vadd.f32 %v786_v25, %v1536_v33  ;;  %v919_v26 = vadd.f32 %v918_v21, %v856_v22  ;;  %v861_v33 = vmul.f32 %v1580_v7, %v1580_v7 }
 0x143   :  { %v920_v28 = vadd.f32 %v919_v26, %v857_v0  ;;  %v788_v30 = vadd.f32 %v787_v23, %v1558_v53  ;;  %v862_v53 = vmul.f32 %v1602_v27, %v1602_v27 }
 0x145   :  { %v789_v42 = vadd.f32 %v788_v30, %v1591_v18  ;;  %v921_v32 = vadd.f32 %v920_v28, %v858_v16 }
 0x147   :  { %v922_v35 = vadd.f32 %v921_v32, %v859_v48  ;;  %v790_v62 = vadd.f32 %v789_v42, %v1613_v36 }
 0x149   :  { %v791_v34 = vadd.f32 %v790_v62, %v1580_v7  ;;  %v923_v37 = vadd.f32 %v922_v35, %v860_v60  ;;  %v865_v7 = vmul.f32 %v1624_v49, %v1624_v49 }
 0x14b   :  { %v924_v44 = vadd.f32 %v923_v37, %v861_v33  ;;  %v792_v40 = vadd.f32 %v791_v34, %v1602_v27  ;;  %v866_v27 = vmul.f32 %v1646_v6, %v1646_v6 }
 0x14d   :  { %v793_v18 = vadd.f32 %v792_v40, %v1635_v59  ;;  %v925_v52 = vadd.f32 %v924_v44, %v862_v53 }
 0x14f   :  { %v926_v45 = vadd.f32 %v925_v52, %v863_v43  ;;  %v794_v36 = vadd.f32 %v793_v18, %v1657_v19 }
 0x151   :  { %v795_v10 = vadd.f32 %v794_v36, %v1624_v49  ;;  %v927_v50 = vadd.f32 %v926_v45, %v864_v46  ;;  %v869_v49 = vmul.f32 %v1668_v29, %v1668_v29 }
 0x153   :  { %v928_v51 = vadd.f32 %v927_v50, %v865_v7  ;;  %v796_v55 = vadd.f32 %v795_v10, %v1646_v6  ;;  %v870_v6 = vmul.f32 %v1690_v54, %v1690_v54 }
 0x155   :  { %v797_v59 = vadd.f32 %v796_v55, %v1679_v41  ;;  %v929_v57 = vadd.f32 %v928_v51, %v866_v27 }
 0x157   :  { %v930_v3 = vadd.f32 %v929_v57, %v867_v24  ;;  %v798_v19 = vadd.f32 %v797_v59, %v1696_v63 }
 0x159   :  { %v799_v61 = vadd.f32 %v798_v19, %v1668_v29  ;;  %v931_v17 = vadd.f32 %v930_v3, %v868_v58 }
 0x15b   :  { %v800_v1 = vadd.f32 %v799_v61, %v1690_v54  ;;  %v932_v2 = vadd.f32 %v931_v17, %v869_v49 }
 0x15d   :  { %v801_v41 = vrot.slane %v800_v1, 4  ;;  %v933_v39 = vadd.f32 %v932_v2, %v870_v6 }
 0x15f   :  { %v802_v4 = vadd.f32 %v801_v41, %v800_v1  ;;  %v934_v5 = vrot.slane %v933_v39, 4 }
 0x161   :  { %v803_v9 = vrot.slane %v802_v4, 2  ;;  %v935_v56 = vadd.f32 %v934_v5, %v933_v39 }
 0x163   :  { %v804_v11 = vadd.f32 %v803_v9, %v802_v4  ;;  %v936_v63 = vrot.slane %v935_v56, 2 }
 0x165   :  { %v805_v31 = vrot.slane %v804_v11, 1  ;;  %v937_v38 = vadd.f32 %v936_v63, %v935_v56 }
 0x167   :  { %v938_v12 = vrot.slane %v937_v38, 1  ;;  %v806_v29 = vadd.f32 %v805_v31, %v804_v11 }
 0x169   :  { %v939_v47 = vadd.f32 %v938_v12, %v937_v38 }
 0x16b   :  { %v941_v13 = vsel %vm940_vm2, %v806_v29, %v939_v47 }
 0x16c   :  { %942 = vst [vmem:[%s1809_s4] sm:$0x3] %v941_v13 }

// kernel: decoder_forward.18
= control target key start
LH: loop header
LB: loop body
LE: loop exit
PB: predicated region body
PF: predicated region fallthrough
CT: control target
= control target key end

     0   :  { %s1030_s0 = inlined_call_operand.vmem [shape: f32[512,128], index: 0, kind: input, shape index: {}]   ;;  %s1031_s1 = inlined_call_operand.vmem [shape: f32[1,128], index: 1, kind: input, shape index: {}]   ;;  %s1032_s2 = inlined_call_operand.vmem [shape: f32[1,128], index: 2, kind: input, shape index: {}]   ;;  %s1033_s3 = inlined_call_operand.vmem [shape: f32[512,128], index: 3, kind: output, shape index: {}]  }
   0x1   :  { %v14_v0 = vld [vmem:[%s1030_s0] sm:$0xff]  ;;  %v15_v4 = vld [vmem:[%s1030_s0 + $0x8] sm:$0xff]  ;;  %v16_v5 = vld [vmem:[%s1030_s0 + $0x10] sm:$0xff] }
   0x2   :  { %v508_v1 = vld [vmem:[%s1031_s1] ss:$0 sm:$0xff]  ;;  %v17_v6 = vld [vmem:[%s1030_s0 + $0x18] sm:$0xff]  ;;  %v19_v11 = vld [vmem:[%s1030_s0 + $0x28] sm:$0xff] }
   0x3   :  { %v513_v2 = vld [vmem:[%s1032_s2] ss:$0 sm:$0xff]  ;;  %v85_v3 = vmul.f32 %v508_v1, %v14_v0  ;;  %v86_v7 = vmul.f32 %v508_v1, %v15_v4  ;;  %v87_v8 = vmul.f32 %v508_v1, %v16_v5  ;;  %v88_v9 = vmul.f32 %v508_v1, %v17_v6  ;;  %v20_v12 = vld [vmem:[%s1030_s0 + $0x30] sm:$0xff]  ;;  %v21_v17 = vld [vmem:[%s1030_s0 + $0x38] sm:$0xff] }
   0x4   :  { %v18_v10 = vld [vmem:[%s1030_s0 + $0x20] sm:$0xff]  ;;  %v90_v15 = vmul.f32 %v508_v1, %v19_v11  ;;  %v91_v16 = vmul.f32 %v508_v1, %v20_v12  ;;  %v92_v21 = vmul.f32 %v508_v1, %v21_v17  ;;  %v23_v30 = vld [vmem:[%s1030_s0 + $0x48] sm:$0xff]  ;;  %v24_v31 = vld [vmem:[%s1030_s0 + $0x50] sm:$0xff] }
   0x5   :  { %v156_v13 = vadd.f32 %v513_v2, %v85_v3  ;;  %v89_v14 = vmul.f32 %v508_v1, %v18_v10  ;;  %v157_v18 = vadd.f32 %v513_v2, %v86_v7  ;;  %v158_v19 = vadd.f32 %v513_v2, %v87_v8  ;;  %v22_v25 = vld [vmem:[%s1030_s0 + $0x40] sm:$0xff]  ;;  %v25_v43 = vld [vmem:[%s1030_s0 + $0x58] sm:$0xff]  ;;  %v27_v45 = vld [vmem:[%s1030_s0 + $0x68] sm:$0xff] }
   0x6   :  { %v159_v20 = vadd.f32 %v513_v2, %v88_v9  ;;  %v161_v24 = vadd.f32 %v513_v2, %v90_v15  ;;  %v162_v37 = vadd.f32 %v513_v2, %v91_v16  ;;  %v163_v38 = vadd.f32 %v513_v2, %v92_v21  ;;  %v26_v44 = vld [vmem:[%s1030_s0 + $0x60] sm:$0xff]  ;;  %v28_v56 = vld [vmem:[%s1030_s0 + $0x70] sm:$0xff]  ;;  %v29_v4 = vld [vmem:[%s1030_s0 + $0x78] sm:$0xff] }
   0x7   :  { %vm220_vm0 = vcmp.ge.f32.partialorder %v156_v13, 0.0  ;;  %v284_v22 = vmul.f32 0.01, %v156_v13  ;;  %v160_v23 = vadd.f32 %v513_v2, %v89_v14  ;;  %vm221_vm1 = vcmp.ge.f32.partialorder %v157_v18, 0.0  ;;  %v30_v5 = vld [vmem:[%s1030_s0 + $0x80] sm:$0xff]  ;;  %v31_v9 = vld [vmem:[%s1030_s0 + $0x88] sm:$0xff] }
   0x8   :  { %v285_v26 = vmul.f32 0.01, %v157_v18  ;;  %vm222_vm2 = vcmp.ge.f32.partialorder %v158_v19, 0.0  ;;  %v286_v27 = vmul.f32 0.01, %v158_v19  ;;  %vm223_vm3 = vcmp.ge.f32.partialorder %v159_v20, 0.0 }
   0x9   :  { %v348_v28 = vsel %vm220_vm0, %v156_v13, %v284_v22  ;;  %v287_v29 = vmul.f32 0.01, %v159_v20  ;;  %vm224_vm4 = vcmp.ge.f32.partialorder %v160_v23, 0.0  ;;  %v288_v34 = vmul.f32 0.01, %v160_v23  ;;  %v32_v10 = vld [vmem:[%s1030_s0 + $0x90] sm:$0xff] }
   0xa   :  { %412 = vst [vmem:[%s1033_s3] sm:$0xff] %v348_v28  ;;  %v349_v32 = vsel %vm221_vm1, %v157_v18, %v285_v26  ;;  %v350_v33 = vsel %vm222_vm2, %v158_v19, %v286_v27  ;;  %vm225_vm5 = vcmp.ge.f32.partialorder %v161_v24, 0.0  ;;  %v289_v36 = vmul.f32 0.01, %v161_v24  ;;  %v33_v17 = vld [vmem:[%s1030_s0 + $0x98] sm:$0xff]  ;;  %v34_v18 = vld [vmem:[%s1030_s0 + $0xa0] sm:$0xff] }
   0xb   :  { %413 = vst [vmem:[%s1033_s3 + $0x8] sm:$0xff] %v349_v32  ;;  %414 = vst [vmem:[%s1033_s3 + $0x10] sm:$0xff] %v350_v33  ;;  %v351_v35 = vsel %vm223_vm3, %v159_v20, %v287_v29  ;;  %v352_v39 = vsel %vm224_vm4, %v160_v23, %v288_v34  ;;  %v93_v40 = vmul.f32 %v508_v1, %v22_v25  ;;  %vm226_vm6 = vcmp.ge.f32.partialorder %v162_v37, 0.0  ;;  %v35_v32 = vld [vmem:[%s1030_s0 + $0xa8] sm:$0xff]  ;;  %v36_v33 = vld [vmem:[%s1030_s0 + $0xb0] sm:$0xff] }
   0xc   :  { %415 = vst [vmem:[%s1033_s3 + $0x18] sm:$0xff] %v351_v35  ;;  %v94_v41 = vmul.f32 %v508_v1, %v23_v30  ;;  %v95_v42 = vmul.f32 %v508_v1, %v24_v31  ;;  %416 = vst [vmem:[%s1033_s3 + $0x20] sm:$0xff] %v352_v39  ;;  %v353_v46 = vsel %vm225_vm5, %v161_v24, %v289_v36  ;;  %v290_v47 = vmul.f32 0.01, %v162_v37 }
   0xd   :  { %vm227_vm7 = vcmp.ge.f32.partialorder %v163_v38, 0.0  ;;  %417 = vst [vmem:[%s1033_s3 + $0x28] sm:$0xff] %v353_v46  ;;  %v291_v48 = vmul.f32 0.01, %v163_v38  ;;  %v164_v49 = vadd.f32 %v513_v2, %v93_v40  ;;  %v96_v53 = vmul.f32 %v508_v1, %v25_v43  ;;  %v37_v40 = vld [vmem:[%s1030_s0 + $0xb8] sm:$0xff]  ;;  %v39_v46 = vld [vmem:[%s1030_s0 + $0xc8] sm:$0xff] }
   0xe   :  { %v165_v50 = vadd.f32 %v513_v2, %v94_v41  ;;  %v166_v51 = vadd.f32 %v513_v2, %v95_v42  ;;  %v354_v52 = vsel %vm226_vm6, %v162_v37, %v290_v47  ;;  %v97_v54 = vmul.f32 %v508_v1, %v26_v44  ;;  %v40_v47 = vld [vmem:[%s1030_s0 + $0xd0] sm:$0xff] }
   0xf   :  { %v98_v55 = vmul.f32 %v508_v1, %v27_v45  ;;  %418 = vst [vmem:[%s1033_s3 + $0x30] sm:$0xff] %v354_v52  ;;  %v355_v57 = vsel %vm227_vm7, %v163_v38, %v291_v48  ;;  %vm228_vm8 = vcmp.ge.f32.partialorder %v164_v49, 0.0  ;;  %v292_v58 = vmul.f32 0.01, %v164_v49  ;;  %v38_v45 = vld [vmem:[%s1030_s0 + $0xc0] sm:$0xff] }
  0x10   :  { %vm229_vm9 = vcmp.ge.f32.partialorder %v165_v50, 0.0  ;;  %419 = vst [vmem:[%s1033_s3 + $0x38] sm:$0xff] %v355_v57  ;;  %v293_v59 = vmul.f32 0.01, %v165_v50  ;;  %vm230_vm10 = vcmp.ge.f32.partialorder %v166_v51, 0.0  ;;  %v167_v61 = vadd.f32 %v513_v2, %v96_v53 }
  0x11   :  { %v294_v60 = vmul.f32 0.01, %v166_v51  ;;  %v356_v62 = vsel %vm228_vm8, %v164_v49, %v292_v58  ;;  %v168_v63 = vadd.f32 %v513_v2, %v97_v54  ;;  %v169_v0 = vadd.f32 %v513_v2, %v98_v55  ;;  %v41_v58 = vld [vmem:[%s1030_s0 + $0xd8] sm:$0xff] }
  0x12   :  { %v99_v3 = vmul.f32 %v508_v1, %v28_v56  ;;  %420 = vst [vmem:[%s1033_s3 + $0x40] sm:$0xff] %v356_v62  ;;  %v357_v6 = vsel %vm229_vm9, %v165_v50, %v293_v59  ;;  %vm231_vm11 = vcmp.ge.f32.partialorder %v167_v61, 0.0  ;;  %v295_v8 = vmul.f32 0.01, %v167_v61  ;;  %v42_v59 = vld [vmem:[%s1030_s0 + $0xe0] sm:$0xff] }
  0x13   :  { %v358_v7 = vsel %vm230_vm10, %v166_v51, %v294_v60  ;;  %421 = vst [vmem:[%s1033_s3 + $0x48] sm:$0xff] %v357_v6  ;;  %vm232_vm12 = vcmp.ge.f32.partialorder %v168_v63, 0.0  ;;  %v296_v11 = vmul.f32 0.01, %v168_v63  ;;  %vm233_vm13 = vcmp.ge.f32.partialorder %v169_v0, 0.0 }
  0x14   :  { %422 = vst [vmem:[%s1033_s3 + $0x50] sm:$0xff] %v358_v7  ;;  %v297_v12 = vmul.f32 0.01, %v169_v0  ;;  %v359_v13 = vsel %vm231_vm11, %v167_v61, %v295_v8  ;;  %v170_v14 = vadd.f32 %v513_v2, %v99_v3  ;;  %v100_v15 = vmul.f32 %v508_v1, %v29_v4 }
  0x15   :  { %v101_v16 = vmul.f32 %v508_v1, %v30_v5  ;;  %423 = vst [vmem:[%s1033_s3 + $0x58] sm:$0xff] %v359_v13  ;;  %v360_v19 = vsel %vm232_vm12, %v168_v63, %v296_v11  ;;  %v102_v21 = vmul.f32 %v508_v1, %v31_v9  ;;  %v103_v22 = vmul.f32 %v508_v1, %v32_v10  ;;  %v43_v10 = vld [vmem:[%s1030_s0 + $0xe8] sm:$0xff]  ;;  %v44_v11 = vld [vmem:[%s1030_s0 + $0xf0] sm:$0xff] }
  0x16   :  { %v361_v20 = vsel %vm233_vm13, %v169_v0, %v297_v12  ;;  %424 = vst [vmem:[%s1033_s3 + $0x60] sm:$0xff] %v360_v19  ;;  %vm234_vm14 = vcmp.ge.f32.partialorder %v170_v14, 0.0  ;;  %v298_v23 = vmul.f32 0.01, %v170_v14  ;;  %v171_v24 = vadd.f32 %v513_v2, %v100_v15 }
  0x17   :  { %425 = vst [vmem:[%s1033_s3 + $0x68] sm:$0xff] %v361_v20  ;;  %v172_v25 = vadd.f32 %v513_v2, %v101_v16  ;;  %v173_v26 = vadd.f32 %v513_v2, %v102_v21  ;;  %v174_v27 = vadd.f32 %v513_v2, %v103_v22  ;;  %v104_v28 = vmul.f32 %v508_v1, %v33_v17 }
  0x18   :  { %v105_v29 = vmul.f32 %v508_v1, %v34_v18  ;;  %v362_v30 = vsel %vm234_vm14, %v170_v14, %v298_v23  ;;  %vm235_vm15 = vcmp.ge.f32.partialorder %v171_v24, 0.0  ;;  %v299_v31 = vmul.f32 0.01, %v171_v24  ;;  %v45_v18 = vld [vmem:[%s1030_s0 + $0xf8] sm:$0xff]  ;;  %v46_v23 = vld [vmem:[%s1030_s0 + $0x100] sm:$0xff] }
  0x19   :  { %vm236_vm0 = vcmp.ge.f32.partialorder %v172_v25, 0.0  ;;  %426 = vst [vmem:[%s1033_s3 + $0x70] sm:$0xff] %v362_v30  ;;  %v300_v34 = vmul.f32 0.01, %v172_v25  ;;  %vm237_vm1 = vcmp.ge.f32.partialorder %v173_v26, 0.0  ;;  %vm238_vm2 = vcmp.ge.f32.partialorder %v174_v27, 0.0 }
  0x1a   :  { %v301_v35 = vmul.f32 0.01, %v173_v26  ;;  %v363_v36 = vsel %vm235_vm15, %v171_v24, %v299_v31  ;;  %v302_v37 = vmul.f32 0.01, %v174_v27  ;;  %v175_v38 = vadd.f32 %v513_v2, %v104_v28  ;;  %v47_v24 = vld [vmem:[%s1030_s0 + $0x108] sm:$0xff] }
  0x1b   :  { %v176_v39 = vadd.f32 %v513_v2, %v105_v29  ;;  %427 = vst [vmem:[%s1033_s3 + $0x78] sm:$0xff] %v363_v36  ;;  %v364_v41 = vsel %vm236_vm0, %v172_v25, %v300_v34  ;;  %v106_v43 = vmul.f32 %v508_v1, %v35_v32  ;;  %v107_v44 = vmul.f32 %v508_v1, %v36_v33  ;;  %v48_v25 = vld [vmem:[%s1030_s0 + $0x110] sm:$0xff]  ;;  %v49_v36 = vld [vmem:[%s1030_s0 + $0x118] sm:$0xff] }
  0x1c   :  { %v365_v42 = vsel %vm237_vm1, %v173_v26, %v301_v35  ;;  %428 = vst [vmem:[%s1033_s3 + $0x80] sm:$0xff] %v364_v41  ;;  %v366_v48 = vsel %vm238_vm2, %v174_v27, %v302_v37  ;;  %vm239_vm3 = vcmp.ge.f32.partialorder %v175_v38, 0.0  ;;  %v303_v49 = vmul.f32 0.01, %v175_v38  ;;  %v50_v37 = vld [vmem:[%s1030_s0 + $0x120] sm:$0xff] }
  0x1d   :  { %429 = vst [vmem:[%s1033_s3 + $0x88] sm:$0xff] %v365_v42  ;;  %vm240_vm4 = vcmp.ge.f32.partialorder %v176_v39, 0.0  ;;  %430 = vst [vmem:[%s1033_s3 + $0x90] sm:$0xff] %v366_v48  ;;  %v304_v50 = vmul.f32 0.01, %v176_v39  ;;  %v177_v51 = vadd.f32 %v513_v2, %v106_v43  ;;  %v178_v52 = vadd.f32 %v513_v2, %v107_v44 }
  0x1e   :  { %v108_v53 = vmul.f32 %v508_v1, %v37_v40  ;;  %v367_v54 = vsel %vm239_vm3, %v175_v38, %v303_v49  ;;  %v109_v55 = vmul.f32 %v508_v1, %v38_v45  ;;  %v110_v56 = vmul.f32 %v508_v1, %v39_v46 }
  0x1f   :  { %v111_v57 = vmul.f32 %v508_v1, %v40_v47  ;;  %431 = vst [vmem:[%s1033_s3 + $0x98] sm:$0xff] %v367_v54  ;;  %v368_v60 = vsel %vm240_vm4, %v176_v39, %v304_v50  ;;  %vm241_vm5 = vcmp.ge.f32.partialorder %v177_v51, 0.0  ;;  %v305_v61 = vmul.f32 0.01, %v177_v51  ;;  %v51_v50 = vld [vmem:[%s1030_s0 + $0x128] sm:$0xff] }
  0x20   :  { %vm242_vm6 = vcmp.ge.f32.partialorder %v178_v52, 0.0  ;;  %432 = vst [vmem:[%s1033_s3 + $0xa0] sm:$0xff] %v368_v60  ;;  %v306_v62 = vmul.f32 0.01, %v178_v52  ;;  %v179_v63 = vadd.f32 %v513_v2, %v108_v53  ;;  %v180_v0 = vadd.f32 %v513_v2, %v109_v55 }
  0x21   :  { %v181_v3 = vadd.f32 %v513_v2, %v110_v56  ;;  %v369_v4 = vsel %vm241_vm5, %v177_v51, %v305_v61  ;;  %v182_v5 = vadd.f32 %v513_v2, %v111_v57  ;;  %v112_v6 = vmul.f32 %v508_v1, %v41_v58  ;;  %v52_v51 = vld [vmem:[%s1030_s0 + $0x130] sm:$0xff]  ;;  %v53_v58 = vld [vmem:[%s1030_s0 + $0x138] sm:$0xff] }
  0x22   :  { %v113_v7 = vmul.f32 %v508_v1, %v42_v59  ;;  %433 = vst [vmem:[%s1033_s3 + $0xa8] sm:$0xff] %v369_v4  ;;  %v370_v8 = vsel %vm242_vm6, %v178_v52, %v306_v62  ;;  %vm243_vm7 = vcmp.ge.f32.partialorder %v179_v63, 0.0  ;;  %v307_v9 = vmul.f32 0.01, %v179_v63 }
  0x23   :  { %vm244_vm8 = vcmp.ge.f32.partialorder %v180_v0, 0.0  ;;  %434 = vst [vmem:[%s1033_s3 + $0xb0] sm:$0xff] %v370_v8  ;;  %v308_v12 = vmul.f32 0.01, %v180_v0  ;;  %vm245_vm9 = vcmp.ge.f32.partialorder %v181_v3, 0.0  ;;  %vm246_vm10 = vcmp.ge.f32.partialorder %v182_v5, 0.0 }
  0x24   :  { %v309_v13 = vmul.f32 0.01, %v181_v3  ;;  %v371_v14 = vsel %vm243_vm7, %v179_v63, %v307_v9  ;;  %v310_v15 = vmul.f32 0.01, %v182_v5  ;;  %v183_v16 = vadd.f32 %v513_v2, %v112_v6  ;;  %v54_v63 = vld [vmem:[%s1030_s0 + $0x140] sm:$0xff] }
  0x25   :  { %v184_v17 = vadd.f32 %v513_v2, %v113_v7  ;;  %435 = vst [vmem:[%s1033_s3 + $0xb8] sm:$0xff] %v371_v14  ;;  %v372_v19 = vsel %vm244_vm8, %v180_v0, %v308_v12  ;;  %v114_v21 = vmul.f32 %v508_v1, %v43_v10  ;;  %v115_v22 = vmul.f32 %v508_v1, %v44_v11  ;;  %v55_v0 = vld [vmem:[%s1030_s0 + $0x148] sm:$0xff]  ;;  %v57_v14 = vld [vmem:[%s1030_s0 + $0x158] sm:$0xff] }
  0x26   :  { %v373_v20 = vsel %vm245_vm9, %v181_v3, %v309_v13  ;;  %436 = vst [vmem:[%s1033_s3 + $0xc0] sm:$0xff] %v372_v19  ;;  %v374_v26 = vsel %vm246_vm10, %v182_v5, %v310_v15  ;;  %vm247_vm11 = vcmp.ge.f32.partialorder %v183_v16, 0.0  ;;  %v311_v27 = vmul.f32 0.01, %v183_v16  ;;  %v56_v3 = vld [vmem:[%s1030_s0 + $0x150] sm:$0xff]  ;;  %v58_v15 = vld [vmem:[%s1030_s0 + $0x160] sm:$0xff] }
  0x27   :  { %437 = vst [vmem:[%s1033_s3 + $0xc8] sm:$0xff] %v373_v20  ;;  %vm248_vm12 = vcmp.ge.f32.partialorder %v184_v17, 0.0  ;;  %438 = vst [vmem:[%s1033_s3 + $0xd0] sm:$0xff] %v374_v26  ;;  %v312_v28 = vmul.f32 0.01, %v184_v17  ;;  %v185_v29 = vadd.f32 %v513_v2, %v114_v21  ;;  %v186_v30 = vadd.f32 %v513_v2, %v115_v22 }
  0x28   :  { %v116_v31 = vmul.f32 %v508_v1, %v45_v18  ;;  %v375_v32 = vsel %vm247_vm11, %v183_v16, %v311_v27  ;;  %v117_v33 = vmul.f32 %v508_v1, %v46_v23  ;;  %v118_v34 = vmul.f32 %v508_v1, %v47_v24 }
  0x29   :  { %v119_v35 = vmul.f32 %v508_v1, %v48_v25  ;;  %439 = vst [vmem:[%s1033_s3 + $0xd8] sm:$0xff] %v375_v32  ;;  %v376_v38 = vsel %vm248_vm12, %v184_v17, %v312_v28  ;;  %vm249_vm13 = vcmp.ge.f32.partialorder %v185_v29, 0.0  ;;  %v313_v39 = vmul.f32 0.01, %v185_v29  ;;  %v59_v28 = vld [vmem:[%s1030_s0 + $0x168] sm:$0xff] }
  0x2a   :  { %vm250_vm14 = vcmp.ge.f32.partialorder %v186_v30, 0.0  ;;  %440 = vst [vmem:[%s1033_s3 + $0xe0] sm:$0xff] %v376_v38  ;;  %v314_v40 = vmul.f32 0.01, %v186_v30  ;;  %v187_v41 = vadd.f32 %v513_v2, %v116_v31  ;;  %v188_v42 = vadd.f32 %v513_v2, %v117_v33 }
  0x2b   :  { %v189_v43 = vadd.f32 %v513_v2, %v118_v34  ;;  %v377_v44 = vsel %vm249_vm13, %v185_v29, %v313_v39  ;;  %v190_v45 = vadd.f32 %v513_v2, %v119_v35  ;;  %v120_v46 = vmul.f32 %v508_v1, %v49_v36  ;;  %v60_v29 = vld [vmem:[%s1030_s0 + $0x170] sm:$0xff]  ;;  %v61_v36 = vld [vmem:[%s1030_s0 + $0x178] sm:$0xff] }
  0x2c   :  { %v121_v47 = vmul.f32 %v508_v1, %v50_v37  ;;  %441 = vst [vmem:[%s1033_s3 + $0xe8] sm:$0xff] %v377_v44  ;;  %v378_v48 = vsel %vm250_vm14, %v186_v30, %v314_v40  ;;  %vm251_vm15 = vcmp.ge.f32.partialorder %v187_v41, 0.0  ;;  %v315_v49 = vmul.f32 0.01, %v187_v41 }
  0x2d   :  { %vm252_vm0 = vcmp.ge.f32.partialorder %v188_v42, 0.0  ;;  %442 = vst [vmem:[%s1033_s3 + $0xf0] sm:$0xff] %v378_v48  ;;  %v316_v52 = vmul.f32 0.01, %v188_v42  ;;  %vm253_vm1 = vcmp.ge.f32.partialorder %v189_v43, 0.0  ;;  %vm254_vm2 = vcmp.ge.f32.partialorder %v190_v45, 0.0 }
  0x2e   :  { %v317_v53 = vmul.f32 0.01, %v189_v43  ;;  %v379_v54 = vsel %vm251_vm15, %v187_v41, %v315_v49  ;;  %v318_v55 = vmul.f32 0.01, %v190_v45  ;;  %v191_v56 = vadd.f32 %v513_v2, %v120_v46  ;;  %v62_v41 = vld [vmem:[%s1030_s0 + $0x180] sm:$0xff] }
  0x2f   :  { %v192_v57 = vadd.f32 %v513_v2, %v121_v47  ;;  %443 = vst [vmem:[%s1033_s3 + $0xf8] sm:$0xff] %v379_v54  ;;  %v380_v59 = vsel %vm252_vm0, %v188_v42, %v316_v52  ;;  %v122_v61 = vmul.f32 %v508_v1, %v51_v50  ;;  %v123_v62 = vmul.f32 %v508_v1, %v52_v51  ;;  %v63_v42 = vld [vmem:[%s1030_s0 + $0x188] sm:$0xff]  ;;  %v65_v54 = vld [vmem:[%s1030_s0 + $0x198] sm:$0xff] }
  0x30   :  { %v381_v60 = vsel %vm253_vm1, %v189_v43, %v317_v53  ;;  %444 = vst [vmem:[%s1033_s3 + $0x100] sm:$0xff] %v380_v59  ;;  %v382_v4 = vsel %vm254_vm2, %v190_v45, %v318_v55  ;;  %vm255_vm3 = vcmp.ge.f32.partialorder %v191_v56, 0.0  ;;  %v319_v5 = vmul.f32 0.01, %v191_v56  ;;  %v64_v43 = vld [vmem:[%s1030_s0 + $0x190] sm:$0xff]  ;;  %v66_v55 = vld [vmem:[%s1030_s0 + $0x1a0] sm:$0xff] }
  0x31   :  { %445 = vst [vmem:[%s1033_s3 + $0x108] sm:$0xff] %v381_v60  ;;  %vm256_vm4 = vcmp.ge.f32.partialorder %v192_v57, 0.0  ;;  %446 = vst [vmem:[%s1033_s3 + $0x110] sm:$0xff] %v382_v4  ;;  %v320_v6 = vmul.f32 0.01, %v192_v57  ;;  %v193_v7 = vadd.f32 %v513_v2, %v122_v61  ;;  %v194_v8 = vadd.f32 %v513_v2, %v123_v62 }
  0x32   :  { %v124_v9 = vmul.f32 %v508_v1, %v53_v58  ;;  %v383_v10 = vsel %vm255_vm3, %v191_v56, %v319_v5  ;;  %v125_v11 = vmul.f32 %v508_v1, %v54_v63  ;;  %v126_v12 = vmul.f32 %v508_v1, %v55_v0 }
  0x33   :  { %v127_v13 = vmul.f32 %v508_v1, %v56_v3  ;;  %447 = vst [vmem:[%s1033_s3 + $0x118] sm:$0xff] %v383_v10  ;;  %v384_v16 = vsel %vm256_vm4, %v192_v57, %v320_v6  ;;  %vm257_vm5 = vcmp.ge.f32.partialorder %v193_v7, 0.0  ;;  %v321_v17 = vmul.f32 0.01, %v193_v7  ;;  %v67_v6 = vld [vmem:[%s1030_s0 + $0x1a8] sm:$0xff] }
  0x34   :  { %vm258_vm6 = vcmp.ge.f32.partialorder %v194_v8, 0.0  ;;  %448 = vst [vmem:[%s1033_s3 + $0x120] sm:$0xff] %v384_v16  ;;  %v322_v18 = vmul.f32 0.01, %v194_v8  ;;  %v195_v19 = vadd.f32 %v513_v2, %v124_v9  ;;  %v196_v20 = vadd.f32 %v513_v2, %v125_v11 }
  0x35   :  { %v197_v21 = vadd.f32 %v513_v2, %v126_v12  ;;  %v385_v22 = vsel %vm257_vm5, %v193_v7, %v321_v17  ;;  %v198_v23 = vadd.f32 %v513_v2, %v127_v13  ;;  %v128_v24 = vmul.f32 %v508_v1, %v57_v14  ;;  %v68_v7 = vld [vmem:[%s1030_s0 + $0x1b0] sm:$0xff]  ;;  %v69_v14 = vld [vmem:[%s1030_s0 + $0x1b8] sm:$0xff] }
  0x36   :  { %v129_v25 = vmul.f32 %v508_v1, %v58_v15  ;;  %449 = vst [vmem:[%s1033_s3 + $0x128] sm:$0xff] %v385_v22  ;;  %v386_v26 = vsel %vm258_vm6, %v194_v8, %v322_v18  ;;  %vm259_vm7 = vcmp.ge.f32.partialorder %v195_v19, 0.0  ;;  %v323_v27 = vmul.f32 0.01, %v195_v19 }
  0x37   :  { %vm260_vm8 = vcmp.ge.f32.partialorder %v196_v20, 0.0  ;;  %450 = vst [vmem:[%s1033_s3 + $0x130] sm:$0xff] %v386_v26  ;;  %v324_v30 = vmul.f32 0.01, %v196_v20  ;;  %vm261_vm9 = vcmp.ge.f32.partialorder %v197_v21, 0.0  ;;  %vm262_vm10 = vcmp.ge.f32.partialorder %v198_v23, 0.0 }
  0x38   :  { %v325_v31 = vmul.f32 0.01, %v197_v21  ;;  %v387_v32 = vsel %vm259_vm7, %v195_v19, %v323_v27  ;;  %v326_v33 = vmul.f32 0.01, %v198_v23  ;;  %v199_v34 = vadd.f32 %v513_v2, %v128_v24  ;;  %v70_v19 = vld [vmem:[%s1030_s0 + $0x1c0] sm:$0xff] }
  0x39   :  { %v200_v35 = vadd.f32 %v513_v2, %v129_v25  ;;  %451 = vst [vmem:[%s1033_s3 + $0x138] sm:$0xff] %v387_v32  ;;  %v388_v37 = vsel %vm260_vm8, %v196_v20, %v324_v30  ;;  %v130_v39 = vmul.f32 %v508_v1, %v59_v28  ;;  %v131_v40 = vmul.f32 %v508_v1, %v60_v29  ;;  %v71_v20 = vld [vmem:[%s1030_s0 + $0x1c8] sm:$0xff]  ;;  %v73_v32 = vld [vmem:[%s1030_s0 + $0x1d8] sm:$0xff] }
  0x3a   :  { %v389_v38 = vsel %vm261_vm9, %v197_v21, %v325_v31  ;;  %452 = vst [vmem:[%s1033_s3 + $0x140] sm:$0xff] %v388_v37  ;;  %v390_v44 = vsel %vm262_vm10, %v198_v23, %v326_v33  ;;  %vm263_vm11 = vcmp.ge.f32.partialorder %v199_v34, 0.0  ;;  %v327_v45 = vmul.f32 0.01, %v199_v34  ;;  %v72_v21 = vld [vmem:[%s1030_s0 + $0x1d0] sm:$0xff]  ;;  %v74_v33 = vld [vmem:[%s1030_s0 + $0x1e0] sm:$0xff] }
  0x3b   :  { %453 = vst [vmem:[%s1033_s3 + $0x148] sm:$0xff] %v389_v38  ;;  %vm264_vm12 = vcmp.ge.f32.partialorder %v200_v35, 0.0  ;;  %454 = vst [vmem:[%s1033_s3 + $0x150] sm:$0xff] %v390_v44  ;;  %v328_v46 = vmul.f32 0.01, %v200_v35  ;;  %v201_v47 = vadd.f32 %v513_v2, %v130_v39  ;;  %v202_v48 = vadd.f32 %v513_v2, %v131_v40 }
  0x3c   :  { %v132_v49 = vmul.f32 %v508_v1, %v61_v36  ;;  %v391_v50 = vsel %vm263_vm11, %v199_v34, %v327_v45  ;;  %v133_v51 = vmul.f32 %v508_v1, %v62_v41  ;;  %v134_v52 = vmul.f32 %v508_v1, %v63_v42 }
  0x3d   :  { %v135_v53 = vmul.f32 %v508_v1, %v64_v43  ;;  %455 = vst [vmem:[%s1033_s3 + $0x158] sm:$0xff] %v391_v50  ;;  %v392_v56 = vsel %vm264_vm12, %v200_v35, %v328_v46  ;;  %vm265_vm13 = vcmp.ge.f32.partialorder %v201_v47, 0.0  ;;  %v329_v57 = vmul.f32 0.01, %v201_v47  ;;  %v75_v46 = vld [vmem:[%s1030_s0 + $0x1e8] sm:$0xff] }
  0x3e   :  { %vm266_vm14 = vcmp.ge.f32.partialorder %v202_v48, 0.0  ;;  %456 = vst [vmem:[%s1033_s3 + $0x160] sm:$0xff] %v392_v56  ;;  %v330_v58 = vmul.f32 0.01, %v202_v48  ;;  %v203_v59 = vadd.f32 %v513_v2, %v132_v49  ;;  %v204_v60 = vadd.f32 %v513_v2, %v133_v51 }
  0x3f   :  { %v205_v61 = vadd.f32 %v513_v2, %v134_v52  ;;  %v393_v62 = vsel %vm265_vm13, %v201_v47, %v329_v57  ;;  %v206_v63 = vadd.f32 %v513_v2, %v135_v53  ;;  %v136_v0 = vmul.f32 %v508_v1, %v65_v54  ;;  %v76_v47 = vld [vmem:[%s1030_s0 + $0x1f0] sm:$0xff]  ;;  %v77_v54 = vld [vmem:[%s1030_s0 + $0x1f8] sm:$0xff] }
  0x40   :  { %v137_v3 = vmul.f32 %v508_v1, %v66_v55  ;;  %457 = vst [vmem:[%s1033_s3 + $0x168] sm:$0xff] %v393_v62  ;;  %v394_v4 = vsel %vm266_vm14, %v202_v48, %v330_v58  ;;  %vm267_vm15 = vcmp.ge.f32.partialorder %v203_v59, 0.0  ;;  %v331_v5 = vmul.f32 0.01, %v203_v59 }
  0x41   :  { %vm268_vm0 = vcmp.ge.f32.partialorder %v204_v60, 0.0  ;;  %458 = vst [vmem:[%s1033_s3 + $0x170] sm:$0xff] %v394_v4  ;;  %v332_v8 = vmul.f32 0.01, %v204_v60  ;;  %vm269_vm1 = vcmp.ge.f32.partialorder %v205_v61, 0.0  ;;  %vm270_vm2 = vcmp.ge.f32.partialorder %v206_v63, 0.0 }
  0x42   :  { %v333_v9 = vmul.f32 0.01, %v205_v61  ;;  %v395_v10 = vsel %vm267_vm15, %v203_v59, %v331_v5  ;;  %v334_v11 = vmul.f32 0.01, %v206_v63  ;;  %v207_v12 = vadd.f32 %v513_v2, %v136_v0 }
  0x43   :  { %v208_v13 = vadd.f32 %v513_v2, %v137_v3  ;;  %459 = vst [vmem:[%s1033_s3 + $0x178] sm:$0xff] %v395_v10  ;;  %v396_v15 = vsel %vm268_vm0, %v204_v60, %v332_v8  ;;  %v138_v17 = vmul.f32 %v508_v1, %v67_v6  ;;  %v139_v18 = vmul.f32 %v508_v1, %v68_v7 }
  0x44   :  { %v397_v16 = vsel %vm269_vm1, %v205_v61, %v333_v9  ;;  %460 = vst [vmem:[%s1033_s3 + $0x180] sm:$0xff] %v396_v15  ;;  %v398_v22 = vsel %vm270_vm2, %v206_v63, %v334_v11  ;;  %vm271_vm3 = vcmp.ge.f32.partialorder %v207_v12, 0.0  ;;  %v335_v23 = vmul.f32 0.01, %v207_v12 }
  0x45   :  { %461 = vst [vmem:[%s1033_s3 + $0x188] sm:$0xff] %v397_v16  ;;  %vm272_vm4 = vcmp.ge.f32.partialorder %v208_v13, 0.0  ;;  %462 = vst [vmem:[%s1033_s3 + $0x190] sm:$0xff] %v398_v22  ;;  %v336_v24 = vmul.f32 0.01, %v208_v13  ;;  %v209_v25 = vadd.f32 %v513_v2, %v138_v17  ;;  %v210_v26 = vadd.f32 %v513_v2, %v139_v18 }
  0x46   :  { %v140_v27 = vmul.f32 %v508_v1, %v69_v14  ;;  %v399_v28 = vsel %vm271_vm3, %v207_v12, %v335_v23  ;;  %v141_v29 = vmul.f32 %v508_v1, %v70_v19  ;;  %v142_v30 = vmul.f32 %v508_v1, %v71_v20 }
  0x47   :  { %v143_v31 = vmul.f32 %v508_v1, %v72_v21  ;;  %463 = vst [vmem:[%s1033_s3 + $0x198] sm:$0xff] %v399_v28  ;;  %v400_v34 = vsel %vm272_vm4, %v208_v13, %v336_v24  ;;  %vm273_vm5 = vcmp.ge.f32.partialorder %v209_v25, 0.0  ;;  %v337_v35 = vmul.f32 0.01, %v209_v25 }
  0x48   :  { %vm274_vm6 = vcmp.ge.f32.partialorder %v210_v26, 0.0  ;;  %464 = vst [vmem:[%s1033_s3 + $0x1a0] sm:$0xff] %v400_v34  ;;  %v338_v36 = vmul.f32 0.01, %v210_v26  ;;  %v211_v37 = vadd.f32 %v513_v2, %v140_v27  ;;  %v212_v38 = vadd.f32 %v513_v2, %v141_v29 }
  0x49   :  { %v213_v39 = vadd.f32 %v513_v2, %v142_v30  ;;  %v401_v40 = vsel %vm273_vm5, %v209_v25, %v337_v35  ;;  %v214_v41 = vadd.f32 %v513_v2, %v143_v31  ;;  %v144_v42 = vmul.f32 %v508_v1, %v73_v32 }
  0x4a   :  { %v145_v43 = vmul.f32 %v508_v1, %v74_v33  ;;  %465 = vst [vmem:[%s1033_s3 + $0x1a8] sm:$0xff] %v401_v40  ;;  %v402_v44 = vsel %vm274_vm6, %v210_v26, %v338_v36  ;;  %vm275_vm7 = vcmp.ge.f32.partialorder %v211_v37, 0.0  ;;  %v339_v45 = vmul.f32 0.01, %v211_v37 }
  0x4b   :  { %vm276_vm8 = vcmp.ge.f32.partialorder %v212_v38, 0.0  ;;  %466 = vst [vmem:[%s1033_s3 + $0x1b0] sm:$0xff] %v402_v44  ;;  %v340_v48 = vmul.f32 0.01, %v212_v38  ;;  %vm277_vm9 = vcmp.ge.f32.partialorder %v213_v39, 0.0  ;;  %vm278_vm10 = vcmp.ge.f32.partialorder %v214_v41, 0.0 }
  0x4c   :  { %v341_v49 = vmul.f32 0.01, %v213_v39  ;;  %v403_v50 = vsel %vm275_vm7, %v211_v37, %v339_v45  ;;  %v342_v51 = vmul.f32 0.01, %v214_v41  ;;  %v215_v52 = vadd.f32 %v513_v2, %v144_v42 }
  0x4d   :  { %v216_v53 = vadd.f32 %v513_v2, %v145_v43  ;;  %467 = vst [vmem:[%s1033_s3 + $0x1b8] sm:$0xff] %v403_v50  ;;  %v404_v55 = vsel %vm276_vm8, %v212_v38, %v340_v48  ;;  %v146_v57 = vmul.f32 %v508_v1, %v75_v46  ;;  %v147_v58 = vmul.f32 %v508_v1, %v76_v47 }
  0x4e   :  { %v405_v56 = vsel %vm277_vm9, %v213_v39, %v341_v49  ;;  %468 = vst [vmem:[%s1033_s3 + $0x1c0] sm:$0xff] %v404_v55  ;;  %v406_v59 = vsel %vm278_vm10, %v214_v41, %v342_v51  ;;  %vm279_vm11 = vcmp.ge.f32.partialorder %v215_v52, 0.0  ;;  %v343_v60 = vmul.f32 0.01, %v215_v52 }
  0x4f   :  { %469 = vst [vmem:[%s1033_s3 + $0x1c8] sm:$0xff] %v405_v56  ;;  %vm280_vm12 = vcmp.ge.f32.partialorder %v216_v53, 0.0  ;;  %470 = vst [vmem:[%s1033_s3 + $0x1d0] sm:$0xff] %v406_v59  ;;  %v344_v61 = vmul.f32 0.01, %v216_v53  ;;  %v217_v62 = vadd.f32 %v513_v2, %v146_v57  ;;  %v218_v63 = vadd.f32 %v513_v2, %v147_v58 }
  0x50   :  { %v148_v0 = vmul.f32 %v508_v1, %v77_v54  ;;  %v407_v3 = vsel %vm279_vm11, %v215_v52, %v343_v60 }
  0x51   :  { %471 = vst [vmem:[%s1033_s3 + $0x1d8] sm:$0xff] %v407_v3  ;;  %v408_v4 = vsel %vm280_vm12, %v216_v53, %v344_v61  ;;  %vm281_vm13 = vcmp.ge.f32.partialorder %v217_v62, 0.0  ;;  %v345_v5 = vmul.f32 0.01, %v217_v62  ;;  %vm282_vm14 = vcmp.ge.f32.partialorder %v218_v63, 0.0 }
  0x52   :  { %472 = vst [vmem:[%s1033_s3 + $0x1e0] sm:$0xff] %v408_v4  ;;  %v346_v6 = vmul.f32 0.01, %v218_v63  ;;  %v219_v7 = vadd.f32 %v513_v2, %v148_v0 }
  0x53   :  { %v409_v8 = vsel %vm281_vm13, %v217_v62, %v345_v5 }
  0x54   :  { %473 = vst [vmem:[%s1033_s3 + $0x1e8] sm:$0xff] %v409_v8  ;;  %v410_v1 = vsel %vm282_vm14, %v218_v63, %v346_v6  ;;  %vm283_vm15 = vcmp.ge.f32.partialorder %v219_v7, 0.0  ;;  %v347_v9 = vmul.f32 0.01, %v219_v7 }
  0x55   :  { %474 = vst [vmem:[%s1033_s3 + $0x1f0] sm:$0xff] %v410_v1 }
  0x56   :  { %v411_v10 = vsel %vm283_vm15, %v219_v7, %v347_v9 }
  0x57   :  { %475 = vst [vmem:[%s1033_s3 + $0x1f8] sm:$0xff] %v411_v10 }

// kernel: decoder_forward.19
= control target key start
LH: loop header
LB: loop body
LE: loop exit
PB: predicated region body
PF: predicated region fallthrough
CT: control target
= control target key end

     0   :  { %vm379_vm0 = vcmask 1043456   ;;  %vm282_vm1 = vcmask 588800   ;;  %s1586_s1 = inlined_call_operand.vmem [shape: bf16[72,128], index: 1, kind: input, shape index: {}]   ;;  %s1587_s0 = inlined_call_operand.vmem [shape: bf16[512,72], index: 0, kind: input, shape index: {}]   ;;  %s1588_s2 = inlined_call_operand.vmem [shape: f32[1,128], index: 2, kind: input, shape index: {}]   ;;  %s1589_s3 = inlined_call_operand.vmem [shape: f32[512,128], index: 3, kind: output, shape index: {}]  }
   0x1   :  { %v997_v0 = vld [vmem:[%s1586_s1 + $0x20] ss:$0 sps:$4 sm:$0xff]   ;;  %v998_v1 = vld [vmem:[%s1586_s1 + $0x18] sm:$0xff]   ;;  %v999_v3 = vld [vmem:[%s1586_s1 + $0x10] sm:$0xff]  }
   0x2   :  { %995 = vmatprep.subr.msk.bf16.mxu0 %vm379_vm0, %v997_v0  ;;  %996 = vmatprep.subr.msk.bf16.mxu1 %vm379_vm0, %v997_v0  ;;  %v381_v2 = vsel %vm379_vm0, %v997_v0, 0  ;;  %v1002_v4 = vld [vmem:[%s1587_s0] sm:$0xff]   ;;  %v1000_v6 = vld [vmem:[%s1586_s1 + $0x8] sm:$0xff]   ;;  %v1006_v10 = vld [vmem:[%s1587_s0 + $0x10] sm:$0xff]  }
   0x3   :  { %912 = vmatpush3.bf16.msra.mxu0 %v381_v2  ;;  %990 = vmatpush3.bf16.msra.mxu1 %v381_v2  ;;  %v1003_v5 = vld [vmem:[%s1587_s0 + $0x80] sm:$0xff]   ;;  %v1004_v8 = vld [vmem:[%s1587_s0 + $0x8] sm:$0xff]   ;;  %v1007_v11 = vld [vmem:[%s1587_s0 + $0x90] sm:$0xff]  }
   0x4   :  { %913 = vmatprep.subr.bf16.mxu0 %v998_v1  ;;  %986 = vmatprep.subr.bf16.mxu1 %v998_v1  ;;  %v1001_v7 = vld [vmem:[%s1586_s1] sm:$0xff]   ;;  %v1005_v9 = vld [vmem:[%s1587_s0 + $0x88] sm:$0xff]   ;;  %v1008_v12 = vld [vmem:[%s1587_s0 + $0x18] sm:$0xff]  }
   0x5   :  { %921 = vmatprep.mubr.msk.bf16.mxu0 %vm282_vm1, %v1002_v4  ;;  %953 = vmatprep.mubr.msk.bf16.mxu1 %vm282_vm1, %v1003_v5  ;;  %v1009_v13 = vld [vmem:[%s1587_s0 + $0x98] sm:$0xff]   ;;  %v1010_v14 = vld [vmem:[%s1587_s0 + $0x20] sm:$0xff]   ;;  %v1012_v16 = vld [vmem:[%s1587_s0 + $0x28] sm:$0xff]  }
   0x6   :  { %v1011_v15 = vld [vmem:[%s1587_s0 + $0xa0] sm:$0xff]   ;;  %v1013_v17 = vld [vmem:[%s1587_s0 + $0xa8] sm:$0xff]   ;;  %v1014_v18 = vld [vmem:[%s1587_s0 + $0x30] sm:$0xff]  }
   0x7   :  { %914 = vmatpush3.bf16.msra.mxu0 %v998_v1  ;;  %991 = vmatpush3.bf16.msra.mxu1 %v998_v1  ;;  %v1015_v19 = vld [vmem:[%s1587_s0 + $0xb0] sm:$0xff]   ;;  %v1016_v20 = vld [vmem:[%s1587_s0 + $0x38] sm:$0xff]   ;;  %v1018_v22 = vld [vmem:[%s1587_s0 + $0x40] sm:$0xff]  }
   0x8   :  { %915 = vmatprep.subr.bf16.mxu0 %v999_v3  ;;  %987 = vmatprep.subr.bf16.mxu1 %v999_v3  ;;  %v1017_v21 = vld [vmem:[%s1587_s0 + $0xb8] sm:$0xff]   ;;  %v1019_v23 = vld [vmem:[%s1587_s0 + $0xc0] sm:$0xff]   ;;  %v1020_v24 = vld [vmem:[%s1587_s0 + $0x48] sm:$0xff]  }
   0x9   :  { %v1021_v25 = vld [vmem:[%s1587_s0 + $0xc8] sm:$0xff]   ;;  %v1022_v26 = vld [vmem:[%s1587_s0 + $0x50] sm:$0xff]   ;;  %v1024_v28 = vld [vmem:[%s1587_s0 + $0x58] sm:$0xff]  }
   0xa   :  { %v1023_v27 = vld [vmem:[%s1587_s0 + $0xd0] sm:$0xff]   ;;  %v1025_v29 = vld [vmem:[%s1587_s0 + $0xd8] sm:$0xff]   ;;  %v1026_v30 = vld [vmem:[%s1587_s0 + $0x60] sm:$0xff]  }
   0xb   :  { %916 = vmatpush3.bf16.msra.mxu0 %v999_v3  ;;  %992 = vmatpush3.bf16.msra.mxu1 %v999_v3  ;;  %v1027_v31 = vld [vmem:[%s1587_s0 + $0xe0] sm:$0xff]   ;;  %v1028_v32 = vld [vmem:[%s1587_s0 + $0x68] sm:$0xff]   ;;  %v1030_v34 = vld [vmem:[%s1587_s0 + $0x70] sm:$0xff]  }
   0xc   :  { %917 = vmatprep.subr.bf16.mxu0 %v1000_v6  ;;  %988 = vmatprep.subr.bf16.mxu1 %v1000_v6  ;;  %v1029_v33 = vld [vmem:[%s1587_s0 + $0xe8] sm:$0xff]   ;;  %v1031_v35 = vld [vmem:[%s1587_s0 + $0xf0] sm:$0xff]   ;;  %v1032_v36 = vld [vmem:[%s1587_s0 + $0x78] sm:$0xff]  }
   0xd   :  { %v1033_v37 = vld [vmem:[%s1587_s0 + $0xf8] sm:$0xff]   ;;  %v1328_v38 = vld [vmem:[%s1588_s2] ss:$0 sm:$0xff] }
   0xf   :  { %918 = vmatpush3.bf16.msra.mxu0 %v1000_v6  ;;  %993 = vmatpush3.bf16.msra.mxu1 %v1000_v6 }
  0x10   :  { %919 = vmatprep.subr.bf16.mxu0 %v1001_v7  ;;  %989 = vmatprep.subr.bf16.mxu1 %v1001_v7 }
  0x13   :  { %920 = vmatpush3.bf16.msra.mxu0 %v1001_v7  ;;  %994 = vmatpush3.bf16.msra.mxu1 %v1001_v7 }
  0x16   :  { %922 = vmatmul.mubr.msk.bf16.vlgmr.msra.gmra.mxu0 %vm282_vm1, %v1004_v8  ;;  %954 = vmatmul.mubr.msk.bf16.vlgmr.msra.gmra.mxu1 %vm282_vm1, %v1005_v9 }
  0x17   :  { %925 = vmatprep.mubr.msk.bf16.mxu0 %vm282_vm1, %v1006_v10  ;;  %957 = vmatprep.mubr.msk.bf16.mxu1 %vm282_vm1, %v1007_v11 }
  0x1e   :  { %926 = vmatmul.mubr.msk.bf16.gmra.mxu0 %vm282_vm1, %v1008_v12  ;;  %958 = vmatmul.mubr.msk.bf16.gmra.mxu1 %vm282_vm1, %v1009_v13 }
  0x1f   :  { %929 = vmatprep.mubr.msk.bf16.mxu0 %vm282_vm1, %v1010_v14  ;;  %961 = vmatprep.mubr.msk.bf16.mxu1 %vm282_vm1, %v1011_v15 }
  0x26   :  { %930 = vmatmul.mubr.msk.bf16.gmra.mxu0 %vm282_vm1, %v1012_v16  ;;  %962 = vmatmul.mubr.msk.bf16.gmra.mxu1 %vm282_vm1, %v1013_v17 }
  0x27   :  { %933 = vmatprep.mubr.msk.bf16.mxu0 %vm282_vm1, %v1014_v18  ;;  %965 = vmatprep.mubr.msk.bf16.mxu1 %vm282_vm1, %v1015_v19 }
  0x2e   :  { %934 = vmatmul.mubr.msk.bf16.gmra.mxu0 %vm282_vm1, %v1016_v20  ;;  %966 = vmatmul.mubr.msk.bf16.gmra.mxu1 %vm282_vm1, %v1017_v21 }
  0x2f   :  { %937 = vmatprep.mubr.msk.bf16.mxu0 %vm282_vm1, %v1018_v22  ;;  %969 = vmatprep.mubr.msk.bf16.mxu1 %vm282_vm1, %v1019_v23 }
  0x36   :  { %938 = vmatmul.mubr.msk.bf16.gmra.mxu0 %vm282_vm1, %v1020_v24  ;;  %970 = vmatmul.mubr.msk.bf16.gmra.mxu1 %vm282_vm1, %v1021_v25 }
  0x37   :  { %941 = vmatprep.mubr.msk.bf16.mxu0 %vm282_vm1, %v1022_v26  ;;  %973 = vmatprep.mubr.msk.bf16.mxu1 %vm282_vm1, %v1023_v27 }
  0x3e   :  { %942 = vmatmul.mubr.msk.bf16.gmra.mxu0 %vm282_vm1, %v1024_v28  ;;  %974 = vmatmul.mubr.msk.bf16.gmra.mxu1 %vm282_vm1, %v1025_v29 }
  0x3f   :  { %945 = vmatprep.mubr.msk.bf16.mxu0 %vm282_vm1, %v1026_v30  ;;  %977 = vmatprep.mubr.msk.bf16.mxu1 %vm282_vm1, %v1027_v31 }
  0x46   :  { %946 = vmatmul.mubr.msk.bf16.gmra.mxu0 %vm282_vm1, %v1028_v32  ;;  %978 = vmatmul.mubr.msk.bf16.gmra.mxu1 %vm282_vm1, %v1029_v33 }
  0x47   :  { %949 = vmatprep.mubr.msk.bf16.mxu0 %vm282_vm1, %v1030_v34  ;;  %981 = vmatprep.mubr.msk.bf16.mxu1 %vm282_vm1, %v1031_v35 }
  0x4e   :  { %950 = vmatmul.mubr.msk.bf16.gmra.mxu0 %vm282_vm1, %v1032_v36  ;;  %982 = vmatmul.mubr.msk.bf16.gmra.mxu1 %vm282_vm1, %v1033_v37 }
  0xd6   :  { %v923_v39 = vpop.f32.mrf.mxu0  ;;  %v955_v40 = vpop.f32.mrf.mxu1 }
  0xd7   :  { %v426_v41 = vadd.f32 %v923_v39, %v1328_v38  ;;  %v554_v42 = vadd.f32 %v955_v40, %v1328_v38 }
  0xd8   :  { %v417_v43 = vpop.f32.mrf.mxu0  ;;  %v545_v44 = vpop.f32.mrf.mxu1 }
  0xd9   :  { %1034 = vtanh.f32 %v426_v41  ;;  %v418_v45 = vadd.f32 %v1328_v38, %v417_v43  ;;  %v546_v46 = vadd.f32 %v1328_v38, %v545_v44 }
  0xda   :  { %1036 = vtanh.f32 %v554_v42  ;;  %v924_v47 = vpop.f32.mrf.mxu0  ;;  %v956_v48 = vpop.f32.mrf.mxu1 }
  0xdb   :  { %1038 = vtanh.f32 %v418_v45  ;;  %v429_v49 = vadd.f32 %v924_v47, %v1328_v38  ;;  %v557_v50 = vadd.f32 %v956_v48, %v1328_v38 }
  0xdc   :  { %1040 = vtanh.f32 %v546_v46  ;;  %v420_v51 = vpop.f32.mrf.mxu0  ;;  %v548_v52 = vpop.f32.mrf.mxu1 }
  0xdd   :  { %1042 = vtanh.f32 %v429_v49  ;;  %v421_v53 = vadd.f32 %v1328_v38, %v420_v51  ;;  %v549_v54 = vadd.f32 %v1328_v38, %v548_v52 }
  0xde   :  { %1044 = vtanh.f32 %v557_v50  ;;  %v927_v55 = vpop.f32.mrf.mxu0  ;;  %v959_v56 = vpop.f32.mrf.mxu1 }
  0xdf   :  { %1046 = vtanh.f32 %v421_v53  ;;  %v442_v57 = vadd.f32 %v927_v55, %v1328_v38  ;;  %v570_v58 = vadd.f32 %v959_v56, %v1328_v38 }
  0xe0   :  { %1048 = vtanh.f32 %v549_v54  ;;  %v433_v59 = vpop.f32.mrf.mxu0  ;;  %v561_v60 = vpop.f32.mrf.mxu1 }
  0xe1   :  { %1050 = vtanh.f32 %v442_v57  ;;  %v434_v61 = vadd.f32 %v1328_v38, %v433_v59  ;;  %v562_v62 = vadd.f32 %v1328_v38, %v561_v60 }
  0xe2   :  { %1052 = vtanh.f32 %v570_v58  ;;  %v928_v63 = vpop.f32.mrf.mxu0  ;;  %v960_v0 = vpop.f32.mrf.mxu1 }
  0xe3   :  { %1054 = vtanh.f32 %v434_v61  ;;  %v445_v1 = vadd.f32 %v928_v63, %v1328_v38  ;;  %v573_v2 = vadd.f32 %v960_v0, %v1328_v38 }
  0xe4   :  { %1056 = vtanh.f32 %v562_v62  ;;  %v436_v3 = vpop.f32.mrf.mxu0  ;;  %v564_v4 = vpop.f32.mrf.mxu1 }
  0xe5   :  { %1058 = vtanh.f32 %v445_v1  ;;  %v437_v5 = vadd.f32 %v1328_v38, %v436_v3  ;;  %v565_v6 = vadd.f32 %v1328_v38, %v564_v4 }
  0xe6   :  { %v1035_v7 = vpop.eup %1034  ;;  %1060 = vtanh.f32 %v573_v2  ;;  %v931_v8 = vpop.f32.mrf.mxu0 }
  0xe7   :  { %v963_v9 = vpop.f32.mrf.mxu1  ;;  %v1037_v10 = vpop.eup %1036  ;;  %738 = vst [vmem:[%s1589_s3 + $0x10] sm:$0xff] %v1035_v7  ;;  %1062 = vtanh.f32 %v437_v5  ;;  %v458_v11 = vadd.f32 %v931_v8, %v1328_v38 }
  0xe8   :  { %v586_v12 = vadd.f32 %v963_v9, %v1328_v38  ;;  %v1039_v13 = vpop.eup %1038  ;;  %770 = vst [vmem:[%s1589_s3 + $0x110] sm:$0xff] %v1037_v10  ;;  %1064 = vtanh.f32 %v565_v6  ;;  %v449_v14 = vpop.f32.mrf.mxu0 }
  0xe9   :  { %v577_v15 = vpop.f32.mrf.mxu1  ;;  %v1041_v16 = vpop.eup %1040  ;;  %736 = vst [vmem:[%s1589_s3] sm:$0xff] %v1039_v13  ;;  %1066 = vtanh.f32 %v458_v11  ;;  %v450_v17 = vadd.f32 %v1328_v38, %v449_v14 }
  0xea   :  { %v578_v18 = vadd.f32 %v1328_v38, %v577_v15  ;;  %v1043_v19 = vpop.eup %1042  ;;  %768 = vst [vmem:[%s1589_s3 + $0x100] sm:$0xff] %v1041_v16  ;;  %1068 = vtanh.f32 %v586_v12  ;;  %v932_v20 = vpop.f32.mrf.mxu0 }
  0xeb   :  { %v964_v21 = vpop.f32.mrf.mxu1  ;;  %v1045_v22 = vpop.eup %1044  ;;  %739 = vst [vmem:[%s1589_s3 + $0x18] sm:$0xff] %v1043_v19  ;;  %1070 = vtanh.f32 %v450_v17  ;;  %v461_v23 = vadd.f32 %v932_v20, %v1328_v38 }
  0xec   :  { %v589_v24 = vadd.f32 %v964_v21, %v1328_v38  ;;  %v1047_v25 = vpop.eup %1046  ;;  %771 = vst [vmem:[%s1589_s3 + $0x118] sm:$0xff] %v1045_v22  ;;  %1072 = vtanh.f32 %v578_v18  ;;  %v452_v26 = vpop.f32.mrf.mxu0 }
  0xed   :  { %v580_v27 = vpop.f32.mrf.mxu1  ;;  %v1049_v28 = vpop.eup %1048  ;;  %737 = vst [vmem:[%s1589_s3 + $0x8] sm:$0xff] %v1047_v25  ;;  %1074 = vtanh.f32 %v461_v23  ;;  %v453_v29 = vadd.f32 %v1328_v38, %v452_v26 }
  0xee   :  { %v581_v30 = vadd.f32 %v1328_v38, %v580_v27  ;;  %v1051_v31 = vpop.eup %1050  ;;  %769 = vst [vmem:[%s1589_s3 + $0x108] sm:$0xff] %v1049_v28  ;;  %1076 = vtanh.f32 %v589_v24  ;;  %v935_v32 = vpop.f32.mrf.mxu0 }
  0xef   :  { %v967_v33 = vpop.f32.mrf.mxu1  ;;  %v1053_v34 = vpop.eup %1052  ;;  %742 = vst [vmem:[%s1589_s3 + $0x30] sm:$0xff] %v1051_v31  ;;  %1078 = vtanh.f32 %v453_v29  ;;  %v474_v35 = vadd.f32 %v935_v32, %v1328_v38 }
  0xf0   :  { %v602_v36 = vadd.f32 %v967_v33, %v1328_v38  ;;  %v1055_v37 = vpop.eup %1054  ;;  %774 = vst [vmem:[%s1589_s3 + $0x130] sm:$0xff] %v1053_v34  ;;  %1080 = vtanh.f32 %v581_v30  ;;  %v465_v39 = vpop.f32.mrf.mxu0 }
  0xf1   :  { %v593_v40 = vpop.f32.mrf.mxu1  ;;  %v1057_v41 = vpop.eup %1056  ;;  %740 = vst [vmem:[%s1589_s3 + $0x20] sm:$0xff] %v1055_v37  ;;  %1082 = vtanh.f32 %v474_v35  ;;  %v466_v42 = vadd.f32 %v1328_v38, %v465_v39 }
  0xf2   :  { %v594_v43 = vadd.f32 %v1328_v38, %v593_v40  ;;  %v1059_v44 = vpop.eup %1058  ;;  %772 = vst [vmem:[%s1589_s3 + $0x120] sm:$0xff] %v1057_v41  ;;  %1084 = vtanh.f32 %v602_v36  ;;  %v936_v45 = vpop.f32.mrf.mxu0 }
  0xf3   :  { %v968_v46 = vpop.f32.mrf.mxu1  ;;  %v1061_v47 = vpop.eup %1060  ;;  %743 = vst [vmem:[%s1589_s3 + $0x38] sm:$0xff] %v1059_v44  ;;  %1086 = vtanh.f32 %v466_v42  ;;  %v477_v48 = vadd.f32 %v936_v45, %v1328_v38 }
  0xf4   :  { %v605_v49 = vadd.f32 %v968_v46, %v1328_v38  ;;  %v1063_v50 = vpop.eup %1062  ;;  %775 = vst [vmem:[%s1589_s3 + $0x138] sm:$0xff] %v1061_v47  ;;  %1088 = vtanh.f32 %v594_v43  ;;  %v468_v51 = vpop.f32.mrf.mxu0 }
  0xf5   :  { %v596_v52 = vpop.f32.mrf.mxu1  ;;  %v1065_v53 = vpop.eup %1064  ;;  %741 = vst [vmem:[%s1589_s3 + $0x28] sm:$0xff] %v1063_v50  ;;  %1090 = vtanh.f32 %v477_v48  ;;  %v469_v54 = vadd.f32 %v1328_v38, %v468_v51 }
  0xf6   :  { %v597_v55 = vadd.f32 %v1328_v38, %v596_v52  ;;  %v1067_v56 = vpop.eup %1066  ;;  %773 = vst [vmem:[%s1589_s3 + $0x128] sm:$0xff] %v1065_v53  ;;  %1092 = vtanh.f32 %v605_v49  ;;  %v939_v57 = vpop.f32.mrf.mxu0 }
  0xf7   :  { %v971_v58 = vpop.f32.mrf.mxu1  ;;  %v1069_v59 = vpop.eup %1068  ;;  %746 = vst [vmem:[%s1589_s3 + $0x50] sm:$0xff] %v1067_v56  ;;  %1094 = vtanh.f32 %v469_v54  ;;  %v490_v60 = vadd.f32 %v939_v57, %v1328_v38 }
  0xf8   :  { %v618_v61 = vadd.f32 %v971_v58, %v1328_v38  ;;  %v1071_v62 = vpop.eup %1070  ;;  %778 = vst [vmem:[%s1589_s3 + $0x150] sm:$0xff] %v1069_v59  ;;  %1096 = vtanh.f32 %v597_v55  ;;  %v481_v63 = vpop.f32.mrf.mxu0 }
  0xf9   :  { %v609_v0 = vpop.f32.mrf.mxu1  ;;  %v1073_v1 = vpop.eup %1072  ;;  %744 = vst [vmem:[%s1589_s3 + $0x40] sm:$0xff] %v1071_v62  ;;  %1098 = vtanh.f32 %v490_v60  ;;  %v482_v2 = vadd.f32 %v1328_v38, %v481_v63 }
  0xfa   :  { %v610_v3 = vadd.f32 %v1328_v38, %v609_v0  ;;  %v1075_v4 = vpop.eup %1074  ;;  %776 = vst [vmem:[%s1589_s3 + $0x140] sm:$0xff] %v1073_v1  ;;  %1100 = vtanh.f32 %v618_v61  ;;  %v940_v5 = vpop.f32.mrf.mxu0 }
  0xfb   :  { %v972_v6 = vpop.f32.mrf.mxu1  ;;  %v1077_v7 = vpop.eup %1076  ;;  %747 = vst [vmem:[%s1589_s3 + $0x58] sm:$0xff] %v1075_v4  ;;  %1102 = vtanh.f32 %v482_v2  ;;  %v493_v8 = vadd.f32 %v940_v5, %v1328_v38 }
  0xfc   :  { %v621_v9 = vadd.f32 %v972_v6, %v1328_v38  ;;  %v1079_v10 = vpop.eup %1078  ;;  %779 = vst [vmem:[%s1589_s3 + $0x158] sm:$0xff] %v1077_v7  ;;  %1104 = vtanh.f32 %v610_v3  ;;  %v484_v11 = vpop.f32.mrf.mxu0 }
  0xfd   :  { %v612_v12 = vpop.f32.mrf.mxu1  ;;  %v1081_v13 = vpop.eup %1080  ;;  %745 = vst [vmem:[%s1589_s3 + $0x48] sm:$0xff] %v1079_v10  ;;  %1106 = vtanh.f32 %v493_v8  ;;  %v485_v14 = vadd.f32 %v1328_v38, %v484_v11 }
  0xfe   :  { %v613_v15 = vadd.f32 %v1328_v38, %v612_v12  ;;  %v1083_v16 = vpop.eup %1082  ;;  %777 = vst [vmem:[%s1589_s3 + $0x148] sm:$0xff] %v1081_v13  ;;  %1108 = vtanh.f32 %v621_v9  ;;  %v943_v17 = vpop.f32.mrf.mxu0 }
  0xff   :  { %v975_v18 = vpop.f32.mrf.mxu1  ;;  %v1085_v19 = vpop.eup %1084  ;;  %750 = vst [vmem:[%s1589_s3 + $0x70] sm:$0xff] %v1083_v16  ;;  %1110 = vtanh.f32 %v485_v14  ;;  %v506_v20 = vadd.f32 %v943_v17, %v1328_v38 }
 0x100   :  { %v634_v21 = vadd.f32 %v975_v18, %v1328_v38  ;;  %v1087_v22 = vpop.eup %1086  ;;  %782 = vst [vmem:[%s1589_s3 + $0x170] sm:$0xff] %v1085_v19  ;;  %1112 = vtanh.f32 %v613_v15  ;;  %v497_v23 = vpop.f32.mrf.mxu0 }
 0x101   :  { %v625_v24 = vpop.f32.mrf.mxu1  ;;  %v1089_v25 = vpop.eup %1088  ;;  %748 = vst [vmem:[%s1589_s3 + $0x60] sm:$0xff] %v1087_v22  ;;  %1114 = vtanh.f32 %v506_v20  ;;  %v498_v26 = vadd.f32 %v1328_v38, %v497_v23 }
 0x102   :  { %v626_v27 = vadd.f32 %v1328_v38, %v625_v24  ;;  %v1091_v28 = vpop.eup %1090  ;;  %780 = vst [vmem:[%s1589_s3 + $0x160] sm:$0xff] %v1089_v25  ;;  %1116 = vtanh.f32 %v634_v21  ;;  %v944_v29 = vpop.f32.mrf.mxu0 }
 0x103   :  { %v976_v30 = vpop.f32.mrf.mxu1  ;;  %v1093_v31 = vpop.eup %1092  ;;  %751 = vst [vmem:[%s1589_s3 + $0x78] sm:$0xff] %v1091_v28  ;;  %1118 = vtanh.f32 %v498_v26  ;;  %v509_v32 = vadd.f32 %v944_v29, %v1328_v38 }
 0x104   :  { %v637_v33 = vadd.f32 %v976_v30, %v1328_v38  ;;  %v1095_v34 = vpop.eup %1094  ;;  %783 = vst [vmem:[%s1589_s3 + $0x178] sm:$0xff] %v1093_v31  ;;  %1120 = vtanh.f32 %v626_v27  ;;  %v500_v35 = vpop.f32.mrf.mxu0 }
 0x105   :  { %v628_v36 = vpop.f32.mrf.mxu1  ;;  %v1097_v37 = vpop.eup %1096  ;;  %749 = vst [vmem:[%s1589_s3 + $0x68] sm:$0xff] %v1095_v34  ;;  %1122 = vtanh.f32 %v509_v32  ;;  %v501_v39 = vadd.f32 %v1328_v38, %v500_v35 }
 0x106   :  { %v629_v40 = vadd.f32 %v1328_v38, %v628_v36  ;;  %v1099_v41 = vpop.eup %1098  ;;  %781 = vst [vmem:[%s1589_s3 + $0x168] sm:$0xff] %v1097_v37  ;;  %1124 = vtanh.f32 %v637_v33  ;;  %v947_v42 = vpop.f32.mrf.mxu0 }
 0x107   :  { %v979_v43 = vpop.f32.mrf.mxu1  ;;  %v1101_v44 = vpop.eup %1100  ;;  %754 = vst [vmem:[%s1589_s3 + $0x90] sm:$0xff] %v1099_v41  ;;  %1126 = vtanh.f32 %v501_v39  ;;  %v522_v45 = vadd.f32 %v947_v42, %v1328_v38 }
 0x108   :  { %v650_v46 = vadd.f32 %v979_v43, %v1328_v38  ;;  %v1103_v47 = vpop.eup %1102  ;;  %786 = vst [vmem:[%s1589_s3 + $0x190] sm:$0xff] %v1101_v44  ;;  %1128 = vtanh.f32 %v629_v40  ;;  %v513_v48 = vpop.f32.mrf.mxu0 }
 0x109   :  { %v641_v49 = vpop.f32.mrf.mxu1  ;;  %v1105_v50 = vpop.eup %1104  ;;  %752 = vst [vmem:[%s1589_s3 + $0x80] sm:$0xff] %v1103_v47  ;;  %1130 = vtanh.f32 %v522_v45  ;;  %v514_v51 = vadd.f32 %v1328_v38, %v513_v48 }
 0x10a   :  { %v642_v52 = vadd.f32 %v1328_v38, %v641_v49  ;;  %v1107_v53 = vpop.eup %1106  ;;  %784 = vst [vmem:[%s1589_s3 + $0x180] sm:$0xff] %v1105_v50  ;;  %1132 = vtanh.f32 %v650_v46  ;;  %v948_v54 = vpop.f32.mrf.mxu0 }
 0x10b   :  { %v980_v55 = vpop.f32.mrf.mxu1  ;;  %v1109_v56 = vpop.eup %1108  ;;  %755 = vst [vmem:[%s1589_s3 + $0x98] sm:$0xff] %v1107_v53  ;;  %1134 = vtanh.f32 %v514_v51  ;;  %v525_v57 = vadd.f32 %v948_v54, %v1328_v38 }
 0x10c   :  { %v653_v58 = vadd.f32 %v980_v55, %v1328_v38  ;;  %v1111_v59 = vpop.eup %1110  ;;  %787 = vst [vmem:[%s1589_s3 + $0x198] sm:$0xff] %v1109_v56  ;;  %1136 = vtanh.f32 %v642_v52  ;;  %v516_v60 = vpop.f32.mrf.mxu0 }
 0x10d   :  { %v644_v61 = vpop.f32.mrf.mxu1  ;;  %v1113_v62 = vpop.eup %1112  ;;  %753 = vst [vmem:[%s1589_s3 + $0x88] sm:$0xff] %v1111_v59  ;;  %1138 = vtanh.f32 %v525_v57  ;;  %v517_v63 = vadd.f32 %v1328_v38, %v516_v60 }
 0x10e   :  { %v645_v0 = vadd.f32 %v1328_v38, %v644_v61  ;;  %v1115_v1 = vpop.eup %1114  ;;  %785 = vst [vmem:[%s1589_s3 + $0x188] sm:$0xff] %v1113_v62  ;;  %1140 = vtanh.f32 %v653_v58  ;;  %v951_v2 = vpop.f32.mrf.mxu0 }
 0x10f   :  { %v983_v3 = vpop.f32.mrf.mxu1  ;;  %v1117_v4 = vpop.eup %1116  ;;  %758 = vst [vmem:[%s1589_s3 + $0xb0] sm:$0xff] %v1115_v1  ;;  %1142 = vtanh.f32 %v517_v63  ;;  %v538_v5 = vadd.f32 %v951_v2, %v1328_v38 }
 0x110   :  { %v666_v6 = vadd.f32 %v983_v3, %v1328_v38  ;;  %v1119_v7 = vpop.eup %1118  ;;  %790 = vst [vmem:[%s1589_s3 + $0x1b0] sm:$0xff] %v1117_v4  ;;  %1144 = vtanh.f32 %v645_v0  ;;  %v529_v8 = vpop.f32.mrf.mxu0 }
 0x111   :  { %v657_v9 = vpop.f32.mrf.mxu1  ;;  %v1121_v10 = vpop.eup %1120  ;;  %756 = vst [vmem:[%s1589_s3 + $0xa0] sm:$0xff] %v1119_v7  ;;  %1146 = vtanh.f32 %v538_v5  ;;  %v530_v11 = vadd.f32 %v1328_v38, %v529_v8 }
 0x112   :  { %v658_v12 = vadd.f32 %v1328_v38, %v657_v9  ;;  %v1123_v13 = vpop.eup %1122  ;;  %788 = vst [vmem:[%s1589_s3 + $0x1a0] sm:$0xff] %v1121_v10  ;;  %1148 = vtanh.f32 %v666_v6  ;;  %v952_v14 = vpop.f32.mrf.mxu0 }
 0x113   :  { %v984_v15 = vpop.f32.mrf.mxu1  ;;  %v1125_v16 = vpop.eup %1124  ;;  %759 = vst [vmem:[%s1589_s3 + $0xb8] sm:$0xff] %v1123_v13  ;;  %1150 = vtanh.f32 %v530_v11  ;;  %v541_v17 = vadd.f32 %v952_v14, %v1328_v38 }
 0x114   :  { %v669_v18 = vadd.f32 %v984_v15, %v1328_v38  ;;  %v1127_v19 = vpop.eup %1126  ;;  %791 = vst [vmem:[%s1589_s3 + $0x1b8] sm:$0xff] %v1125_v16  ;;  %1152 = vtanh.f32 %v658_v12  ;;  %v532_v20 = vpop.f32.mrf.mxu0 }
 0x115   :  { %v660_v21 = vpop.f32.mrf.mxu1  ;;  %v1129_v22 = vpop.eup %1128  ;;  %757 = vst [vmem:[%s1589_s3 + $0xa8] sm:$0xff] %v1127_v19  ;;  %1154 = vtanh.f32 %v541_v17  ;;  %v533_v23 = vadd.f32 %v1328_v38, %v532_v20 }
 0x116   :  { %v661_v24 = vadd.f32 %v1328_v38, %v660_v21  ;;  %v1131_v25 = vpop.eup %1130  ;;  %789 = vst [vmem:[%s1589_s3 + $0x1a8] sm:$0xff] %v1129_v22  ;;  %1156 = vtanh.f32 %v669_v18 }
 0x117   :  { %v1133_v26 = vpop.eup %1132  ;;  %762 = vst [vmem:[%s1589_s3 + $0xd0] sm:$0xff] %v1131_v25  ;;  %1158 = vtanh.f32 %v533_v23 }
 0x118   :  { %v1135_v27 = vpop.eup %1134  ;;  %794 = vst [vmem:[%s1589_s3 + $0x1d0] sm:$0xff] %v1133_v26  ;;  %1160 = vtanh.f32 %v661_v24 }
 0x119   :  { %v1137_v28 = vpop.eup %1136  ;;  %760 = vst [vmem:[%s1589_s3 + $0xc0] sm:$0xff] %v1135_v27 }
 0x11a   :  { %v1139_v38 = vpop.eup %1138  ;;  %792 = vst [vmem:[%s1589_s3 + $0x1c0] sm:$0xff] %v1137_v28 }
 0x11b   :  { %v1141_v29 = vpop.eup %1140  ;;  %763 = vst [vmem:[%s1589_s3 + $0xd8] sm:$0xff] %v1139_v38 }
 0x11c   :  { %v1143_v30 = vpop.eup %1142  ;;  %795 = vst [vmem:[%s1589_s3 + $0x1d8] sm:$0xff] %v1141_v29 }
 0x11d   :  { %v1145_v31 = vpop.eup %1144  ;;  %761 = vst [vmem:[%s1589_s3 + $0xc8] sm:$0xff] %v1143_v30 }
 0x11e   :  { %v1147_v32 = vpop.eup %1146  ;;  %793 = vst [vmem:[%s1589_s3 + $0x1c8] sm:$0xff] %v1145_v31 }
 0x11f   :  { %v1149_v33 = vpop.eup %1148  ;;  %766 = vst [vmem:[%s1589_s3 + $0xf0] sm:$0xff] %v1147_v32 }
 0x120   :  { %v1151_v34 = vpop.eup %1150  ;;  %798 = vst [vmem:[%s1589_s3 + $0x1f0] sm:$0xff] %v1149_v33 }
 0x121   :  { %v1153_v35 = vpop.eup %1152  ;;  %764 = vst [vmem:[%s1589_s3 + $0xe0] sm:$0xff] %v1151_v34 }
 0x122   :  { %v1155_v36 = vpop.eup %1154  ;;  %796 = vst [vmem:[%s1589_s3 + $0x1e0] sm:$0xff] %v1153_v35 }
 0x123   :  { %v1157_v37 = vpop.eup %1156  ;;  %767 = vst [vmem:[%s1589_s3 + $0xf8] sm:$0xff] %v1155_v36 }
 0x124   :  { %v1159_v39 = vpop.eup %1158  ;;  %799 = vst [vmem:[%s1589_s3 + $0x1f8] sm:$0xff] %v1157_v37 }
 0x125   :  { %v1161_v40 = vpop.eup %1160  ;;  %765 = vst [vmem:[%s1589_s3 + $0xe8] sm:$0xff] %v1159_v39 }
 0x126   :  { %797 = vst [vmem:[%s1589_s3 + $0x1e8] sm:$0xff] %v1161_v40 }

</bundles_post_ra>
